<compile_context>
chip_gen: v7x
topology: tpu7x:2x2x1
jax: 0.10.0
libtpu: 0.0.40
codegen_flags: <defaults>
</compile_context>

<pallas_src>
import math

import jax
import jax.numpy as jnp
from jax.experimental import pallas as pl
from jax.experimental.pallas import tpu as pltpu

# ---------------- configuration (CLIPNeRF defaults, scaled down) -----------
INPUT_CH        = 3
INPUT_CH_VIEWS  = 3
STYLE_DIM       = 32      # shape code width  (styles[:, :STYLE_DIM])
APPEAR_DIM      = 32      # appearance code width (styles[:, STYLE_DIM:])
EMBED_DIM       = 32
STYLE_DEPTH     = 1
W_DEFORM, D_DEFORM = 64, 4
W_NERF,   D_NERF   = 64, 8
SKIP            = (4,)
W_BOTTLENECK    = 8
W_RGB, D_RGB    = 64, 2
OUT_CH          = 4       # cat([rgb(3), sigma(1)])
LANES           = 128     # every padded activation / weight slot is 128 lanes wide
CONST_LANE      = LANES - 1   # lane that always holds 1.0 (bias folding)

# lane layout of the padded input: [pts | views | shape code | appearance code | 0 | 1]
PTS_OFF, VIEWS_OFF = 0, INPUT_CH
SC_OFF = INPUT_CH + INPUT_CH_VIEWS
AC_OFF = SC_OFF + STYLE_DIM
IN_WIDTH = AC_OFF + APPEAR_DIM
# lane layout of the fused StyleMLP output: [shape_code1 | shape_code2 | appearance]
SC1_OFF, SC2_OFF, ACODE_OFF = 0, EMBED_DIM, 2 * EMBED_DIM
# lane layout of the fused sigma/feature head: [feature | sigma]
FEAT_OFF, SIGMA_LANE = 0, W_BOTTLENECK
# lane of the final fused output that carries sigma (right next to rgb 0:3)
SIGMA_OUT_LANE = 3

assert IN_WIDTH < CONST_LANE
assert 3 * EMBED_DIM < CONST_LANE and W_BOTTLENECK + 1 < CONST_LANE
assert max(W_DEFORM, W_NERF, W_RGB) < CONST_LANE
assert STYLE_DEPTH == 1  # TODO(synk): deeper StyleMLPs would need extra layers.


def _expected_weight_rows():
    """Total K rows of the packed weight slab (one 128-row block per operand)."""
    n = 1                                             # style (x)
    n += 2                                            # deform0 (x, style)
    n += (D_DEFORM - 2) + 1                           # deform hidden + last
    n += 2                                            # fusion (h, style)
    n += 1                                            # pts0
    n += sum(2 if (i - 1) in SKIP else 1 for i in range(1, D_NERF))
    n += 1                                            # feature|sigma head
    n += 3                                            # rgb0 (x, head, style)
    n += (D_RGB - 2)                                  # rgb hidden
    n += 2                                            # rgbout fused w/ sigma copy
    return n * LANES


def _make_take_w(w):
    """Sequential consumer of the packed weight slab (works on Ref or array)."""
    cursor = [0]

    def take_w(n_operands):
        k = n_operands * LANES
        off = cursor[0]
        cursor[0] = off + k
        return w[off:off + k, :]                      # static row slice

    return take_w


# --------------------- shared padded network body ---------------------------
def _padded_forward(x, take_w):
    """Network body on 128-lane padded activations (lane 127 of x is 1.0).

    All biases are folded into the weight slabs via the constant lane; every
    layer is a single bf16 MXU matmul with f32 accumulation.  Multi-operand
    (torch.cat) layers are K-fused by lane-concatenating the operand tiles.
    Returns the final [*, 128] f32 tile: lanes 0:3 = rgb, lane 3 = sigma.
    """
    relu = lambda v: jnp.maximum(v, 0.0)
    bf16 = jnp.bfloat16

    def matmul(acts_bf):
        w = take_w(len(acts_bf))                       # [(n*128), 128] bf16
        lhs = acts_bf[0] if len(acts_bf) == 1 else jnp.concatenate(acts_bf, axis=-1)
        return jnp.dot(lhs, w, preferred_element_type=jnp.float32)

    x_bf = x.astype(bf16)                              # cast once, reused 4x

    # fused StyleMLPs: shape_linear1 | shape_linear2 | appearance_linear
    style_bf = relu(matmul([x_bf])).astype(bf16)

    # deformation network; layer 0 consumes cat(input_pts, shape_code1)
    h = relu(matmul([x_bf, style_bf])).astype(bf16)
    for _ in range(D_DEFORM - 2):
        h = relu(matmul([h])).astype(bf16)
    h = relu(matmul([h])).astype(bf16)                 # -> input_ch lanes

    # shape_fusion on cat(h, shape_code2), residual deformation of pts (f32 add)
    new_pts_bf = (x + jnp.tanh(matmul([h, style_bf]))).astype(bf16)

    # NeRF trunk with skip re-injection of the original input_pts
    h = relu(matmul([new_pts_bf])).astype(bf16)
    for i in range(1, D_NERF):
        if (i - 1) in SKIP:
            h = relu(matmul([x_bf, h])).astype(bf16)
        else:
            h = relu(matmul([h])).astype(bf16)

    head_bf = matmul([h]).astype(bf16)                 # fused [feature | sigma], no relu

    # rgb branch on cat(input_views, feature, appearance_code)
    r = relu(matmul([x_bf, head_bf, style_bf])).astype(bf16)
    for _ in range(D_RGB - 2):
        r = relu(matmul([r])).astype(bf16)

    # final layer fused with the sigma copy -> lanes [rgb(0:3) | sigma(3) | 0...]
    return matmul([r, head_bf])


# ---------------------------- Pallas kernel --------------------------------
def _clipnerf_kernel(inp_ref, w_ref, out_ref):
    x = inp_ref[...]                                   # [TN, 128] f32
    out = _padded_forward(x, _make_take_w(w_ref))      # [TN, 128] f32, lane-dense
    out_ref[...] = out.astype(out_ref.dtype)           # single unmasked full-tile store


# ------------------------------ wrapper -------------------------------------
def _pad_inputs(x, styles):
    n = x.shape[0]
    zeros = jnp.zeros((n, LANES - IN_WIDTH - 1), x.dtype)
    ones = jnp.ones((n, 1), x.dtype)                   # constant lane for bias folding
    return jnp.concatenate([x, styles, zeros, ones], axis=-1)   # (N, 128)


def clipnerf_forward(x, styles, wpack, *, block_n=2048):
    """Fused CLIPNeRF forward. Returns [N, 4] = cat(rgb, sigma)."""
    N = x.shape[0]
    inp = _pad_inputs(x.astype(jnp.float32), styles.astype(jnp.float32))

    # Big tiles amortise the ~0.35us/step pipeline overhead, but keep >= 4 grid
    # steps at large N so v7x's two TensorCores each get >= 2 steps and the
    # input/weight prologue DMAs hide under the previous step's compute.
    if N >= 4 * 512:
        block_n = min(block_n, -(-N // 4))
    block_n = max(8, min(block_n, N))
    block_n = -(-block_n // 8) * 8                     # sublane-align

    k_total = wpack.shape[0]
    padded_out = pl.pallas_call(
        _clipnerf_kernel,
        out_shape=jax.ShapeDtypeStruct((N, LANES), jnp.float32),
        grid_spec=pltpu.PrefetchScalarGridSpec(
            num_scalar_prefetch=0,
            grid=(pl.cdiv(N, block_n),),
            in_specs=[
                pl.BlockSpec((block_n, LANES), lambda n: (n, 0)),
                # packed weights: constant block index -> fetched once, not per step
                pl.BlockSpec((k_total, LANES), lambda n: (0, 0)),
            ],
            # lane-dense full-width output tile (sliced to [:, :4] below)
            out_specs=pl.BlockSpec((block_n, LANES), lambda n: (n, 0)),
        ),
        compiler_params=pltpu.CompilerParams(
            dimension_semantics=("parallel",),
            vmem_limit_bytes=48 * 1024 * 1024,
        ),
    )(inp, wpack)
    return padded_out[:, :OUT_CH]


# ------------------------- parameter construction --------------------------
def init_raw_params(key):
    """Per-layer parameters (torch.nn.Linear-style init), keyed by name."""
    def linear(k, fan_in, fan_out):
        kw, kb = jax.random.split(k)
        bound = 1.0 / math.sqrt(fan_in)
        w = jax.random.uniform(kw, (fan_in, fan_out), jnp.float32, -bound, bound)
        b = jax.random.uniform(kb, (fan_out,), jnp.float32, -bound, bound)
        return w, b

    keys = iter(jax.random.split(key, 32))
    nk = lambda: next(keys)
    raw = {}
    raw['style1_w'], raw['style1_b'] = linear(nk(), STYLE_DIM, EMBED_DIM)
    raw['style2_w'], raw['style2_b'] = linear(nk(), STYLE_DIM, EMBED_DIM)
    raw['app_w'],    raw['app_b']    = linear(nk(), APPEAR_DIM, EMBED_DIM)
    raw['deform0_w'], raw['deform0_b'] = linear(nk(), INPUT_CH + EMBED_DIM, W_DEFORM)
    for i in range(1, D_DEFORM - 1):
        raw[f'deform{i}_w'], raw[f'deform{i}_b'] = linear(nk(), W_DEFORM, W_DEFORM)
    raw[f'deform{D_DEFORM-1}_w'], raw[f'deform{D_DEFORM-1}_b'] = \
        linear(nk(), W_DEFORM, INPUT_CH)
    raw['fusion_w'], raw['fusion_b'] = linear(nk(), INPUT_CH + EMBED_DIM, INPUT_CH)
    raw['pts0_w'], raw['pts0_b'] = linear(nk(), INPUT_CH, W_NERF)
    for i in range(1, D_NERF):
        fan_in = INPUT_CH + W_NERF if (i - 1) in SKIP else W_NERF
        raw[f'pts{i}_w'], raw[f'pts{i}_b'] = linear(nk(), fan_in, W_NERF)
    raw['sigma_w'], raw['sigma_b'] = linear(nk(), W_NERF, 1)
    raw['feat_w'],  raw['feat_b']  = linear(nk(), W_NERF, W_BOTTLENECK)
    raw['rgb0_w'], raw['rgb0_b'] = linear(
        nk(), INPUT_CH_VIEWS + W_BOTTLENECK + EMBED_DIM, W_RGB)
    for i in range(1, D_RGB - 1):
        raw[f'rgb{i}_w'], raw[f'rgb{i}_b'] = linear(nk(), W_RGB, W_RGB)
    raw['rgbout_w'], raw['rgbout_b'] = linear(nk(), W_RGB, 3)
    return raw


def pack_params(raw, w_dtype=jnp.bfloat16):
    """Pack all layer weights AND biases into one [K_total, 128] slab.

    One 128x128 block per operand of each layer, stacked along K in the exact
    order / operand grouping that _padded_forward consumes them.  Biases live
    in row CONST_LANE of exactly one operand block per layer (the "carrier");
    [CONST_LANE, CONST_LANE] = 1.0 where the layer's output must keep carrying
    the constant-1 lane forward.
    """
    slabs = []
    blk = lambda: jnp.zeros((LANES, LANES), jnp.float32)

    def add(*operand_blocks):
        slabs.extend(operand_blocks)

    # --- fused StyleMLPs (operand: x; x carries the bias; no const propagation)
    b = blk()
    b = b.at[SC_OFF:SC_OFF + STYLE_DIM, SC1_OFF:SC1_OFF + EMBED_DIM].set(raw['style1_w'])
    b = b.at[SC_OFF:SC_OFF + STYLE_DIM, SC2_OFF:SC2_OFF + EMBED_DIM].set(raw['style2_w'])
    b = b.at[AC_OFF:AC_OFF + APPEAR_DIM, ACODE_OFF:ACODE_OFF + EMBED_DIM].set(raw['app_w'])
    b = b.at[CONST_LANE, SC1_OFF:SC1_OFF + EMBED_DIM].set(raw['style1_b'])
    b = b.at[CONST_LANE, SC2_OFF:SC2_OFF + EMBED_DIM].set(raw['style2_b'])
    b = b.at[CONST_LANE, ACODE_OFF:ACODE_OFF + EMBED_DIM].set(raw['app_b'])
    add(b)

    # --- deform0 (operands: x, style); x carries bias + const propagation
    bx = blk()
    bx = bx.at[PTS_OFF:PTS_OFF + INPUT_CH, 0:W_DEFORM].set(raw['deform0_w'][:INPUT_CH])
    bx = bx.at[CONST_LANE, 0:W_DEFORM].set(raw['deform0_b'])
    bx = bx.at[CONST_LANE, CONST_LANE].set(1.0)
    bs = blk()
    bs = bs.at[SC1_OFF:SC1_OFF + EMBED_DIM, 0:W_DEFORM].set(raw['deform0_w'][INPUT_CH:])
    add(bx, bs)

    # --- deform hidden layers
    for i in range(1, D_DEFORM - 1):
        b = blk()
        b = b.at[0:W_DEFORM, 0:W_DEFORM].set(raw[f'deform{i}_w'])
        b = b.at[CONST_LANE, 0:W_DEFORM].set(raw[f'deform{i}_b'])
        b = b.at[CONST_LANE, CONST_LANE].set(1.0)
        add(b)
    # --- deform last (outputs input_ch lanes)
    b = blk()
    b = b.at[0:W_DEFORM, 0:INPUT_CH].set(raw[f'deform{D_DEFORM-1}_w'])
    b = b.at[CONST_LANE, 0:INPUT_CH].set(raw[f'deform{D_DEFORM-1}_b'])
    b = b.at[CONST_LANE, CONST_LANE].set(1.0)
    add(b)

    # --- shape_fusion (operands: h, style); h carries bias; output const lane
    #     must stay 0 so new_pts lane127 = x lane127 + tanh(0) = 1.0
    bh = blk()
    bh = bh.at[0:INPUT_CH, 0:INPUT_CH].set(raw['fusion_w'][:INPUT_CH])
    bh = bh.at[CONST_LANE, 0:INPUT_CH].set(raw['fusion_b'])
    bs = blk()
    bs = bs.at[SC2_OFF:SC2_OFF + EMBED_DIM, 0:INPUT_CH].set(raw['fusion_w'][INPUT_CH:])
    add(bh, bs)

    # --- NeRF trunk
    b = blk()
    b = b.at[0:INPUT_CH, 0:W_NERF].set(raw['pts0_w'])
    b = b.at[CONST_LANE, 0:W_NERF].set(raw['pts0_b'])
    b = b.at[CONST_LANE, CONST_LANE].set(1.0)
    add(b)
    for i in range(1, D_NERF):
        w, bias = raw[f'pts{i}_w'], raw[f'pts{i}_b']
        if (i - 1) in SKIP:
            bx = blk()
            bx = bx.at[PTS_OFF:PTS_OFF + INPUT_CH, 0:W_NERF].set(w[:INPUT_CH])
            # x also has the const lane -> bias/propagation live only in the h block
            bh = blk()
            bh = bh.at[0:W_NERF, 0:W_NERF].set(w[INPUT_CH:])
            bh = bh.at[CONST_LANE, 0:W_NERF].set(bias)
            bh = bh.at[CONST_LANE, CONST_LANE].set(1.0)
            add(bx, bh)
        else:
            b = blk()
            b = b.at[0:W_NERF, 0:W_NERF].set(w)
            b = b.at[CONST_LANE, 0:W_NERF].set(bias)
            b = b.at[CONST_LANE, CONST_LANE].set(1.0)
            add(b)

    # --- fused feature + sigma head (no relu, no const propagation needed)
    b = blk()
    b = b.at[0:W_NERF, FEAT_OFF:FEAT_OFF + W_BOTTLENECK].set(raw['feat_w'])
    b = b.at[0:W_NERF, SIGMA_LANE:SIGMA_LANE + 1].set(raw['sigma_w'])
    b = b.at[CONST_LANE, FEAT_OFF:FEAT_OFF + W_BOTTLENECK].set(raw['feat_b'])
    b = b.at[CONST_LANE, SIGMA_LANE].set(raw['sigma_b'][0])
    add(b)

    # --- rgb0 (operands: x, head, style); x carries bias + const propagation
    bx = blk()
    bx = bx.at[VIEWS_OFF:VIEWS_OFF + INPUT_CH_VIEWS, 0:W_RGB].set(
        raw['rgb0_w'][:INPUT_CH_VIEWS])
    bx = bx.at[CONST_LANE, 0:W_RGB].set(raw['rgb0_b'])
    bx = bx.at[CONST_LANE, CONST_LANE].set(1.0)
    bhd = blk()
    bhd = bhd.at[FEAT_OFF:FEAT_OFF + W_BOTTLENECK, 0:W_RGB].set(
        raw['rgb0_w'][INPUT_CH_VIEWS:INPUT_CH_VIEWS + W_BOTTLENECK])
    bs = blk()
    bs = bs.at[ACODE_OFF:ACODE_OFF + EMBED_DIM, 0:W_RGB].set(
        raw['rgb0_w'][INPUT_CH_VIEWS + W_BOTTLENECK:])
    add(bx, bhd, bs)

    # --- rgb hidden layers (none for D_RGB=2)
    for i in range(1, D_RGB - 1):
        b = blk()
        b = b.at[0:W_RGB, 0:W_RGB].set(raw[f'rgb{i}_w'])
        b = b.at[CONST_LANE, 0:W_RGB].set(raw[f'rgb{i}_b'])
        b = b.at[CONST_LANE, CONST_LANE].set(1.0)
        add(b)

    # --- final rgb layer fused with the sigma copy (operands: r, head)
    br = blk()
    br = br.at[0:W_RGB, 0:3].set(raw['rgbout_w'])
    br = br.at[CONST_LANE, 0:3].set(raw['rgbout_b'])
    bhd = blk()
    bhd = bhd.at[SIGMA_LANE, SIGMA_OUT_LANE].set(1.0)   # copy sigma -> output lane 3
    add(br, bhd)

    wpack = jnp.concatenate(slabs, axis=0).astype(w_dtype)
    assert wpack.shape == (_expected_weight_rows(), LANES), wpack.shape
    return wpack


# ------------------------- pure-JAX references -------------------------------
def ref_forward_padded(x, styles, wpack):
    """Same padded / bf16-operand computation as the kernel, in plain jnp."""
    inp = _pad_inputs(x.astype(jnp.float32), styles.astype(jnp.float32))
    out = _padded_forward(inp, _make_take_w(wpack))
    return out[:, :OUT_CH]


def ref_forward_f32(x, styles, raw):
    """Independent unpacked float32 reference (validates packing + fusions)."""
    pts, views = x[:, :INPUT_CH], x[:, INPUT_CH:INPUT_CH + INPUT_CH_VIEWS]
    sc, ac = styles[:, :STYLE_DIM], styles[:, STYLE_DIM:]
    relu = lambda v: jnp.maximum(v, 0.0)
    lin = lambda v, w, b: v @ w + b

    sc1 = relu(lin(sc, raw['style1_w'], raw['style1_b']))
    sc2 = relu(lin(sc, raw['style2_w'], raw['style2_b']))
    acode = relu(lin(ac, raw['app_w'], raw['app_b']))

    h = relu(lin(jnp.concatenate([pts, sc1], -1), raw['deform0_w'], raw['deform0_b']))
    for i in range(1, D_DEFORM):
        h = relu(lin(h, raw[f'deform{i}_w'], raw[f'deform{i}_b']))
    f = lin(jnp.concatenate([h, sc2], -1), raw['fusion_w'], raw['fusion_b'])
    new_pts = pts + jnp.tanh(f)

    h = relu(lin(new_pts, raw['pts0_w'], raw['pts0_b']))
    for i in range(1, D_NERF):
        if (i - 1) in SKIP:
            h = relu(lin(jnp.concatenate([pts, h], -1),
                         raw[f'pts{i}_w'], raw[f'pts{i}_b']))
        else:
            h = relu(lin(h, raw[f'pts{i}_w'], raw[f'pts{i}_b']))

    sigma = lin(h, raw['sigma_w'], raw['sigma_b'])
    feat = lin(h, raw['feat_w'], raw['feat_b'])
    r = relu(lin(jnp.concatenate([views, feat, acode], -1),
                 raw['rgb0_w'], raw['rgb0_b']))
    for i in range(1, D_RGB - 1):
        r = relu(lin(r, raw[f'rgb{i}_w'], raw[f'rgb{i}_b']))
    rgb = lin(r, raw['rgbout_w'], raw['rgbout_b'])
    return jnp.concatenate([rgb, sigma], -1)


# --------------------------------- main --------------------------------------
if __name__ == "__main__":
    key = jax.random.PRNGKey(0)
    k_x, k_s, k_p = jax.random.split(key, 3)

    N = 640                                 # deliberately NOT a multiple of block_n
    x = jax.random.normal(k_x, (N, INPUT_CH + INPUT_CH_VIEWS), jnp.float32)
    styles = jax.random.normal(k_s, (N, STYLE_DIM + APPEAR_DIM), jnp.float32)

    raw = init_raw_params(k_p)
    wpack = pack_params(raw)

    # block_n=256 -> 3 grid steps, last block partial (exercises clipped writeback).
    out = clipnerf_forward(x, styles, wpack, block_n=256)
    out = jax.block_until_ready(out)
    assert out.shape == (N, OUT_CH), out.shape

    # 1) kernel vs identical padded/bf16 jnp computation (tight)
    ref_pad = ref_forward_padded(x, styles, wpack)
    err_pad = float(jnp.max(jnp.abs(out - ref_pad)))
    assert err_pad < 1e-3, f"kernel vs padded reference mismatch: {err_pad}"

    # 2) kernel vs independent unpacked f32 reference (validates packing/fusions)
    ref_f32 = ref_forward_f32(x, styles, raw)
    err_f32 = float(jnp.max(jnp.abs(out - ref_f32)))
    assert err_f32 < 3e-2, f"kernel vs f32 reference mismatch: {err_f32}"

    print("KERNEL_OK")
</pallas_src>

<mosaic_0001>
module attributes {stable_mosaic.version = 11 : i64} {
  func.func @_clipnerf_kernel(%arg0: i32, %arg1: memref<256x128xf32, #tpu.memory_space<vmem>>, %arg2: memref<2944x128xbf16, #tpu.memory_space<vmem>>, %arg3: memref<256x128xf32, #tpu.memory_space<vmem>>) attributes {dimension_semantics = [#tpu.dimension_semantics<parallel>], iteration_bounds = array<i64: 3>, scalar_prefetch = 0 : i64, scratch_operands = 0 : i64, tpu.core_type = #tpu.core_type<tc>, window_params = [{transform_indices = @transform_0, window_bounds = array<i64: 256, 128>}, {pipeline_mode = #tpu.pipeline_mode<synchronous>, transform_indices = @transform_1, window_bounds = array<i64: 2944, 128>}, {transform_indices = @transform_2, window_bounds = array<i64: 256, 128>}]} {
    %c0 = arith.constant 0 : index
    %c0_0 = arith.constant 0 : index
    %0 = vector.load %arg1[%c0, %c0_0] : memref<256x128xf32, #tpu.memory_space<vmem>>, vector<256x128xf32>
    %1 = arith.truncf %0 : vector<256x128xf32> to vector<256x128xbf16>
    %c0_1 = arith.constant 0 : index
    %c0_2 = arith.constant 0 : index
    %2 = vector.load %arg2[%c0_1, %c0_2] : memref<2944x128xbf16, #tpu.memory_space<vmem>>, vector<128x128xbf16>
    %cst = arith.constant dense<0.000000e+00> : vector<256x128xf32>
    %3 = tpu.matmul %1, %2, %cst {dimension_numbers = #tpu.dot_dimension_numbers<[1], [0], [0], [1], [0, 0, 1, 1], [], []>} : vector<256x128xbf16>, vector<128x128xbf16>, vector<256x128xf32> -> vector<256x128xf32>
    %cst_3 = arith.constant 0.000000e+00 : f32
    %4 = vector.broadcast %cst_3 : f32 to vector<256x128xf32>
    %5 = arith.maximumf %3, %4 : vector<256x128xf32>
    %6 = arith.truncf %5 : vector<256x128xf32> to vector<256x128xbf16>
    %c128 = arith.constant 128 : index
    %c0_4 = arith.constant 0 : index
    %7 = vector.load %arg2[%c128, %c0_4] : memref<2944x128xbf16, #tpu.memory_space<vmem>>, vector<256x128xbf16>
    %8 = tpu.concatenate %1, %6 in 1 : vector<256x128xbf16>, vector<256x128xbf16> -> vector<256x256xbf16>
    %cst_5 = arith.constant dense<0.000000e+00> : vector<256x128xf32>
    %9 = tpu.matmul %8, %7, %cst_5 {dimension_numbers = #tpu.dot_dimension_numbers<[1], [0], [0], [1], [0, 0, 1, 1], [], []>} : vector<256x256xbf16>, vector<256x128xbf16>, vector<256x128xf32> -> vector<256x128xf32>
    %cst_6 = arith.constant 0.000000e+00 : f32
    %10 = vector.broadcast %cst_6 : f32 to vector<256x128xf32>
    %11 = arith.maximumf %9, %10 : vector<256x128xf32>
    %12 = arith.truncf %11 : vector<256x128xf32> to vector<256x128xbf16>
    %c384 = arith.constant 384 : index
    %c0_7 = arith.constant 0 : index
    %13 = vector.load %arg2[%c384, %c0_7] : memref<2944x128xbf16, #tpu.memory_space<vmem>>, vector<128x128xbf16>
    %cst_8 = arith.constant dense<0.000000e+00> : vector<256x128xf32>
    %14 = tpu.matmul %12, %13, %cst_8 {dimension_numbers = #tpu.dot_dimension_numbers<[1], [0], [0], [1], [0, 0, 1, 1], [], []>} : vector<256x128xbf16>, vector<128x128xbf16>, vector<256x128xf32> -> vector<256x128xf32>
    %cst_9 = arith.constant 0.000000e+00 : f32
    %15 = vector.broadcast %cst_9 : f32 to vector<256x128xf32>
    %16 = arith.maximumf %14, %15 : vector<256x128xf32>
    %17 = arith.truncf %16 : vector<256x128xf32> to vector<256x128xbf16>
    %c512 = arith.constant 512 : index
    %c0_10 = arith.constant 0 : index
    %18 = vector.load %arg2[%c512, %c0_10] : memref<2944x128xbf16, #tpu.memory_space<vmem>>, vector<128x128xbf16>
    %cst_11 = arith.constant dense<0.000000e+00> : vector<256x128xf32>
    %19 = tpu.matmul %17, %18, %cst_11 {dimension_numbers = #tpu.dot_dimension_numbers<[1], [0], [0], [1], [0, 0, 1, 1], [], []>} : vector<256x128xbf16>, vector<128x128xbf16>, vector<256x128xf32> -> vector<256x128xf32>
    %cst_12 = arith.constant 0.000000e+00 : f32
    %20 = vector.broadcast %cst_12 : f32 to vector<256x128xf32>
    %21 = arith.maximumf %19, %20 : vector<256x128xf32>
    %22 = arith.truncf %21 : vector<256x128xf32> to vector<256x128xbf16>
    %c640 = arith.constant 640 : index
    %c0_13 = arith.constant 0 : index
    %23 = vector.load %arg2[%c640, %c0_13] : memref<2944x128xbf16, #tpu.memory_space<vmem>>, vector<128x128xbf16>
    %cst_14 = arith.constant dense<0.000000e+00> : vector<256x128xf32>
    %24 = tpu.matmul %22, %23, %cst_14 {dimension_numbers = #tpu.dot_dimension_numbers<[1], [0], [0], [1], [0, 0, 1, 1], [], []>} : vector<256x128xbf16>, vector<128x128xbf16>, vector<256x128xf32> -> vector<256x128xf32>
    %cst_15 = arith.constant 0.000000e+00 : f32
    %25 = vector.broadcast %cst_15 : f32 to vector<256x128xf32>
    %26 = arith.maximumf %24, %25 : vector<256x128xf32>
    %27 = arith.truncf %26 : vector<256x128xf32> to vector<256x128xbf16>
    %c768 = arith.constant 768 : index
    %c0_16 = arith.constant 0 : index
    %28 = vector.load %arg2[%c768, %c0_16] : memref<2944x128xbf16, #tpu.memory_space<vmem>>, vector<256x128xbf16>
    %29 = tpu.concatenate %27, %6 in 1 : vector<256x128xbf16>, vector<256x128xbf16> -> vector<256x256xbf16>
    %cst_17 = arith.constant dense<0.000000e+00> : vector<256x128xf32>
    %30 = tpu.matmul %29, %28, %cst_17 {dimension_numbers = #tpu.dot_dimension_numbers<[1], [0], [0], [1], [0, 0, 1, 1], [], []>} : vector<256x256xbf16>, vector<256x128xbf16>, vector<256x128xf32> -> vector<256x128xf32>
    %31 = math.tanh %30 : vector<256x128xf32>
    %32 = arith.addf %0, %31 : vector<256x128xf32>
    %33 = arith.truncf %32 : vector<256x128xf32> to vector<256x128xbf16>
    %c1024 = arith.constant 1024 : index
    %c0_18 = arith.constant 0 : index
    %34 = vector.load %arg2[%c1024, %c0_18] : memref<2944x128xbf16, #tpu.memory_space<vmem>>, vector<128x128xbf16>
    %cst_19 = arith.constant dense<0.000000e+00> : vector<256x128xf32>
    %35 = tpu.matmul %33, %34, %cst_19 {dimension_numbers = #tpu.dot_dimension_numbers<[1], [0], [0], [1], [0, 0, 1, 1], [], []>} : vector<256x128xbf16>, vector<128x128xbf16>, vector<256x128xf32> -> vector<256x128xf32>
    %cst_20 = arith.constant 0.000000e+00 : f32
    %36 = vector.broadcast %cst_20 : f32 to vector<256x128xf32>
    %37 = arith.maximumf %35, %36 : vector<256x128xf32>
    %38 = arith.truncf %37 : vector<256x128xf32> to vector<256x128xbf16>
    %c1152 = arith.constant 1152 : index
    %c0_21 = arith.constant 0 : index
    %39 = vector.load %arg2[%c1152, %c0_21] : memref<2944x128xbf16, #tpu.memory_space<vmem>>, vector<128x128xbf16>
    %cst_22 = arith.constant dense<0.000000e+00> : vector<256x128xf32>
    %40 = tpu.matmul %38, %39, %cst_22 {dimension_numbers = #tpu.dot_dimension_numbers<[1], [0], [0], [1], [0, 0, 1, 1], [], []>} : vector<256x128xbf16>, vector<128x128xbf16>, vector<256x128xf32> -> vector<256x128xf32>
    %cst_23 = arith.constant 0.000000e+00 : f32
    %41 = vector.broadcast %cst_23 : f32 to vector<256x128xf32>
    %42 = arith.maximumf %40, %41 : vector<256x128xf32>
    %43 = arith.truncf %42 : vector<256x128xf32> to vector<256x128xbf16>
    %c1280 = arith.constant 1280 : index
    %c0_24 = arith.constant 0 : index
    %44 = vector.load %arg2[%c1280, %c0_24] : memref<2944x128xbf16, #tpu.memory_space<vmem>>, vector<128x128xbf16>
    %cst_25 = arith.constant dense<0.000000e+00> : vector<256x128xf32>
    %45 = tpu.matmul %43, %44, %cst_25 {dimension_numbers = #tpu.dot_dimension_numbers<[1], [0], [0], [1], [0, 0, 1, 1], [], []>} : vector<256x128xbf16>, vector<128x128xbf16>, vector<256x128xf32> -> vector<256x128xf32>
    %cst_26 = arith.constant 0.000000e+00 : f32
    %46 = vector.broadcast %cst_26 : f32 to vector<256x128xf32>
    %47 = arith.maximumf %45, %46 : vector<256x128xf32>
    %48 = arith.truncf %47 : vector<256x128xf32> to vector<256x128xbf16>
    %c1408 = arith.constant 1408 : index
    %c0_27 = arith.constant 0 : index
    %49 = vector.load %arg2[%c1408, %c0_27] : memref<2944x128xbf16, #tpu.memory_space<vmem>>, vector<128x128xbf16>
    %cst_28 = arith.constant dense<0.000000e+00> : vector<256x128xf32>
    %50 = tpu.matmul %48, %49, %cst_28 {dimension_numbers = #tpu.dot_dimension_numbers<[1], [0], [0], [1], [0, 0, 1, 1], [], []>} : vector<256x128xbf16>, vector<128x128xbf16>, vector<256x128xf32> -> vector<256x128xf32>
    %cst_29 = arith.constant 0.000000e+00 : f32
    %51 = vector.broadcast %cst_29 : f32 to vector<256x128xf32>
    %52 = arith.maximumf %50, %51 : vector<256x128xf32>
    %53 = arith.truncf %52 : vector<256x128xf32> to vector<256x128xbf16>
    %c1536 = arith.constant 1536 : index
    %c0_30 = arith.constant 0 : index
    %54 = vector.load %arg2[%c1536, %c0_30] : memref<2944x128xbf16, #tpu.memory_space<vmem>>, vector<128x128xbf16>
    %cst_31 = arith.constant dense<0.000000e+00> : vector<256x128xf32>
    %55 = tpu.matmul %53, %54, %cst_31 {dimension_numbers = #tpu.dot_dimension_numbers<[1], [0], [0], [1], [0, 0, 1, 1], [], []>} : vector<256x128xbf16>, vector<128x128xbf16>, vector<256x128xf32> -> vector<256x128xf32>
    %cst_32 = arith.constant 0.000000e+00 : f32
    %56 = vector.broadcast %cst_32 : f32 to vector<256x128xf32>
    %57 = arith.maximumf %55, %56 : vector<256x128xf32>
    %58 = arith.truncf %57 : vector<256x128xf32> to vector<256x128xbf16>
    %c1664 = arith.constant 1664 : index
    %c0_33 = arith.constant 0 : index
    %59 = vector.load %arg2[%c1664, %c0_33] : memref<2944x128xbf16, #tpu.memory_space<vmem>>, vector<256x128xbf16>
    %60 = tpu.concatenate %1, %58 in 1 : vector<256x128xbf16>, vector<256x128xbf16> -> vector<256x256xbf16>
    %cst_34 = arith.constant dense<0.000000e+00> : vector<256x128xf32>
    %61 = tpu.matmul %60, %59, %cst_34 {dimension_numbers = #tpu.dot_dimension_numbers<[1], [0], [0], [1], [0, 0, 1, 1], [], []>} : vector<256x256xbf16>, vector<256x128xbf16>, vector<256x128xf32> -> vector<256x128xf32>
    %cst_35 = arith.constant 0.000000e+00 : f32
    %62 = vector.broadcast %cst_35 : f32 to vector<256x128xf32>
    %63 = arith.maximumf %61, %62 : vector<256x128xf32>
    %64 = arith.truncf %63 : vector<256x128xf32> to vector<256x128xbf16>
    %c1920 = arith.constant 1920 : index
    %c0_36 = arith.constant 0 : index
    %65 = vector.load %arg2[%c1920, %c0_36] : memref<2944x128xbf16, #tpu.memory_space<vmem>>, vector<128x128xbf16>
    %cst_37 = arith.constant dense<0.000000e+00> : vector<256x128xf32>
    %66 = tpu.matmul %64, %65, %cst_37 {dimension_numbers = #tpu.dot_dimension_numbers<[1], [0], [0], [1], [0, 0, 1, 1], [], []>} : vector<256x128xbf16>, vector<128x128xbf16>, vector<256x128xf32> -> vector<256x128xf32>
    %cst_38 = arith.constant 0.000000e+00 : f32
    %67 = vector.broadcast %cst_38 : f32 to vector<256x128xf32>
    %68 = arith.maximumf %66, %67 : vector<256x128xf32>
    %69 = arith.truncf %68 : vector<256x128xf32> to vector<256x128xbf16>
    %c2048 = arith.constant 2048 : index
    %c0_39 = arith.constant 0 : index
    %70 = vector.load %arg2[%c2048, %c0_39] : memref<2944x128xbf16, #tpu.memory_space<vmem>>, vector<128x128xbf16>
    %cst_40 = arith.constant dense<0.000000e+00> : vector<256x128xf32>
    %71 = tpu.matmul %69, %70, %cst_40 {dimension_numbers = #tpu.dot_dimension_numbers<[1], [0], [0], [1], [0, 0, 1, 1], [], []>} : vector<256x128xbf16>, vector<128x128xbf16>, vector<256x128xf32> -> vector<256x128xf32>
    %cst_41 = arith.constant 0.000000e+00 : f32
    %72 = vector.broadcast %cst_41 : f32 to vector<256x128xf32>
    %73 = arith.maximumf %71, %72 : vector<256x128xf32>
    %74 = arith.truncf %73 : vector<256x128xf32> to vector<256x128xbf16>
    %c2176 = arith.constant 2176 : index
    %c0_42 = arith.constant 0 : index
    %75 = vector.load %arg2[%c2176, %c0_42] : memref<2944x128xbf16, #tpu.memory_space<vmem>>, vector<128x128xbf16>
    %cst_43 = arith.constant dense<0.000000e+00> : vector<256x128xf32>
    %76 = tpu.matmul %74, %75, %cst_43 {dimension_numbers = #tpu.dot_dimension_numbers<[1], [0], [0], [1], [0, 0, 1, 1], [], []>} : vector<256x128xbf16>, vector<128x128xbf16>, vector<256x128xf32> -> vector<256x128xf32>
    %77 = arith.truncf %76 : vector<256x128xf32> to vector<256x128xbf16>
    %c2304 = arith.constant 2304 : index
    %c0_44 = arith.constant 0 : index
    %78 = vector.load %arg2[%c2304, %c0_44] : memref<2944x128xbf16, #tpu.memory_space<vmem>>, vector<384x128xbf16>
    %79 = tpu.concatenate %1, %77, %6 in 1 : vector<256x128xbf16>, vector<256x128xbf16>, vector<256x128xbf16> -> vector<256x384xbf16>
    %cst_45 = arith.constant dense<0.000000e+00> : vector<256x128xf32>
    %80 = tpu.matmul %79, %78, %cst_45 {dimension_numbers = #tpu.dot_dimension_numbers<[1], [0], [0], [1], [0, 0, 1, 1], [], []>} : vector<256x384xbf16>, vector<384x128xbf16>, vector<256x128xf32> -> vector<256x128xf32>
    %cst_46 = arith.constant 0.000000e+00 : f32
    %81 = vector.broadcast %cst_46 : f32 to vector<256x128xf32>
    %82 = arith.maximumf %80, %81 : vector<256x128xf32>
    %83 = arith.truncf %82 : vector<256x128xf32> to vector<256x128xbf16>
    %c2688 = arith.constant 2688 : index
    %c0_47 = arith.constant 0 : index
    %84 = vector.load %arg2[%c2688, %c0_47] : memref<2944x128xbf16, #tpu.memory_space<vmem>>, vector<256x128xbf16>
    %85 = tpu.concatenate %83, %77 in 1 : vector<256x128xbf16>, vector<256x128xbf16> -> vector<256x256xbf16>
    %cst_48 = arith.constant dense<0.000000e+00> : vector<256x128xf32>
    %86 = tpu.matmul %85, %84, %cst_48 {dimension_numbers = #tpu.dot_dimension_numbers<[1], [0], [0], [1], [0, 0, 1, 1], [], []>} : vector<256x256xbf16>, vector<256x128xbf16>, vector<256x128xf32> -> vector<256x128xf32>
    %c0_49 = arith.constant 0 : index
    %c0_50 = arith.constant 0 : index
    %87 = vector.load %arg3[%c0_49, %c0_50] : memref<256x128xf32, #tpu.memory_space<vmem>>, vector<256x128xf32>
    tpu.vector_store %arg3[%c0_49, %c0_50], %86 {strides = array<i32>} : memref<256x128xf32, #tpu.memory_space<vmem>>, vector<256x128xf32>,
    return
  }
  func.func @transform_0(%arg0: i32) -> (i32, i32) {
    %c0_i32 = arith.constant 0 : i32
    %c0_i32_0 = arith.constant 0 : i32
    return %arg0, %c0_i32 : i32, i32
  }
  func.func @transform_1(%arg0: i32) -> (i32, i32) {
    %c0_i32 = arith.constant 0 : i32
    %c0_i32_0 = arith.constant 0 : i32
    %c0_i32_1 = arith.constant 0 : i32
    return %c0_i32, %c0_i32_0 : i32, i32
  }
  func.func @transform_2(%arg0: i32) -> (i32, i32) {
    %c0_i32 = arith.constant 0 : i32
    %c0_i32_0 = arith.constant 0 : i32
    return %arg0, %c0_i32 : i32, i32
  }
}

</mosaic_0001>

<bundles_post_ra>
// kernel: tpu_custom_call.1
= control target key start
LH: loop header
LB: loop body
LE: loop exit
PB: predicated region body
PF: predicated region fallthrough
CT: control target
= control target key end

     0   :  { %7 = vsyncpa [#allocation3], 0  ;;  %s8353_s0 = inlined_call_operand.hbm [shape: f32[640,128], index: 0, kind: input, shape index: {}]   ;;  %s8354_s1 = inlined_call_operand.hbm [shape: bf16[2944,128], index: 1, kind: input, shape index: {}]   ;;  %s8355_s2 = inlined_call_operand.hbm [shape: f32[640,128], index: 2, kind: output, shape index: {}]  }
   0x1   :  { %9 = vsyncpa [#allocation3 + $0x1], 0 }
   0x2   :  { %10 = vsyncpa [#allocation6], 0 }
   0x3   :  { %11 = vsyncpa [#allocation4], 0 }
   0x4   :  { %13 = vsyncpa [#allocation4 + $0x1], 0  ;;  %s7725_s9 = smov 0   ;;  %s7727_s10 = smov 0  }
   0x5   :  { %s7729_s11 = smov 0   ;;  %s7731_s12 = smov 0  }
   0x6 LB: > { %s7746_s13 = sadd.s32 4294967295, %s7699_s12   ;;  %s5515_s14 = sadd.s32 4294967294, %s7699_s12   ;;  %s7699_s12 = sphi %s7731_s12, %s8382_s12   ;;  %s7695_s11 = sphi %s7729_s11, %s8381_s11   ;;  %s7691_s10 = sphi %s7727_s10, %s8380_s10   ;;  %s7687_s9 = sphi %s7725_s9, %s8379_s9  }
   0x7   : > { %s7750_s15 = sadd.s32 1, %s7699_s12   ;;  %s26_s16 = sadd.s32 1, %s7695_s11 }
   0x8   : > { %s23_s17 = ssub.s32 %s7699_s12, %s7750_s15  ;;  %p33_p0 = scmp.ne.s32.totalorder %s7695_s11, %s7691_s10 }
   0x9   : > { %p24_p1 = scmp.eq.s32.totalorder %s23_s17, 0  ;;  %p34_p2 = scmp.eq.s32.totalorder %s7699_s12, 0 }
   0xa   : > { %p39_p3 = scmp.ne.s32.totalorder %s7691_s10, %s7687_s9  ;;  %p8356_p4 = scmp.eq.s32.totalorder %s7746_s13, 0 }
   0xb   : > { %s7762_s18 = scalar_select %p24_p1, %s7695_s11, %s26_s16  }
   0xc   : > { %p7764_p5 = por %p34_p2, %p33_p0  ;;  %p7770_p6 = por %p8356_p4, %p39_p3 }
   0xd   : > { %p84_p7 = scmp.eq.s32.totalorder %s7746_s13, 2  ;;  %p90_p8 = scmp.eq.s32.totalorder %s5515_s14, 2 }
   0xe   : > { %s8360_s19 = scalar_select %p7764_p5, 1, 0 }
   0xf   : > { %s8361_s20 = scalar_select %p7770_p6, 1, 0 }
  0x10   : > { %p5516_p9 = scmp.ge.s32.totalorder %s7699_s12, 1  ;;  %p97_p10 = scmp.lt.s32.totalorder %s7699_s12, 4 }
  0x11   : > { %p7777_p11 = por %p84_p7, %p33_p0  ;;  %p7781_p12 = por %p90_p8, %p39_p3 }
  0x12   : > { %p7785_p13 = pnand %p5516_p9, %p97_p10  ;;  %s7701_s24 = smov [#allocation5]  }
  0x13   : > { %s8362_s21 = scalar_select %p7777_p11, 1, 0 }
  0x14   : > { %s8363_s22 = scalar_select %p7781_p12, 1, 0 }
  0x15   : > { %s8364_s23 = scalar_select %p7785_p13, 1, 0 }
  0x16   : > { %p7243_p1 = pneg %p7785_p13  ;;  %s109_s25 = sshll.u32 %s7701_s24, 4  ;;  %s110_s25 = int_to_ptr.vmem [resolvable:$true] %s109_s25 }
  0x17   : > { %s7573_s29 = scalar_lea.hbm %s8354_s1, 23552 }
  0x18   : > { %p7793_p2 = pnand %p7243_p1, %p8356_p4  ;;  %p7574_p0 = scmp.ne.s32.totalorder %s8354_s1, %s7573_s29 }
  0x19   : > { %p7580_p9 = scmp.lt.u32.totalorder %s7573_s29, %s8354_s1 }
  0x1a   : > { %p7575_p3 = pneg %p7793_p2 }
  0x1c   : > { %p7576_p7 = pnand %p7575_p3, %p7574_p0 }
  0x1e   : > { %p7577_p8 = pneg %p7576_p7 }
  0x20   : > { %p7582_p10 = pnand %p7580_p9, %p7577_p8 }
  0x22   : > { %7585 = shalt.err (!%p7582_p10)
}
  0x23   : > { %s7586_s6 = scalar_lea.vmem %s110_s25, 23552  ;;  %p7594_p11 = scmp.lt.s32.totalorder %s110_s25, %s110_s25 }
  0x24   : > { %p7587_p1 = scmp.ne.s32.totalorder %s110_s25, %s7586_s6  ;;  %p7595_p6 = scmp.lt.s32.totalorder %s7586_s6, %s7586_s6 }
  0x26   : > { %p7589_p4 = pnand %p7587_p1, %p7575_p3  ;;  %p7596_p13 = por %p7595_p6, %p7594_p11 }
  0x28   : > { %p7590_p12 = pneg %p7589_p4 }
  0x2a   : > { %p7597_p5 = pnand %p7596_p13, %p7590_p12 }
  0x2c   : > { %7600 = shalt.err (!%p7597_p5)
}
  0x2d   : > { %s7702_s7 = smov 64   ;;  %s7703_s8 = smov 4  }
  0x2e   : > { %7246 = dma.hbm_to_vmem [thread:$0]  (!%p7793_p2), %s8354_s1, 23552, %s110_s25, [#allocation6], %s7702_s7, %s7702_s7, %s7703_s8  }
  0x2f   : > { %p5518_p0 = scmp.ge.s32.totalorder %s7699_s12, 3 }
  0x30   : > { %p8366_p7 = scmp.ne.s32.totalorder (!%p5518_p0), %s8360_s19, 0 }
  0x31   : > { %119 = sbr.rel (%p5518_p0) target bundleno = 91 (0x5b), region = 20 }
  0x38   : > { %122 = sbr.rel (!%p8366_p7) target bundleno = 91 (0x5b), region = 24  ;;  %s123_s17 = sand.u32 (%p8366_p7), 1, %s7695_s11  }
  0x39   : > { %s5520_s24 = sshll.u32 (%p8366_p7), %s7699_s12, 5  ;;  %s5519_s27 = sshll.u32 (%p8366_p7), %s123_s17, 8 }
  0x3a   : > { %s129_s28 = ssub.s32 (%p8366_p7), 80, %s5520_s24  ;;  %s7821_s30 = scalar_lea.sflag (%p8366_p7), [#allocation3], %s123_s17 }
  0x3b   : > { %p130_p4 = scmp.lt.s32.totalorder (%p8366_p7), %s129_s28, 32  ;;  %s127_s25 = scalar_lea.vmem (%p8366_p7), [#allocation2], %s5519_s27 }
  0x3f   : > { %s8384_s28 = smov (!%p130_p4, %s129_s28), 32 }
  0x40   : > { %s7818_s29 = sshll.u32 %s8384_s28, 7 }
  0x41   : > { %s134_s26 = ssub.s32 4096, %s7818_s29 }
  0x42   : > { %135 = vsyncadd %s7821_s30, %s134_s26  ;;  %p5522_p5 = scmp.ne.s32.totalorder %s7818_s29, 0  ;;  %s5723_s19 = sshll.u32 %s7699_s12, 12 }
  0x43   : > { %s7829_s5 = scalar_lea.hbm %s8353_s0, %s5723_s19  ;;  %s140_s6 = sshll.u32 %s127_s25, 4  ;;  %s7831_s6 = int_to_ptr.vmem [resolvable:$true] %s140_s6 }
  0x44   : > { %s7601_s7 = scalar_lea.hbm %s7829_s5, %s7818_s29  ;;  %s7605_s16 = scalar_lea.hbm %s8353_s0, 10240 }
  0x45   : > { %p7602_p6 = scmp.ne.s32.totalorder %s7829_s5, %s7601_s7  ;;  %p7606_p13 = scmp.lt.u32.totalorder %s7829_s5, %s8353_s0 }
  0x46   : > { %p7607_p2 = scmp.lt.u32.totalorder %s7605_s16, %s7601_s7  ;;  %p7609_p8 = scmp.lt.u32.totalorder %s7601_s7, %s7829_s5 }
  0x47   : > { %p7603_p11 = pnand %p7602_p6, %p5522_p5 }
  0x48   : > { %p7608_p3 = por %p7607_p2, %p7606_p13 }
  0x49   : > { %p7604_p12 = pneg %p7603_p11 }
  0x4a   : > { %p7610_p9 = por %p7609_p8, %p7608_p3 }
  0x4c   : > { %p7611_p10 = pnand %p7610_p9, %p7604_p12 }
  0x4e   : > { %7614 = shalt.err (!%p7611_p10)
}
  0x4f   : > { %s7615_s27 = scalar_lea.vmem %s7831_s6, %s7818_s29  ;;  %s7704_s28 = smov [#allocation2]  }
  0x50   : > { %p7616_p1 = scmp.ne.s32.totalorder %s7831_s6, %s7615_s27  ;;  %s7619_s26 = sshll.u32 %s7704_s28, 4  ;;  %s7620_s26 = int_to_ptr.vmem [resolvable:$false] %s7619_s26 }
  0x51   : > { %s7621_s25 = scalar_lea.vmem %s7620_s26, 8192  ;;  %p7622_p4 = scmp.lt.s32.totalorder %s7831_s6, %s7620_s26 }
  0x52   : > { %p7617_p0 = pnand %p7616_p1, %p5522_p5  ;;  %p7623_p6 = scmp.lt.s32.totalorder %s7621_s25, %s7615_s27 }
  0x54   : > { %p7618_p7 = pneg %p7617_p0  ;;  %p7624_p11 = por %p7623_p6, %p7622_p4 }
  0x56   : > { %p7625_p13 = pnand %p7624_p11, %p7618_p7 }
  0x58   : > { %7628 = shalt.err (!%p7625_p13)
}
  0x59   : > { %s7705_s19 = smov 128   ;;  %s7706_s3 = smov 8  }
  0x5a   : > { %146 = dma.hbm_to_vmem [thread:$0]  (%p5522_p5), %s7829_s5, %s7818_s29, %s7831_s6, %s7821_s30, %s7705_s19, %s7705_s19, %s7706_s3  }
  0x5b PF: > { %p8367_p12 = scmp.ne.s32.totalorder %s8364_s23, 0 }
  0x5d   : > { %152 = sbr.rel (%p8367_p12) target bundleno = 4064 (0xfe0), region = 28 }
  0x64   : > { %s7861_s4 = sand.u32 1, %s7691_s10   ;;  %p8368_p2 = scmp.ne.s32.totalorder %s8361_s20, 0 }
  0x65   : > { %s5527_s7 = sshll.u32 %s7861_s4, 8  ;;  %s155_s8 = scalar_lea.sflag [#allocation3], %s7861_s4 }
  0x66   : > { %s7867_s14 = scalar_lea.vmem [#allocation2], %s5527_s7 }
  0x67   : > { %7674 = dma.done.wait (%p8368_p2), %s155_s8, 4096  }
  0x68   : > { %7676 = vsyncadd (%p8368_p2), %s155_s8, 4294963200  ;;  %p8369_p5 = scmp.eq.s32.totalorder %s7746_s13, 0 }
  0x6a   : > { %7678 = dma.done.wait (%p8369_p5), [#allocation6], 23552   ;;  %p8370_p3 = pmov %p8369_p5 }
  0x6b   : > { %v7293_v0 = vld [vmem:[#allocation5] sm:$0xff]   ;;  %v7294_v1 = vld [vmem:[#allocation5 + $0x8] sm:$0xff]   ;;  %v7295_v2 = vld [vmem:[#allocation5 + $0x10] sm:$0xff]   ;;  %s8257_s20 = scalar_lea.vmem [#allocation7], %s5527_s7  ;;  %s5413_s23 = scalar_lea.sflag [#allocation4], %s7861_s4 }
  0x6c   : > { %7680 = vsyncadd (%p8370_p3), [#allocation6], 4294943744  ;;  %6597 = vmatprep.subr.bf16.mxu0 %v7293_v0  ;;  %v7296_v3 = vld [vmem:[#allocation5 + $0x18] sm:$0xff]   ;;  %v194_v4 = vld [vmem:[%s7867_s14] sm:$0xff]  ;;  %p8377_p8 = scmp.ne.s32.totalorder %s8362_s21, 0 }
  0x6d   : > { %6598 = vmatpush3.bf16.msra.mxu0 %v7293_v0  ;;  %v195_v5 = vld [vmem:[%s7867_s14 + $0x8] sm:$0xff]  ;;  %v7297_v7 = vld [vmem:[#allocation5 + $0x20] sm:$0xff]   ;;  %v7299_v9 = vld [vmem:[#allocation5 + $0x30] sm:$0xff]   ;;  %s5715_s29 = sshll.u32 (%p8377_p8), %s7746_s13, 5 }
  0x6e   : > { %6599 = vmatprep.subr.bf16.mxu0 %v7294_v1  ;;  %v7879_v6 = vpack.c.bf16 %v195_v5, %v194_v4  ;;  %v7298_v8 = vld [vmem:[#allocation5 + $0x28] sm:$0xff]   ;;  %v7301_v10 = vld [vmem:[#allocation5 + $0x80] sm:$0xff]   ;;  %v7300_v13 = vld [vmem:[#allocation5 + $0x38] sm:$0xff]   ;;  %s5421_s30 = ssub.s32 (%p8377_p8), 80, %s5715_s29 }
  0x6f   : > { %v7302_v11 = vld [vmem:[#allocation5 + $0x40] sm:$0xff]   ;;  %v7303_v12 = vld [vmem:[#allocation5 + $0x88] sm:$0xff]   ;;  %7221 = vmatprep.subr.bf16.mxu1 %v7301_v10  ;;  %v196_v15 = vld [vmem:[%s7867_s14 + $0x10] sm:$0xff]  ;;  %p5422_p9 = scmp.lt.s32.totalorder (%p8377_p8), %s5421_s30, 32 }
  0x70   : > { %6613 = vmatprep.mubr.bf16.mxu0 %v7879_v6  ;;  %7229 = vmatpush3.bf16.msra.mxu1 %v7302_v11  ;;  %v7304_v14 = vld [vmem:[#allocation5 + $0x48] sm:$0xff]   ;;  %v197_v16 = vld [vmem:[%s7867_s14 + $0x18] sm:$0xff]  ;;  %v7305_v17 = vld [vmem:[#allocation5 + $0x90] sm:$0xff]  }
  0x71   : > { %6600 = vmatpush3.bf16.msra.mxu0 %v7294_v1  ;;  %7222 = vmatprep.subr.bf16.mxu1 %v7303_v12  ;;  %v198_v18 = vld [vmem:[%s7867_s14 + $0x20] sm:$0xff]  ;;  %v199_v19 = vld [vmem:[%s7867_s14 + $0x28] sm:$0xff]  ;;  %v7306_v20 = vld [vmem:[#allocation5 + $0x50] sm:$0xff]   ;;  %v7886_v22 = vpack.c.bf16 %v197_v16, %v196_v15 }
  0x72   : > { %6601 = vmatprep.subr.bf16.mxu0 %v7295_v2  ;;  %v7307_v21 = vld [vmem:[#allocation5 + $0x98] sm:$0xff]   ;;  %v7888_v23 = vpack.c.bf16 %v199_v19, %v198_v18  ;;  %v7309_v25 = vld [vmem:[#allocation5 + $0xa0] sm:$0xff]   ;;  %v200_v26 = vld [vmem:[%s7867_s14 + $0x30] sm:$0xff] }
  0x73   : > { %v7308_v24 = vld [vmem:[#allocation5 + $0x58] sm:$0xff]   ;;  %v202_v28 = vld [vmem:[%s7867_s14 + $0x40] sm:$0xff]  ;;  %v203_v29 = vld [vmem:[%s7867_s14 + $0x48] sm:$0xff] }
  0x74   : > { %7230 = vmatpush3.bf16.msra.mxu1 %v7304_v14  ;;  %v201_v27 = vld [vmem:[%s7867_s14 + $0x38] sm:$0xff]  ;;  %v7310_v30 = vld [vmem:[#allocation5 + $0x60] sm:$0xff]   ;;  %v7311_v31 = vld [vmem:[#allocation5 + $0xa8] sm:$0xff]   ;;  %v7898_v34 = vpack.c.bf16 %v203_v29, %v202_v28 }
  0x75   : > { %6602 = vmatpush3.bf16.msra.mxu0 %v7295_v2  ;;  %7223 = vmatprep.subr.bf16.mxu1 %v7305_v17  ;;  %v7896_v32 = vpack.c.bf16 %v201_v27, %v200_v26  ;;  %v7312_v33 = vld [vmem:[#allocation5 + $0x68] sm:$0xff]   ;;  %v7313_v35 = vld [vmem:[#allocation5 + $0xb0] sm:$0xff]   ;;  %v205_v37 = vld [vmem:[%s7867_s14 + $0x58] sm:$0xff] }
  0x76   : > { %6603 = vmatprep.subr.bf16.mxu0 %v7296_v3  ;;  %v204_v36 = vld [vmem:[%s7867_s14 + $0x50] sm:$0xff]  ;;  %v206_v38 = vld [vmem:[%s7867_s14 + $0x60] sm:$0xff]  ;;  %v207_v39 = vld [vmem:[%s7867_s14 + $0x68] sm:$0xff] }
  0x77   : > { %v7314_v40 = vld [vmem:[#allocation5 + $0x70] sm:$0xff]   ;;  %v7906_v41 = vpack.c.bf16 %v205_v37, %v204_v36  ;;  %v7908_v42 = vpack.c.bf16 %v207_v39, %v206_v38  ;;  %v209_v44 = vld [vmem:[%s7867_s14 + $0x78] sm:$0xff]  ;;  %v210_v45 = vld [vmem:[%s7867_s14 + $0x80] sm:$0xff] }
  0x78   : > { %7231 = vmatpush3.bf16.msra.mxu1 %v7306_v20  ;;  %v208_v43 = vld [vmem:[%s7867_s14 + $0x70] sm:$0xff]  ;;  %v211_v46 = vld [vmem:[%s7867_s14 + $0x88] sm:$0xff]  ;;  %v213_v50 = vld [vmem:[%s7867_s14 + $0x98] sm:$0xff] }
  0x79   : > { %6604 = vmatpush3.bf16.msra.mxu0 %v7296_v3  ;;  %7224 = vmatprep.subr.bf16.mxu1 %v7307_v21  ;;  %v7916_v47 = vpack.c.bf16 %v209_v44, %v208_v43  ;;  %v7918_v48 = vpack.c.bf16 %v211_v46, %v210_v45  ;;  %v212_v49 = vld [vmem:[%s7867_s14 + $0x90] sm:$0xff]  ;;  %v214_v51 = vld [vmem:[%s7867_s14 + $0xa0] sm:$0xff]  ;;  %v215_v52 = vld [vmem:[%s7867_s14 + $0xa8] sm:$0xff] }
  0x7a   : > { %6605 = vmatprep.subr.bf16.mxu0 %v7297_v7  ;;  %v7926_v53 = vpack.c.bf16 %v213_v50, %v212_v49  ;;  %v7928_v54 = vpack.c.bf16 %v215_v52, %v214_v51  ;;  %v216_v55 = vld [vmem:[%s7867_s14 + $0xb0] sm:$0xff]  ;;  %v217_v56 = vld [vmem:[%s7867_s14 + $0xb8] sm:$0xff]  ;;  %v218_v57 = vld [vmem:[%s7867_s14 + $0xc0] sm:$0xff] }
  0x7b   : > { %v219_v58 = vld [vmem:[%s7867_s14 + $0xc8] sm:$0xff]  ;;  %v7936_v59 = vpack.c.bf16 %v217_v56, %v216_v55  ;;  %v220_v61 = vld [vmem:[%s7867_s14 + $0xd0] sm:$0xff]  ;;  %v221_v62 = vld [vmem:[%s7867_s14 + $0xd8] sm:$0xff] }
  0x7c   : > { %7232 = vmatpush3.bf16.msra.mxu1 %v7308_v24  ;;  %v7938_v60 = vpack.c.bf16 %v219_v58, %v218_v57  ;;  %v222_v63 = vld [vmem:[%s7867_s14 + $0xe0] sm:$0xff]  ;;  %v223_v0 = vld [vmem:[%s7867_s14 + $0xe8] sm:$0xff]  ;;  %v7946_v1 = vpack.c.bf16 %v221_v62, %v220_v61  ;;  %v224_v3 = vld [vmem:[%s7867_s14 + $0xf0] sm:$0xff] }
  0x7d   : > { %6606 = vmatpush3.bf16.msra.mxu0 %v7297_v7  ;;  %7225 = vmatprep.subr.bf16.mxu1 %v7309_v25  ;;  %v7948_v2 = vpack.c.bf16 %v223_v0, %v222_v63  ;;  %v225_v4 = vld [vmem:[%s7867_s14 + $0xf8] sm:$0xff] }
  0x7e   : > { %6607 = vmatprep.subr.bf16.mxu0 %v7298_v8  ;;  %v7954_v5 = vpack.c.bf16 %v225_v4, %v224_v3  ;;  %v7315_v7 = vld [vmem:[#allocation5 + $0xb8] sm:$0xff]  }
  0x7f   : > { %v7320_v36 = vld [vmem:[#allocation5 + $0xd8] sm:$0xff]  }
  0x80   : > { %7233 = vmatpush3.bf16.msra.mxu1 %v7310_v30 }
  0x81   : > { %6608 = vmatpush3.bf16.msra.mxu0 %v7298_v8  ;;  %7226 = vmatprep.subr.bf16.mxu1 %v7311_v31  ;;  %v7316_v8 = vld [vmem:[#allocation5 + $0x78] sm:$0xff]  }
  0x82   : > { %6609 = vmatprep.subr.bf16.mxu0 %v7299_v9 }
  0x84   : > { %7234 = vmatpush3.bf16.msra.mxu1 %v7312_v33 }
  0x85   : > { %6610 = vmatpush3.bf16.msra.mxu0 %v7299_v9  ;;  %7227 = vmatprep.subr.bf16.mxu1 %v7313_v35  ;;  %v7317_v9 = vld [vmem:[#allocation5 + $0xc0] sm:$0xff]  }
  0x86   : > { %6611 = vmatprep.subr.bf16.mxu0 %v7300_v13 }
  0x88   : > { %7235 = vmatpush3.bf16.msra.mxu1 %v7314_v40 }
  0x89   : > { %6612 = vmatpush3.bf16.msra.mxu0 %v7300_v13  ;;  %7228 = vmatprep.subr.bf16.mxu1 %v7315_v7 }
  0x8a   : > { %5749 = vmatprep.subr.bf16.mxu0 %v7301_v10 }
  0x8c   : > { %6614 = vmatmul.mubr.bf16.vlgmr.msra.gmra.mrb[0].mxu0 %v7886_v22  ;;  %7236 = vmatpush3.bf16.msra.mxu1 %v7316_v8 }
  0x8d   : > { %6617 = vmatprep.mubr.bf16.mxu0 %v7888_v23  ;;  %5750 = vmatpush3.bf16.msra.mxu0 %v7302_v11 }
  0x8e   : > { %5751 = vmatprep.subr.bf16.mxu0 %v7303_v12 }
  0x91   : > { %5752 = vmatpush3.bf16.msra.mxu0 %v7304_v14 }
  0x92   : > { %5753 = vmatprep.subr.bf16.mxu0 %v7305_v17 }
  0x94   : > { %6618 = vmatmul.mubr.bf16.gmra.mrb[4].mxu0 %v7896_v32 }
  0x95   : > { %6621 = vmatprep.mubr.bf16.mxu0 %v7898_v34  ;;  %5754 = vmatpush3.bf16.msra.mxu0 %v7306_v20  ;;  %v7318_v20 = vld [vmem:[#allocation5 + $0xc8] sm:$0xff]  }
  0x96   : > { %5755 = vmatprep.subr.bf16.mxu0 %v7307_v21 }
  0x99   : > { %5756 = vmatpush3.bf16.msra.mxu0 %v7308_v24 }
  0x9a   : > { %5757 = vmatprep.subr.bf16.mxu0 %v7309_v25 }
  0x9c   : > { %6622 = vmatmul.mubr.bf16.gmra.mrb[8].mxu0 %v7906_v41 }
  0x9d   : > { %6625 = vmatprep.mubr.bf16.mxu0 %v7908_v42  ;;  %5758 = vmatpush3.bf16.msra.mxu0 %v7310_v30  ;;  %v7319_v30 = vld [vmem:[#allocation5 + $0xd0] sm:$0xff]  }
  0x9e   : > { %5759 = vmatprep.subr.bf16.mxu0 %v7311_v31 }
  0xa1   : > { %5760 = vmatpush3.bf16.msra.mxu0 %v7312_v33 }
  0xa2   : > { %5761 = vmatprep.subr.bf16.mxu0 %v7313_v35 }
  0xa4   : > { %6626 = vmatmul.mubr.bf16.gmra.mrb[12].mxu0 %v7916_v47 }
  0xa5   : > { %6629 = vmatprep.mubr.bf16.mxu0 %v7918_v48  ;;  %5762 = vmatpush3.bf16.msra.mxu0 %v7314_v40 }
  0xa6   : > { %5763 = vmatprep.subr.bf16.mxu0 %v7315_v7 }
  0xa9   : > { %5764 = vmatpush3.bf16.msra.mxu0 %v7316_v8 }
  0xaa   : > { %6645 = vmatprep.subr.bf16.mxu0 %v7317_v9 }
  0xac   : > { %6630 = vmatmul.mubr.bf16.gmra.mrb[16].mxu0 %v7926_v53 }
  0xad   : > { %6633 = vmatprep.mubr.bf16.mxu0 %v7928_v54 }
  0xb4   : > { %6634 = vmatmul.mubr.bf16.gmra.mrb[20].mxu0 %v7936_v59 }
  0xb5   : > { %6637 = vmatprep.mubr.bf16.mxu0 %v7938_v60 }
  0xbc   : > { %6638 = vmatmul.mubr.bf16.gmra.mrb[24].mxu0 %v7946_v1 }
  0xbd   : > { %6641 = vmatprep.mubr.bf16.mxu0 %v7948_v2 }
  0xc4   : > { %6642 = vmatmul.mubr.bf16.gmra.mrb[28].mxu0 %v7954_v5 }
 0x15f   : > { %v6615_v10 = vpop.f32.mrb[0].mxu0 }
 0x160   : > { %v340_v11 = vpop.f32.mrb[1].mxu0  ;;  %v469_v13 = vmax.f32 %v6615_v10, 0.0 }
 0x161   : > { %v6616_v12 = vpop.f32.mrb[2].mxu0  ;;  %v467_v16 = vmax.f32 %v340_v11, 0.0 }
 0x162   : > { %v470_v14 = vmax.f32 %v6616_v12, 0.0  ;;  %v343_v15 = vpop.f32.mrb[3].mxu0 }
 0x163   : > { %v468_v17 = vmax.f32 %v343_v15, 0.0 }
 0x164   : > { %v7957_v18 = vpack.c.bf16 %v470_v14, %v469_v13 }
 0x165   : > { %v7959_v19 = vpack.c.bf16 %v468_v17, %v467_v16 }
 0x167   : > { %675 = vmatprep.mubr.bf16.mxu0 %v7959_v19  ;;  %v6619_v21 = vpop.f32.mrb[4].mxu0 }
 0x168   : > { %676 = vmatmul.mubr.bf16.vlgmr.msra.gmra.mrb[32].mxu0 %v7879_v6  ;;  %v473_v24 = vmax.f32 %v6619_v21, 0.0  ;;  %v356_v25 = vpop.f32.mrb[5].mxu0 }
 0x169   : > { %683 = vmatprep.mubr.bf16.mxu0 %v7957_v18  ;;  %v471_v26 = vmax.f32 %v356_v25, 0.0  ;;  %v6620_v27 = vpop.f32.mrb[6].mxu0  ;;  %6646 = vmatpush3.bf16.msra.mxu0 %v7317_v9 }
 0x16a   : > { %v474_v28 = vmax.f32 %v6620_v27, 0.0  ;;  %v359_v29 = vpop.f32.mrb[7].mxu0  ;;  %6647 = vmatprep.subr.bf16.mxu0 %v7318_v20 }
 0x16b   : > { %v472_v31 = vmax.f32 %v359_v29, 0.0 }
 0x16c   : > { %v7964_v33 = vpack.c.bf16 %v474_v28, %v473_v24 }
 0x16d   : > { %v7966_v35 = vpack.c.bf16 %v472_v31, %v471_v26  ;;  %6648 = vmatpush3.bf16.msra.mxu0 %v7318_v20 }
 0x16e   : > { %6649 = vmatprep.subr.bf16.mxu0 %v7319_v30 }
 0x16f   : > { %v6623_v37 = vpop.f32.mrb[8].mxu0 }
 0x170   : > { %v477_v38 = vmax.f32 %v6623_v37, 0.0  ;;  %v372_v39 = vpop.f32.mrb[9].mxu0  ;;  %684 = vmatmul.mubr.bf16.gmra.mrb[36].mxu0 %v7886_v22 }
 0x171   : > { %v475_v40 = vmax.f32 %v372_v39, 0.0  ;;  %v6624_v43 = vpop.f32.mrb[10].mxu0  ;;  %691 = vmatprep.mubr.bf16.mxu0 %v7966_v35  ;;  %6650 = vmatpush3.bf16.msra.mxu0 %v7319_v30 }
 0x172   : > { %v478_v44 = vmax.f32 %v6624_v43, 0.0  ;;  %v375_v45 = vpop.f32.mrb[11].mxu0  ;;  %6651 = vmatprep.subr.bf16.mxu0 %v7320_v36 }
 0x173   : > { %v476_v46 = vmax.f32 %v375_v45, 0.0 }
 0x174   : > { %v7970_v49 = vpack.c.bf16 %v478_v44, %v477_v38 }
 0x175   : > { %v7972_v50 = vpack.c.bf16 %v476_v46, %v475_v40  ;;  %6652 = vmatpush3.bf16.msra.mxu0 %v7320_v36 }
 0x177   : > { %707 = vmatprep.mubr.bf16.mxu1 %v7972_v50  ;;  %v6627_v51 = vpop.f32.mrb[12].mxu0 }
 0x178   : > { %692 = vmatmul.mubr.bf16.gmra.mrb[40].mxu0 %v7888_v23  ;;  %708 = vmatmul.mubr.bf16.vlgmr.msra.gmra.mrb[0].mxu1 %v7898_v34  ;;  %v481_v52 = vmax.f32 %v6627_v51, 0.0  ;;  %v388_v55 = vpop.f32.mrb[13].mxu0 }
 0x179   : > { %699 = vmatprep.mubr.bf16.mxu0 %v7964_v33  ;;  %715 = vmatprep.mubr.bf16.mxu1 %v7970_v49  ;;  %v479_v56 = vmax.f32 %v388_v55, 0.0  ;;  %v6628_v57 = vpop.f32.mrb[14].mxu0 }
 0x17a   : > { %v482_v58 = vmax.f32 %v6628_v57, 0.0  ;;  %v391_v61 = vpop.f32.mrb[15].mxu0 }
 0x17b   : > { %v480_v62 = vmax.f32 %v391_v61, 0.0 }
 0x17c   : > { %v7979_v63 = vpack.c.bf16 %v482_v58, %v481_v52 }
 0x17d   : > { %v7981_v0 = vpack.c.bf16 %v480_v62, %v479_v56 }
 0x17f   : > { %v6631_v3 = vpop.f32.mrb[16].mxu0 }
 0x180   : > { %700 = vmatmul.mubr.bf16.gmra.mrb[44].mxu0 %v7896_v32  ;;  %716 = vmatmul.mubr.bf16.gmra.mrb[4].mxu1 %v7906_v41  ;;  %v485_v4 = vmax.f32 %v6631_v3, 0.0  ;;  %v404_v7 = vpop.f32.mrb[17].mxu0  ;;  %v7321_v3 = vld [vmem:[#allocation5 + $0xe0] sm:$0xff]  }
 0x181   : > { %723 = vmatprep.mubr.bf16.mxu1 %v7981_v0  ;;  %v483_v8 = vmax.f32 %v404_v7, 0.0  ;;  %v6632_v9 = vpop.f32.mrb[18].mxu0  ;;  %6653 = vmatprep.subr.bf16.mxu0 %v7321_v3  ;;  %v7323_v7 = vld [vmem:[#allocation5 + $0xf0] sm:$0xff]  }
 0x182   : > { %v486_v10 = vmax.f32 %v6632_v9, 0.0  ;;  %v407_v11 = vpop.f32.mrb[19].mxu0  ;;  %6654 = vmatpush3.bf16.msra.mxu0 %v7321_v3  ;;  %v7325_v9 = vld [vmem:[#allocation5 + $0x100] sm:$0xff]  }
 0x183   : > { %v484_v12 = vmax.f32 %v407_v11, 0.0 }
 0x184   : > { %v7986_v13 = vpack.c.bf16 %v486_v10, %v485_v4  ;;  %v7322_v4 = vld [vmem:[#allocation5 + $0xe8] sm:$0xff]  }
 0x185   : > { %v7988_v14 = vpack.c.bf16 %v484_v12, %v483_v8  ;;  %6655 = vmatprep.subr.bf16.mxu0 %v7322_v4  ;;  %v7324_v8 = vld [vmem:[#allocation5 + $0xf8] sm:$0xff]  }
 0x186   : > { %6656 = vmatpush3.bf16.msra.mxu0 %v7322_v4 }
 0x187   : > { %v6635_v15 = vpop.f32.mrb[20].mxu0  ;;  %6657 = vmatprep.subr.bf16.mxu0 %v7323_v7 }
 0x188   : > { %724 = vmatmul.mubr.bf16.gmra.mrb[8].mxu1 %v7908_v42  ;;  %v489_v16 = vmax.f32 %v6635_v15, 0.0  ;;  %v420_v17 = vpop.f32.mrb[21].mxu0 }
 0x189   : > { %731 = vmatprep.mubr.bf16.mxu1 %v7979_v63  ;;  %v487_v20 = vmax.f32 %v420_v17, 0.0  ;;  %v6636_v21 = vpop.f32.mrb[22].mxu0 }
 0x18a   : > { %v490_v24 = vmax.f32 %v6636_v21, 0.0  ;;  %v423_v25 = vpop.f32.mrb[23].mxu0  ;;  %6658 = vmatpush3.bf16.msra.mxu0 %v7323_v7 }
 0x18b   : > { %v488_v26 = vmax.f32 %v423_v25, 0.0  ;;  %6659 = vmatprep.subr.bf16.mxu0 %v7324_v8 }
 0x18c   : > { %v7992_v27 = vpack.c.bf16 %v490_v24, %v489_v16 }
 0x18d   : > { %v7994_v28 = vpack.c.bf16 %v488_v26, %v487_v20 }
 0x18e   : > { %6660 = vmatpush3.bf16.msra.mxu0 %v7324_v8 }
 0x18f   : > { %v6639_v29 = vpop.f32.mrb[24].mxu0  ;;  %6693 = vmatprep.subr.bf16.mxu0 %v7325_v9 }
 0x190   : > { %732 = vmatmul.mubr.bf16.gmra.mrb[12].mxu1 %v7916_v47  ;;  %v493_v30 = vmax.f32 %v6639_v29, 0.0  ;;  %v436_v31 = vpop.f32.mrb[25].mxu0 }
 0x191   : > { %739 = vmatprep.mubr.bf16.mxu1 %v7988_v14  ;;  %v491_v36 = vmax.f32 %v436_v31, 0.0  ;;  %v6640_v37 = vpop.f32.mrb[26].mxu0 }
 0x192   : > { %v494_v38 = vmax.f32 %v6640_v37, 0.0  ;;  %v439_v39 = vpop.f32.mrb[27].mxu0 }
 0x193   : > { %v492_v40 = vmax.f32 %v439_v39, 0.0 }
 0x194   : > { %v7998_v43 = vpack.c.bf16 %v494_v38, %v493_v30 }
 0x195   : > { %v8000_v44 = vpack.c.bf16 %v492_v40, %v491_v36 }
 0x197   : > { %v6643_v45 = vpop.f32.mrb[28].mxu0 }
 0x198   : > { %740 = vmatmul.mubr.bf16.gmra.mrb[16].mxu1 %v7918_v48  ;;  %v497_v46 = vmax.f32 %v6643_v45, 0.0  ;;  %v452_v51 = vpop.f32.mrb[29].mxu0 }
 0x199   : > { %747 = vmatprep.mubr.bf16.mxu1 %v7986_v13  ;;  %v495_v52 = vmax.f32 %v452_v51, 0.0  ;;  %v6644_v55 = vpop.f32.mrb[30].mxu0 }
 0x19a   : > { %v498_v56 = vmax.f32 %v6644_v55, 0.0  ;;  %v455_v57 = vpop.f32.mrb[31].mxu0 }
 0x19b   : > { %v496_v58 = vmax.f32 %v455_v57, 0.0 }
 0x19c   : > { %v8004_v61 = vpack.c.bf16 %v498_v56, %v497_v46  ;;  %v7326_v46 = vld [vmem:[#allocation5 + $0x108] sm:$0xff]  }
 0x19d   : > { %v8006_v62 = vpack.c.bf16 %v496_v58, %v495_v52 }
 0x1a0   : > { %748 = vmatmul.mubr.bf16.gmra.mrb[20].mxu1 %v7926_v53 }
 0x1a1   : > { %755 = vmatprep.mubr.bf16.mxu1 %v7994_v28 }
 0x1a8   : > { %756 = vmatmul.mubr.bf16.gmra.mrb[24].mxu1 %v7928_v54 }
 0x1a9   : > { %763 = vmatprep.mubr.bf16.mxu1 %v7992_v27 }
 0x1b0   : > { %764 = vmatmul.mubr.bf16.gmra.mrb[28].mxu1 %v7936_v59 }
 0x1b1   : > { %771 = vmatprep.mubr.bf16.mxu1 %v8000_v44 }
 0x1b8   : > { %772 = vmatmul.mubr.bf16.gmra.mrb[32].mxu1 %v7938_v60 }
 0x1b9   : > { %779 = vmatprep.mubr.bf16.mxu1 %v7998_v43 }
 0x1c0   : > { %780 = vmatmul.mubr.bf16.gmra.mrb[36].mxu1 %v7946_v1 }
 0x1c1   : > { %787 = vmatprep.mubr.bf16.mxu1 %v8006_v62 }
 0x1c8   : > { %788 = vmatmul.mubr.bf16.gmra.mrb[40].mxu1 %v7948_v2 }
 0x1c9   : > { %795 = vmatprep.mubr.bf16.mxu1 %v8004_v61 }
 0x1d0   : > { %796 = vmatmul.mubr.bf16.gmra.mrb[44].mxu1 %v7954_v5 }
 0x23b   : > { %v5765_v10 = vpop.f32.mrb[32].mxu0 }
 0x23c   : > { %v5766_v11 = vpop.f32.mrb[33].mxu0 }
 0x23d   : > { %v5767_v12 = vadd.f32 %v5766_v11, %v5765_v10  ;;  %v5768_v15 = vpop.f32.mrb[34].mxu0  ;;  %v7327_v11 = vld [vmem:[#allocation5 + $0x110] sm:$0xff]  }
 0x23e   : > { %v5769_v16 = vpop.f32.mrb[35].mxu0 }
 0x23f   : > { %v5770_v17 = vadd.f32 %v5769_v16, %v5768_v15  ;;  %v804_v20 = vmax.f32 %v5767_v12, 0.0 }
 0x241   : > { %v805_v21 = vmax.f32 %v5770_v17, 0.0 }
 0x243   : > { %v5771_v24 = vpop.f32.mrb[36].mxu0  ;;  %v836_v25 = vpack.c.bf16 %v805_v21, %v804_v20 }
 0x244   : > { %v5772_v26 = vpop.f32.mrb[37].mxu0 }
 0x245   : > { %v5773_v29 = vadd.f32 %v5772_v26, %v5771_v24  ;;  %v5774_v30 = vpop.f32.mrb[38].mxu0  ;;  %6661 = vmatprep.mubr.bf16.mxu0 %v836_v25  ;;  %v7328_v25 = vld [vmem:[#allocation5 + $0x118] sm:$0xff]  }
 0x246   : > { %v5775_v31 = vpop.f32.mrb[39].mxu0 }
 0x247   : > { %v5776_v36 = vadd.f32 %v5775_v31, %v5774_v30  ;;  %v806_v37 = vmax.f32 %v5773_v29, 0.0 }
 0x249   : > { %v807_v38 = vmax.f32 %v5776_v36, 0.0 }
 0x24b   : > { %v837_v39 = vpack.c.bf16 %v807_v38, %v806_v37  ;;  %v5777_v40 = vpop.f32.mrb[40].mxu0  ;;  %v5789_v45 = vpop.f32.mrb[0].mxu1 }
 0x24c   : > { %v5778_v51 = vpop.f32.mrb[41].mxu0  ;;  %v5790_v52 = vpop.f32.mrb[1].mxu1 }
 0x24d   : > { %v5779_v55 = vadd.f32 %v5778_v51, %v5777_v40  ;;  %v5780_v56 = vpop.f32.mrb[42].mxu0  ;;  %6662 = vmatmul.mubr.bf16.vlgmr.msra.gmra.mrb[48].mxu0 %v837_v39  ;;  %v5791_v57 = vadd.f32 %v5790_v52, %v5789_v45  ;;  %v5792_v58 = vpop.f32.mrb[2].mxu1 }
 0x24e   : > { %v5781_v3 = vpop.f32.mrb[43].mxu0  ;;  %v5793_v4 = vpop.f32.mrb[3].mxu1  ;;  %6694 = vmatpush3.bf16.msra.mxu0 %v7325_v9 }
 0x24f   : > { %v5782_v7 = vadd.f32 %v5781_v3, %v5780_v56  ;;  %v812_v8 = vmax.f32 %v5791_v57, 0.0  ;;  %v5794_v10 = vadd.f32 %v5793_v4, %v5792_v58  ;;  %6695 = vmatprep.subr.bf16.mxu0 %v7326_v46  ;;  %v808_v12 = vmax.f32 %v5779_v55, 0.0  ;;  %v7330_v3 = vld [vmem:[#allocation5 + $0x128] sm:$0xff]  }
 0x251   : > { %v809_v15 = vmax.f32 %v5782_v7, 0.0  ;;  %v813_v16 = vmax.f32 %v5794_v10, 0.0 }
 0x252   : > { %6696 = vmatpush3.bf16.msra.mxu0 %v7326_v46  ;;  %v7329_v46 = vld [vmem:[#allocation5 + $0x120] sm:$0xff]  }
 0x253   : > { %v5783_v17 = vpop.f32.mrb[44].mxu0  ;;  %v838_v20 = vpack.c.bf16 %v809_v15, %v808_v12  ;;  %v5795_v21 = vpop.f32.mrb[4].mxu1  ;;  %v840_v24 = vpack.c.bf16 %v813_v16, %v812_v8  ;;  %6697 = vmatprep.subr.bf16.mxu0 %v7327_v11  ;;  %v7331_v15 = vld [vmem:[#allocation5 + $0x130] sm:$0xff]  }
 0x254   : > { %v5784_v26 = vpop.f32.mrb[45].mxu0  ;;  %v5796_v29 = vpop.f32.mrb[5].mxu1 }
 0x255   : > { %v5785_v30 = vadd.f32 %v5784_v26, %v5783_v17  ;;  %v5786_v31 = vpop.f32.mrb[46].mxu0  ;;  %6665 = vmatprep.mubr.bf16.mxu0 %v838_v20  ;;  %v5797_v9 = vadd.f32 %v5796_v29, %v5795_v21  ;;  %v5798_v36 = vpop.f32.mrb[6].mxu1 }
 0x256   : > { %v5787_v37 = vpop.f32.mrb[47].mxu0  ;;  %v5799_v38 = vpop.f32.mrb[7].mxu1  ;;  %6698 = vmatpush3.bf16.msra.mxu0 %v7327_v11 }
 0x257   : > { %v5788_v39 = vadd.f32 %v5787_v37, %v5786_v31  ;;  %v814_v40 = vmax.f32 %v5797_v9, 0.0  ;;  %v5800_v45 = vadd.f32 %v5799_v38, %v5798_v36  ;;  %6699 = vmatprep.subr.bf16.mxu0 %v7328_v25  ;;  %v810_v51 = vmax.f32 %v5785_v30, 0.0 }
 0x259   : > { %v811_v52 = vmax.f32 %v5788_v39, 0.0  ;;  %v815_v55 = vmax.f32 %v5800_v45, 0.0 }
 0x25a   : > { %6700 = vmatpush3.bf16.msra.mxu0 %v7328_v25 }
 0x25b   : > { %v839_v56 = vpack.c.bf16 %v811_v52, %v810_v51  ;;  %v5801_v57 = vpop.f32.mrb[8].mxu1  ;;  %v841_v58 = vpack.c.bf16 %v815_v55, %v814_v40  ;;  %6701 = vmatprep.subr.bf16.mxu0 %v7329_v46 }
 0x25c   : > { %v5802_v4 = vpop.f32.mrb[9].mxu1 }
 0x25d   : > { %6666 = vmatmul.mubr.bf16.gmra.mrb[52].mxu0 %v839_v56  ;;  %v5803_v7 = vadd.f32 %v5802_v4, %v5801_v57  ;;  %v5804_v8 = vpop.f32.mrb[10].mxu1 }
 0x25e   : > { %6669 = vmatprep.mubr.bf16.mxu0 %v840_v24  ;;  %v5805_v10 = vpop.f32.mrb[11].mxu1  ;;  %6702 = vmatpush3.bf16.msra.mxu0 %v7329_v46 }
 0x25f   : > { %v816_v11 = vmax.f32 %v5803_v7, 0.0  ;;  %v5806_v12 = vadd.f32 %v5805_v10, %v5804_v8  ;;  %6703 = vmatprep.subr.bf16.mxu0 %v7330_v3 }
 0x261   : > { %v817_v16 = vmax.f32 %v5806_v12, 0.0 }
 0x262   : > { %6704 = vmatpush3.bf16.msra.mxu0 %v7330_v3 }
 0x263   : > { %v5807_v17 = vpop.f32.mrb[12].mxu1  ;;  %v842_v20 = vpack.c.bf16 %v817_v16, %v816_v11  ;;  %6705 = vmatprep.subr.bf16.mxu0 %v7331_v15 }
 0x264   : > { %v5808_v21 = vpop.f32.mrb[13].mxu1 }
 0x265   : > { %6670 = vmatmul.mubr.bf16.gmra.mrb[56].mxu0 %v841_v58  ;;  %v5809_v25 = vadd.f32 %v5808_v21, %v5807_v17  ;;  %v5810_v26 = vpop.f32.mrb[14].mxu1 }
 0x266   : > { %v5811_v29 = vpop.f32.mrb[15].mxu1  ;;  %6673 = vmatprep.mubr.bf16.mxu0 %v842_v20  ;;  %6706 = vmatpush3.bf16.msra.mxu0 %v7331_v15 }
 0x267   : > { %v818_v30 = vmax.f32 %v5809_v25, 0.0  ;;  %v5812_v24 = vadd.f32 %v5811_v29, %v5810_v26 }
 0x269   : > { %v819_v31 = vmax.f32 %v5812_v24, 0.0 }
 0x26b   : > { %v843_v9 = vpack.c.bf16 %v819_v31, %v818_v30  ;;  %v5813_v36 = vpop.f32.mrb[16].mxu1 }
 0x26c   : > { %v5814_v37 = vpop.f32.mrb[17].mxu1 }
 0x26d   : > { %6674 = vmatmul.mubr.bf16.gmra.mrb[60].mxu0 %v843_v9  ;;  %v5815_v38 = vadd.f32 %v5814_v37, %v5813_v36  ;;  %v5816_v39 = vpop.f32.mrb[18].mxu1 }
 0x26e   : > { %v5817_v40 = vpop.f32.mrb[19].mxu1 }
 0x26f   : > { %v820_v45 = vmax.f32 %v5815_v38, 0.0  ;;  %v5818_v46 = vadd.f32 %v5817_v40, %v5816_v39 }
 0x271   : > { %v821_v51 = vmax.f32 %v5818_v46, 0.0 }
 0x273   : > { %v5819_v52 = vpop.f32.mrb[20].mxu1  ;;  %v844_v55 = vpack.c.bf16 %v821_v51, %v820_v45 }
 0x274   : > { %v5820_v56 = vpop.f32.mrb[21].mxu1 }
 0x275   : > { %v5821_v57 = vadd.f32 %v5820_v56, %v5819_v52  ;;  %v5822_v58 = vpop.f32.mrb[22].mxu1  ;;  %6677 = vmatprep.mubr.bf16.mxu0 %v844_v55 }
 0x276   : > { %v5823_v3 = vpop.f32.mrb[23].mxu1 }
 0x277   : > { %v822_v4 = vmax.f32 %v5821_v57, 0.0  ;;  %v5824_v7 = vadd.f32 %v5823_v3, %v5822_v58 }
 0x279   : > { %v823_v8 = vmax.f32 %v5824_v7, 0.0 }
 0x27b   : > { %v845_v10 = vpack.c.bf16 %v823_v8, %v822_v4  ;;  %v5825_v11 = vpop.f32.mrb[24].mxu1 }
 0x27c   : > { %v5826_v12 = vpop.f32.mrb[25].mxu1 }
 0x27d   : > { %6678 = vmatmul.mubr.bf16.gmra.mrb[64].mxu0 %v845_v10  ;;  %v5827_v15 = vadd.f32 %v5826_v12, %v5825_v11  ;;  %v5828_v16 = vpop.f32.mrb[26].mxu1 }
 0x27e   : > { %v5829_v17 = vpop.f32.mrb[27].mxu1 }
 0x27f   : > { %v824_v20 = vmax.f32 %v5827_v15, 0.0  ;;  %v5830_v21 = vadd.f32 %v5829_v17, %v5828_v16 }
 0x281   : > { %v825_v25 = vmax.f32 %v5830_v21, 0.0 }
 0x283   : > { %v5831_v26 = vpop.f32.mrb[28].mxu1  ;;  %v846_v29 = vpack.c.bf16 %v825_v25, %v824_v20 }
 0x284   : > { %v5832_v30 = vpop.f32.mrb[29].mxu1 }
 0x285   : > { %v5833_v24 = vadd.f32 %v5832_v30, %v5831_v26  ;;  %v5834_v31 = vpop.f32.mrb[30].mxu1  ;;  %6681 = vmatprep.mubr.bf16.mxu0 %v846_v29 }
 0x286   : > { %v5835_v9 = vpop.f32.mrb[31].mxu1 }
 0x287   : > { %v826_v36 = vmax.f32 %v5833_v24, 0.0  ;;  %v5836_v37 = vadd.f32 %v5835_v9, %v5834_v31  ;;  %v7332_v31 = vld [vmem:[#allocation5 + $0x138] sm:$0xff]  }
 0x288   : > { %6707 = vmatprep.subr.bf16.mxu0 %v7332_v31 }
 0x289   : > { %v827_v38 = vmax.f32 %v5836_v37, 0.0  ;;  %6708 = vmatpush3.bf16.msra.mxu0 %v7332_v31 }
 0x28b   : > { %v847_v39 = vpack.c.bf16 %v827_v38, %v826_v36  ;;  %v5837_v40 = vpop.f32.mrb[32].mxu1 }
 0x28c   : > { %v5838_v45 = vpop.f32.mrb[33].mxu1 }
 0x28d   : > { %6682 = vmatmul.mubr.bf16.gmra.mrb[68].mxu0 %v847_v39  ;;  %v5839_v46 = vadd.f32 %v5838_v45, %v5837_v40  ;;  %v5840_v51 = vpop.f32.mrb[34].mxu1 }
 0x28e   : > { %v5841_v52 = vpop.f32.mrb[35].mxu1 }
 0x28f   : > { %v828_v55 = vmax.f32 %v5839_v46, 0.0  ;;  %v5842_v56 = vadd.f32 %v5841_v52, %v5840_v51 }
 0x291   : > { %v829_v57 = vmax.f32 %v5842_v56, 0.0  ;;  %v7334_v56 = vld [vmem:[#allocation5 + $0x148] sm:$0xff]  }
 0x293   : > { %v5843_v58 = vpop.f32.mrb[36].mxu1  ;;  %v848_v3 = vpack.c.bf16 %v829_v57, %v828_v55  ;;  %v7333_v55 = vld [vmem:[#allocation5 + $0x140] sm:$0xff]   ;;  %v7335_v57 = vld [vmem:[#allocation5 + $0x150] sm:$0xff]  }
 0x294   : > { %v5844_v4 = vpop.f32.mrb[37].mxu1  ;;  %6741 = vmatprep.subr.bf16.mxu1 %v7333_v55 }
 0x295   : > { %v5845_v7 = vadd.f32 %v5844_v4, %v5843_v58  ;;  %v5846_v8 = vpop.f32.mrb[38].mxu1  ;;  %6685 = vmatprep.mubr.bf16.mxu0 %v848_v3  ;;  %6742 = vmatpush3.bf16.msra.mxu1 %v7333_v55  ;;  %v7336_v58 = vld [vmem:[#allocation5 + $0x158] sm:$0xff]   ;;  %v7337_v3 = vld [vmem:[#allocation5 + $0x160] sm:$0xff]   ;;  %v7338_v4 = vld [vmem:[#allocation5 + $0x168] sm:$0xff]  }
 0x296   : > { %v5847_v10 = vpop.f32.mrb[39].mxu1  ;;  %6743 = vmatprep.subr.bf16.mxu1 %v7334_v56 }
 0x297   : > { %v830_v11 = vmax.f32 %v5845_v7, 0.0  ;;  %v5848_v12 = vadd.f32 %v5847_v10, %v5846_v8  ;;  %v7339_v7 = vld [vmem:[#allocation5 + $0x170] sm:$0xff]  }
 0x299   : > { %v831_v15 = vmax.f32 %v5848_v12, 0.0  ;;  %6744 = vmatpush3.bf16.msra.mxu1 %v7334_v56  ;;  %v7340_v12 = vld [vmem:[#allocation5 + $0x178] sm:$0xff]  }
 0x29a   : > { %6745 = vmatprep.subr.bf16.mxu1 %v7335_v57 }
 0x29b   : > { %v5849_v16 = vpop.f32.mrb[40].mxu1  ;;  %v849_v17 = vpack.c.bf16 %v831_v15, %v830_v11 }
 0x29c   : > { %v5850_v20 = vpop.f32.mrb[41].mxu1 }
 0x29d   : > { %6686 = vmatmul.mubr.bf16.gmra.mrb[72].mxu0 %v849_v17  ;;  %v5851_v21 = vadd.f32 %v5850_v20, %v5849_v16  ;;  %v5852_v25 = vpop.f32.mrb[42].mxu1  ;;  %6746 = vmatpush3.bf16.msra.mxu1 %v7335_v57 }
 0x29e   : > { %v5853_v26 = vpop.f32.mrb[43].mxu1  ;;  %6747 = vmatprep.subr.bf16.mxu1 %v7336_v58 }
 0x29f   : > { %v832_v29 = vmax.f32 %v5851_v21, 0.0  ;;  %v5854_v30 = vadd.f32 %v5853_v26, %v5852_v25 }
 0x2a1   : > { %v833_v24 = vmax.f32 %v5854_v30, 0.0  ;;  %6748 = vmatpush3.bf16.msra.mxu1 %v7336_v58 }
 0x2a2   : > { %6749 = vmatprep.subr.bf16.mxu1 %v7337_v3 }
 0x2a3   : > { %v5855_v9 = vpop.f32.mrb[44].mxu1  ;;  %v850_v36 = vpack.c.bf16 %v833_v24, %v832_v29 }
 0x2a4   : > { %v5856_v37 = vpop.f32.mrb[45].mxu1 }
 0x2a5   : > { %v5857_v38 = vadd.f32 %v5856_v37, %v5855_v9  ;;  %v5858_v39 = vpop.f32.mrb[46].mxu1  ;;  %6689 = vmatprep.mubr.bf16.mxu0 %v850_v36  ;;  %6750 = vmatpush3.bf16.msra.mxu1 %v7337_v3 }
 0x2a6   : > { %v5859_v40 = vpop.f32.mrb[47].mxu1  ;;  %6751 = vmatprep.subr.bf16.mxu1 %v7338_v4 }
 0x2a7   : > { %v834_v45 = vmax.f32 %v5857_v38, 0.0  ;;  %v5860_v46 = vadd.f32 %v5859_v40, %v5858_v39 }
 0x2a9   : > { %v835_v51 = vmax.f32 %v5860_v46, 0.0  ;;  %6752 = vmatpush3.bf16.msra.mxu1 %v7338_v4 }
 0x2aa   : > { %6753 = vmatprep.subr.bf16.mxu1 %v7339_v7 }
 0x2ab   : > { %v851_v52 = vpack.c.bf16 %v835_v51, %v834_v45 }
 0x2ad   : > { %6690 = vmatmul.mubr.bf16.gmra.mrb[76].mxu0 %v851_v52  ;;  %6754 = vmatpush3.bf16.msra.mxu1 %v7339_v7 }
 0x2ae   : > { %6755 = vmatprep.subr.bf16.mxu1 %v7340_v12 }
 0x2b1   : > { %6756 = vmatpush3.bf16.msra.mxu1 %v7340_v12 }
 0x320   : > { %v6663_v8 = vpop.f32.mrb[48].mxu0 }
 0x321   : > { %v950_v10 = vpop.f32.mrb[49].mxu0  ;;  %v1079_v15 = vmax.f32 %v6663_v8, 0.0 }
 0x322   : > { %v6664_v11 = vpop.f32.mrb[50].mxu0  ;;  %v1077_v20 = vmax.f32 %v950_v10, 0.0 }
 0x323   : > { %v1080_v16 = vmax.f32 %v6664_v11, 0.0  ;;  %v953_v17 = vpop.f32.mrb[51].mxu0 }
 0x324   : > { %v1078_v21 = vmax.f32 %v953_v17, 0.0 }
 0x325   : > { %v1110_v25 = vpack.c.bf16 %v1080_v16, %v1079_v15 }
 0x326   : > { %v1109_v26 = vpack.c.bf16 %v1078_v21, %v1077_v20 }
 0x328   : > { %6709 = vmatprep.mubr.bf16.mxu0 %v1109_v26 }
 0x329   : > { %6710 = vmatmul.mubr.bf16.vlgmr.msra.gmra.mrb[80].mxu0 %v1110_v25 }
 0x330   : > { %v6667_v29 = vpop.f32.mrb[52].mxu0 }
 0x331   : > { %v966_v30 = vpop.f32.mrb[53].mxu0  ;;  %v1083_v31 = vmax.f32 %v6667_v29, 0.0 }
 0x332   : > { %v6668_v24 = vpop.f32.mrb[54].mxu0  ;;  %v1081_v37 = vmax.f32 %v966_v30, 0.0 }
 0x333   : > { %v1084_v9 = vmax.f32 %v6668_v24, 0.0  ;;  %v969_v36 = vpop.f32.mrb[55].mxu0 }
 0x334   : > { %v1082_v38 = vmax.f32 %v969_v36, 0.0 }
 0x335   : > { %v1112_v39 = vpack.c.bf16 %v1084_v9, %v1083_v31 }
 0x336   : > { %v1111_v40 = vpack.c.bf16 %v1082_v38, %v1081_v37 }
 0x338   : > { %v6671_v45 = vpop.f32.mrb[56].mxu0  ;;  %6713 = vmatprep.mubr.bf16.mxu0 %v1111_v40 }
 0x339   : > { %v1087_v46 = vmax.f32 %v6671_v45, 0.0  ;;  %v982_v51 = vpop.f32.mrb[57].mxu0  ;;  %6714 = vmatmul.mubr.bf16.gmra.mrb[84].mxu0 %v1112_v39 }
 0x33a   : > { %v1085_v52 = vmax.f32 %v982_v51, 0.0  ;;  %v6672_v55 = vpop.f32.mrb[58].mxu0 }
 0x33b   : > { %v1088_v56 = vmax.f32 %v6672_v55, 0.0  ;;  %v985_v57 = vpop.f32.mrb[59].mxu0 }
 0x33c   : > { %v1086_v58 = vmax.f32 %v985_v57, 0.0 }
 0x33d   : > { %v1114_v3 = vpack.c.bf16 %v1088_v56, %v1087_v46 }
 0x33e   : > { %v1113_v4 = vpack.c.bf16 %v1086_v58, %v1085_v52 }
 0x340   : > { %6717 = vmatprep.mubr.bf16.mxu0 %v1113_v4  ;;  %v6675_v7 = vpop.f32.mrb[60].mxu0 }
 0x341   : > { %6718 = vmatmul.mubr.bf16.gmra.mrb[88].mxu0 %v1114_v3  ;;  %v1091_v8 = vmax.f32 %v6675_v7, 0.0  ;;  %v998_v10 = vpop.f32.mrb[61].mxu0 }
 0x342   : > { %v1089_v11 = vmax.f32 %v998_v10, 0.0  ;;  %v6676_v12 = vpop.f32.mrb[62].mxu0 }
 0x343   : > { %v1092_v15 = vmax.f32 %v6676_v12, 0.0  ;;  %v1001_v16 = vpop.f32.mrb[63].mxu0 }
 0x344   : > { %v1090_v17 = vmax.f32 %v1001_v16, 0.0 }
 0x345   : > { %v1116_v20 = vpack.c.bf16 %v1092_v15, %v1091_v8 }
 0x346   : > { %v1115_v21 = vpack.c.bf16 %v1090_v17, %v1089_v11 }
 0x348   : > { %6721 = vmatprep.mubr.bf16.mxu0 %v1115_v21 }
 0x349   : > { %6722 = vmatmul.mubr.bf16.gmra.mrb[92].mxu0 %v1116_v20 }
 0x350   : > { %v6679_v25 = vpop.f32.mrb[64].mxu0 }
 0x351   : > { %v1095_v26 = vmax.f32 %v6679_v25, 0.0  ;;  %v1014_v29 = vpop.f32.mrb[65].mxu0 }
 0x352   : > { %v1093_v30 = vmax.f32 %v1014_v29, 0.0  ;;  %v6680_v24 = vpop.f32.mrb[66].mxu0 }
 0x353   : > { %v1096_v31 = vmax.f32 %v6680_v24, 0.0  ;;  %v1017_v9 = vpop.f32.mrb[67].mxu0 }
 0x354   : > { %v1094_v36 = vmax.f32 %v1017_v9, 0.0 }
 0x355   : > { %v1118_v37 = vpack.c.bf16 %v1096_v31, %v1095_v26 }
 0x356   : > { %v1117_v38 = vpack.c.bf16 %v1094_v36, %v1093_v30 }
 0x358   : > { %6725 = vmatprep.mubr.bf16.mxu0 %v1117_v38  ;;  %v7342_v38 = vld [vmem:[#allocation5 + $0x180] sm:$0xff]  }
 0x359   : > { %6726 = vmatmul.mubr.bf16.gmra.mrb[96].mxu0 %v1118_v37  ;;  %v7341_v37 = vld [vmem:[#allocation5 + $0x1c0] sm:$0xff]  }
 0x35a   : > { %5933 = vmatprep.subr.bf16.mxu0 %v7341_v37 }
 0x35b   : > { %5934 = vmatpush3.bf16.msra.mxu0 %v7342_v38 }
 0x360   : > { %v6683_v39 = vpop.f32.mrb[68].mxu0 }
 0x361   : > { %v1099_v40 = vmax.f32 %v6683_v39, 0.0  ;;  %v1030_v45 = vpop.f32.mrb[69].mxu0  ;;  %v7343_v39 = vld [vmem:[#allocation5 + $0x1c8] sm:$0xff]  }
 0x362   : > { %v1097_v46 = vmax.f32 %v1030_v45, 0.0  ;;  %v6684_v51 = vpop.f32.mrb[70].mxu0  ;;  %5935 = vmatprep.subr.bf16.mxu0 %v7343_v39  ;;  %v7345_v45 = vld [vmem:[#allocation5 + $0x1d0] sm:$0xff]  }
 0x363   : > { %v1100_v52 = vmax.f32 %v6684_v51, 0.0  ;;  %v1033_v55 = vpop.f32.mrb[71].mxu0  ;;  %v7347_v51 = vld [vmem:[#allocation5 + $0x1d8] sm:$0xff]  }
 0x364   : > { %v1098_v56 = vmax.f32 %v1033_v55, 0.0  ;;  %v7349_v55 = vld [vmem:[#allocation5 + $0x1e0] sm:$0xff]  }
 0x365   : > { %v1120_v57 = vpack.c.bf16 %v1100_v52, %v1099_v40  ;;  %v7344_v40 = vld [vmem:[#allocation5 + $0x188] sm:$0xff]   ;;  %v7348_v52 = vld [vmem:[#allocation5 + $0x198] sm:$0xff]  }
 0x366   : > { %v1119_v58 = vpack.c.bf16 %v1098_v56, %v1097_v46  ;;  %5936 = vmatpush3.bf16.msra.mxu0 %v7344_v40  ;;  %v7346_v46 = vld [vmem:[#allocation5 + $0x190] sm:$0xff]   ;;  %v7350_v56 = vld [vmem:[#allocation5 + $0x1a0] sm:$0xff]  }
 0x367   : > { %5937 = vmatprep.subr.bf16.mxu0 %v7345_v45 }
 0x368   : > { %6729 = vmatprep.mubr.bf16.mxu0 %v1119_v58  ;;  %v7352_v58 = vld [vmem:[#allocation5 + $0x1a8] sm:$0xff]  }
 0x369   : > { %6730 = vmatmul.mubr.bf16.gmra.mrb[100].mxu0 %v1120_v57  ;;  %v7351_v57 = vld [vmem:[#allocation5 + $0x1e8] sm:$0xff]  }
 0x36a   : > { %5938 = vmatpush3.bf16.msra.mxu0 %v7346_v46 }
 0x36b   : > { %5939 = vmatprep.subr.bf16.mxu0 %v7347_v51 }
 0x36e   : > { %5940 = vmatpush3.bf16.msra.mxu0 %v7348_v52 }
 0x36f   : > { %5941 = vmatprep.subr.bf16.mxu0 %v7349_v55 }
 0x370   : > { %v6687_v3 = vpop.f32.mrb[72].mxu0 }
 0x371   : > { %v1103_v4 = vmax.f32 %v6687_v3, 0.0  ;;  %v1046_v7 = vpop.f32.mrb[73].mxu0  ;;  %v7353_v3 = vld [vmem:[#allocation5 + $0x1f0] sm:$0xff]  }
 0x372   : > { %v1101_v8 = vmax.f32 %v1046_v7, 0.0  ;;  %v6688_v10 = vpop.f32.mrb[74].mxu0  ;;  %5942 = vmatpush3.bf16.msra.mxu0 %v7350_v56  ;;  %v7354_v7 = vld [vmem:[#allocation5 + $0x1b0] sm:$0xff]  }
 0x373   : > { %v1104_v11 = vmax.f32 %v6688_v10, 0.0  ;;  %v1049_v12 = vpop.f32.mrb[75].mxu0  ;;  %5943 = vmatprep.subr.bf16.mxu0 %v7351_v57  ;;  %v7355_v10 = vld [vmem:[#allocation5 + $0x1f8] sm:$0xff]  }
 0x374   : > { %v1102_v15 = vmax.f32 %v1049_v12, 0.0 }
 0x375   : > { %v1122_v16 = vpack.c.bf16 %v1104_v11, %v1103_v4 }
 0x376   : > { %v1121_v17 = vpack.c.bf16 %v1102_v15, %v1101_v8  ;;  %5944 = vmatpush3.bf16.msra.mxu0 %v7352_v58 }
 0x377   : > { %5945 = vmatprep.subr.bf16.mxu0 %v7353_v3 }
 0x378   : > { %6733 = vmatprep.mubr.bf16.mxu0 %v1121_v17 }
 0x379   : > { %6734 = vmatmul.mubr.bf16.gmra.mrb[104].mxu0 %v1122_v16 }
 0x37a   : > { %5946 = vmatpush3.bf16.msra.mxu0 %v7354_v7 }
 0x37b   : > { %5947 = vmatprep.subr.bf16.mxu0 %v7355_v10 }
 0x380   : > { %v6691_v20 = vpop.f32.mrb[76].mxu0 }
 0x381   : > { %v1107_v21 = vmax.f32 %v6691_v20, 0.0  ;;  %v1062_v25 = vpop.f32.mrb[77].mxu0 }
 0x382   : > { %v1105_v26 = vmax.f32 %v1062_v25, 0.0  ;;  %v6692_v29 = vpop.f32.mrb[78].mxu0 }
 0x383   : > { %v1108_v30 = vmax.f32 %v6692_v29, 0.0  ;;  %v1065_v24 = vpop.f32.mrb[79].mxu0 }
 0x384   : > { %v1106_v31 = vmax.f32 %v1065_v24, 0.0 }
 0x385   : > { %v1124_v9 = vpack.c.bf16 %v1108_v30, %v1107_v21 }
 0x386   : > { %v1123_v36 = vpack.c.bf16 %v1106_v31, %v1105_v26 }
 0x388   : > { %6737 = vmatprep.mubr.bf16.mxu0 %v1123_v36 }
 0x389   : > { %6738 = vmatmul.mubr.bf16.gmra.mrb[108].mxu0 %v1124_v9 }
 0x38a   : > { %1831 = vmatprep.mubr.bf16.mxu0 %v7959_v19 }
 0x3fc   : > { %v6711_v4 = vpop.f32.mrb[80].mxu0 }
 0x3fd   : > { %v1223_v8 = vpop.f32.mrb[81].mxu0  ;;  %v1352_v12 = vmax.f32 %v6711_v4, 0.0 }
 0x3fe   : > { %v6712_v11 = vpop.f32.mrb[82].mxu0  ;;  %v1350_v17 = vmax.f32 %v1223_v8, 0.0 }
 0x3ff   : > { %v1353_v15 = vmax.f32 %v6712_v11, 0.0  ;;  %v1226_v16 = vpop.f32.mrb[83].mxu0 }
 0x400   : > { %v1351_v20 = vmax.f32 %v1226_v16, 0.0 }
 0x401   : > { %v1383_v21 = vpack.c.bf16 %v1353_v15, %v1352_v12 }
 0x402   : > { %v1382_v25 = vpack.c.bf16 %v1351_v20, %v1350_v17 }
 0x404   : > { %6757 = vmatprep.mubr.bf16.mxu1 %v1382_v25 }
 0x405   : > { %6758 = vmatmul.mubr.bf16.vlgmr.msra.gmra.mrb[48].mxu1 %v1383_v21 }
 0x40c   : > { %v6715_v26 = vpop.f32.mrb[84].mxu0 }
 0x40d   : > { %v1239_v29 = vpop.f32.mrb[85].mxu0  ;;  %v1356_v24 = vmax.f32 %v6715_v26, 0.0 }
 0x40e   : > { %v6716_v30 = vpop.f32.mrb[86].mxu0  ;;  %v1354_v36 = vmax.f32 %v1239_v29, 0.0 }
 0x40f   : > { %v1357_v31 = vmax.f32 %v6716_v30, 0.0  ;;  %v1242_v9 = vpop.f32.mrb[87].mxu0 }
 0x410   : > { %v1355_v37 = vmax.f32 %v1242_v9, 0.0 }
 0x411   : > { %v1385_v38 = vpack.c.bf16 %v1357_v31, %v1356_v24 }
 0x412   : > { %v1384_v39 = vpack.c.bf16 %v1355_v37, %v1354_v36 }
 0x414   : > { %v6719_v40 = vpop.f32.mrb[88].mxu0  ;;  %6761 = vmatprep.mubr.bf16.mxu1 %v1384_v39 }
 0x415   : > { %v1360_v45 = vmax.f32 %v6719_v40, 0.0  ;;  %v1255_v46 = vpop.f32.mrb[89].mxu0  ;;  %6762 = vmatmul.mubr.bf16.gmra.mrb[52].mxu1 %v1385_v38 }
 0x416   : > { %v6720_v51 = vpop.f32.mrb[90].mxu0  ;;  %v1358_v56 = vmax.f32 %v1255_v46, 0.0 }
 0x417   : > { %v1361_v52 = vmax.f32 %v6720_v51, 0.0  ;;  %v1258_v55 = vpop.f32.mrb[91].mxu0 }
 0x418   : > { %v1359_v57 = vmax.f32 %v1258_v55, 0.0 }
 0x419   : > { %v1387_v58 = vpack.c.bf16 %v1361_v52, %v1360_v45 }
 0x41a   : > { %v1386_v3 = vpack.c.bf16 %v1359_v57, %v1358_v56 }
 0x41c   : > { %6765 = vmatprep.mubr.bf16.mxu1 %v1386_v3  ;;  %v6723_v4 = vpop.f32.mrb[92].mxu0 }
 0x41d   : > { %6766 = vmatmul.mubr.bf16.gmra.mrb[56].mxu1 %v1387_v58  ;;  %v1364_v7 = vmax.f32 %v6723_v4, 0.0  ;;  %v1271_v8 = vpop.f32.mrb[93].mxu0 }
 0x41e   : > { %v1362_v10 = vmax.f32 %v1271_v8, 0.0  ;;  %v6724_v11 = vpop.f32.mrb[94].mxu0 }
 0x41f   : > { %v1365_v12 = vmax.f32 %v6724_v11, 0.0  ;;  %v1274_v15 = vpop.f32.mrb[95].mxu0 }
 0x420   : > { %v1363_v16 = vmax.f32 %v1274_v15, 0.0 }
 0x421   : > { %v1389_v17 = vpack.c.bf16 %v1365_v12, %v1364_v7 }
 0x422   : > { %v1388_v20 = vpack.c.bf16 %v1363_v16, %v1362_v10 }
 0x424   : > { %6769 = vmatprep.mubr.bf16.mxu1 %v1388_v20 }
 0x425   : > { %6770 = vmatmul.mubr.bf16.gmra.mrb[60].mxu1 %v1389_v17  ;;  %v7356_v17 = vld [vmem:[#allocation5 + $0x1b8] sm:$0xff]  }
 0x426   : > { %5948 = vmatpush3.bf16.msra.mxu0 %v7356_v17 }
 0x42c   : > { %v6727_v21 = vpop.f32.mrb[96].mxu0 }
 0x42d   : > { %v1368_v25 = vmax.f32 %v6727_v21, 0.0  ;;  %v1287_v26 = vpop.f32.mrb[97].mxu0 }
 0x42e   : > { %v1366_v29 = vmax.f32 %v1287_v26, 0.0  ;;  %v6728_v30 = vpop.f32.mrb[98].mxu0 }
 0x42f   : > { %v1369_v24 = vmax.f32 %v6728_v30, 0.0  ;;  %v1290_v31 = vpop.f32.mrb[99].mxu0 }
 0x430   : > { %v1367_v9 = vmax.f32 %v1290_v31, 0.0 }
 0x431   : > { %v1391_v36 = vpack.c.bf16 %v1369_v24, %v1368_v25 }
 0x432   : > { %v1390_v37 = vpack.c.bf16 %v1367_v9, %v1366_v29 }
 0x434   : > { %6773 = vmatprep.mubr.bf16.mxu1 %v1390_v37 }
 0x435   : > { %6774 = vmatmul.mubr.bf16.gmra.mrb[64].mxu1 %v1391_v36 }
 0x43c   : > { %v6731_v38 = vpop.f32.mrb[100].mxu0 }
 0x43d   : > { %v1372_v39 = vmax.f32 %v6731_v38, 0.0  ;;  %v1303_v40 = vpop.f32.mrb[101].mxu0  ;;  %v7357_v38 = vld [vmem:[#allocation5 + $0x200] sm:$0xff]  }
 0x43e   : > { %v1370_v45 = vmax.f32 %v1303_v40, 0.0  ;;  %v6732_v46 = vpop.f32.mrb[102].mxu0  ;;  %6789 = vmatprep.subr.bf16.mxu1 %v7357_v38 }
 0x43f   : > { %v1373_v51 = vmax.f32 %v6732_v46, 0.0  ;;  %v1306_v52 = vpop.f32.mrb[103].mxu0  ;;  %6790 = vmatpush3.bf16.msra.mxu1 %v7357_v38 }
 0x440   : > { %v1371_v55 = vmax.f32 %v1306_v52, 0.0 }
 0x441   : > { %v1393_v56 = vpack.c.bf16 %v1373_v51, %v1372_v39  ;;  %v7358_v39 = vld [vmem:[#allocation5 + $0x208] sm:$0xff]  }
 0x442   : > { %v1392_v57 = vpack.c.bf16 %v1371_v55, %v1370_v45  ;;  %6791 = vmatprep.subr.bf16.mxu1 %v7358_v39 }
 0x443   : > { %6792 = vmatpush3.bf16.msra.mxu1 %v7358_v39 }
 0x444   : > { %6777 = vmatprep.mubr.bf16.mxu1 %v1392_v57  ;;  %v7359_v57 = vld [vmem:[#allocation5 + $0x210] sm:$0xff]  }
 0x445   : > { %6778 = vmatmul.mubr.bf16.gmra.mrb[68].mxu1 %v1393_v56  ;;  %6793 = vmatprep.subr.bf16.mxu1 %v7359_v57 }
 0x447   : > { %6794 = vmatpush3.bf16.msra.mxu1 %v7359_v57 }
 0x44c   : > { %v6735_v58 = vpop.f32.mrb[104].mxu0 }
 0x44d   : > { %v1376_v3 = vmax.f32 %v6735_v58, 0.0  ;;  %v1319_v4 = vpop.f32.mrb[105].mxu0 }
 0x44e   : > { %v1374_v7 = vmax.f32 %v1319_v4, 0.0  ;;  %v6736_v8 = vpop.f32.mrb[106].mxu0  ;;  %v7360_v4 = vld [vmem:[#allocation5 + $0x218] sm:$0xff]  }
 0x44f   : > { %v1377_v10 = vmax.f32 %v6736_v8, 0.0  ;;  %v1322_v11 = vpop.f32.mrb[107].mxu0  ;;  %6795 = vmatprep.subr.bf16.mxu1 %v7360_v4 }
 0x450   : > { %v1375_v12 = vmax.f32 %v1322_v11, 0.0  ;;  %6796 = vmatpush3.bf16.msra.mxu1 %v7360_v4 }
 0x451   : > { %v1395_v15 = vpack.c.bf16 %v1377_v10, %v1376_v3 }
 0x452   : > { %v1394_v16 = vpack.c.bf16 %v1375_v12, %v1374_v7  ;;  %v7361_v7 = vld [vmem:[#allocation5 + $0x220] sm:$0xff]  }
 0x453   : > { %6797 = vmatprep.subr.bf16.mxu1 %v7361_v7 }
 0x454   : > { %6781 = vmatprep.mubr.bf16.mxu1 %v1394_v16  ;;  %6798 = vmatpush3.bf16.msra.mxu1 %v7361_v7 }
 0x455   : > { %6782 = vmatmul.mubr.bf16.gmra.mrb[72].mxu1 %v1395_v15 }
 0x45c   : > { %v6739_v20 = vpop.f32.mrb[108].mxu0 }
 0x45d   : > { %v1380_v21 = vmax.f32 %v6739_v20, 0.0  ;;  %v1335_v25 = vpop.f32.mrb[109].mxu0 }
 0x45e   : > { %v1378_v26 = vmax.f32 %v1335_v25, 0.0  ;;  %v6740_v29 = vpop.f32.mrb[110].mxu0 }
 0x45f   : > { %v1381_v30 = vmax.f32 %v6740_v29, 0.0  ;;  %v1338_v24 = vpop.f32.mrb[111].mxu0 }
 0x460   : > { %v1379_v31 = vmax.f32 %v1338_v24, 0.0 }
 0x461   : > { %v1397_v9 = vpack.c.bf16 %v1381_v30, %v1380_v21 }
 0x462   : > { %v1396_v36 = vpack.c.bf16 %v1379_v31, %v1378_v26 }
 0x464   : > { %6785 = vmatprep.mubr.bf16.mxu1 %v1396_v36 }
 0x465   : > { %6786 = vmatmul.mubr.bf16.gmra.mrb[76].mxu1 %v1397_v9 }
 0x4d8   : > { %v6759_v37 = vpop.f32.mrb[48].mxu1 }
 0x4d9   : > { %v1496_v40 = vpop.f32.mrb[49].mxu1  ;;  %v1625_v46 = vmax.f32 %v6759_v37, 0.0 }
 0x4da   : > { %v6760_v45 = vpop.f32.mrb[50].mxu1  ;;  %v1623_v55 = vmax.f32 %v1496_v40, 0.0 }
 0x4db   : > { %v1626_v51 = vmax.f32 %v6760_v45, 0.0  ;;  %v1499_v52 = vpop.f32.mrb[51].mxu1 }
 0x4dc   : > { %v1624_v56 = vmax.f32 %v1499_v52, 0.0 }
 0x4dd   : > { %v1656_v58 = vpack.c.bf16 %v1626_v51, %v1625_v46 }
 0x4de   : > { %v1655_v3 = vpack.c.bf16 %v1624_v56, %v1623_v55 }
 0x4e0   : > { %1832 = vmatmul.mubr.bf16.vlgmr.msra.gmra.mrb[112].mxu0 %v1655_v3 }
 0x4e1   : > { %1839 = vmatprep.mubr.bf16.mxu0 %v7957_v18 }
 0x4e8   : > { %v6763_v8 = vpop.f32.mrb[52].mxu1  ;;  %1840 = vmatmul.mubr.bf16.gmra.mrb[116].mxu0 %v1656_v58 }
 0x4e9   : > { %v1512_v10 = vpop.f32.mrb[53].mxu1  ;;  %1847 = vmatprep.mubr.bf16.mxu0 %v7966_v35  ;;  %v1629_v12 = vmax.f32 %v6763_v8, 0.0 }
 0x4ea   : > { %v6764_v11 = vpop.f32.mrb[54].mxu1  ;;  %v1627_v17 = vmax.f32 %v1512_v10, 0.0 }
 0x4eb   : > { %v1630_v15 = vmax.f32 %v6764_v11, 0.0  ;;  %v1515_v16 = vpop.f32.mrb[55].mxu1 }
 0x4ec   : > { %v1628_v20 = vmax.f32 %v1515_v16, 0.0 }
 0x4ed   : > { %v1658_v21 = vpack.c.bf16 %v1630_v15, %v1629_v12 }
 0x4ee   : > { %v1657_v25 = vpack.c.bf16 %v1628_v20, %v1627_v17 }
 0x4f0   : > { %v6767_v26 = vpop.f32.mrb[56].mxu1  ;;  %1848 = vmatmul.mubr.bf16.gmra.mrb[120].mxu0 %v1657_v25 }
 0x4f1   : > { %v1528_v29 = vpop.f32.mrb[57].mxu1  ;;  %1855 = vmatprep.mubr.bf16.mxu0 %v7964_v33  ;;  %v1633_v24 = vmax.f32 %v6767_v26, 0.0 }
 0x4f2   : > { %v6768_v30 = vpop.f32.mrb[58].mxu1  ;;  %v1631_v36 = vmax.f32 %v1528_v29, 0.0 }
 0x4f3   : > { %v1634_v31 = vmax.f32 %v6768_v30, 0.0  ;;  %v1531_v9 = vpop.f32.mrb[59].mxu1 }
 0x4f4   : > { %v1632_v37 = vmax.f32 %v1531_v9, 0.0 }
 0x4f5   : > { %v1660_v38 = vpack.c.bf16 %v1634_v31, %v1633_v24 }
 0x4f6   : > { %v1659_v39 = vpack.c.bf16 %v1632_v37, %v1631_v36 }
 0x4f8   : > { %1856 = vmatmul.mubr.bf16.gmra.mrb[124].mxu0 %v1658_v21  ;;  %v6771_v40 = vpop.f32.mrb[60].mxu1 }
 0x4f9   : > { %1863 = vmatprep.mubr.bf16.mxu0 %v7972_v50  ;;  %v1637_v45 = vmax.f32 %v6771_v40, 0.0  ;;  %v1544_v46 = vpop.f32.mrb[61].mxu1 }
 0x4fa   : > { %v1635_v51 = vmax.f32 %v1544_v46, 0.0  ;;  %v6772_v52 = vpop.f32.mrb[62].mxu1 }
 0x4fb   : > { %v1638_v55 = vmax.f32 %v6772_v52, 0.0  ;;  %v1547_v56 = vpop.f32.mrb[63].mxu1 }
 0x4fc   : > { %v1636_v57 = vmax.f32 %v1547_v56, 0.0 }
 0x4fd   : > { %v1662_v58 = vpack.c.bf16 %v1638_v55, %v1637_v45 }
 0x4fe   : > { %v1661_v3 = vpack.c.bf16 %v1636_v57, %v1635_v51 }
 0x500   : > { %1864 = vmatmul.mubr.bf16.gmra.mrb[128].mxu0 %v1659_v39 }
 0x501   : > { %1871 = vmatprep.mubr.bf16.mxu0 %v7970_v49 }
 0x508   : > { %1872 = vmatmul.mubr.bf16.gmra.mrb[132].mxu0 %v1660_v38  ;;  %v6775_v4 = vpop.f32.mrb[64].mxu1 }
 0x509   : > { %1879 = vmatprep.mubr.bf16.mxu0 %v7981_v0  ;;  %v1641_v7 = vmax.f32 %v6775_v4, 0.0  ;;  %v1560_v8 = vpop.f32.mrb[65].mxu1 }
 0x50a   : > { %v1639_v10 = vmax.f32 %v1560_v8, 0.0  ;;  %v6776_v11 = vpop.f32.mrb[66].mxu1 }
 0x50b   : > { %v1642_v12 = vmax.f32 %v6776_v11, 0.0  ;;  %v1563_v15 = vpop.f32.mrb[67].mxu1 }
 0x50c   : > { %v1640_v16 = vmax.f32 %v1563_v15, 0.0 }
 0x50d   : > { %v1664_v17 = vpack.c.bf16 %v1642_v12, %v1641_v7  ;;  %v7362_v7 = vld [vmem:[#allocation5 + $0x228] sm:$0xff]  }
 0x50e   : > { %v1663_v20 = vpack.c.bf16 %v1640_v16, %v1639_v10  ;;  %6799 = vmatprep.subr.bf16.mxu1 %v7362_v7 }
 0x50f   : > { %6800 = vmatpush3.bf16.msra.mxu1 %v7362_v7 }
 0x510   : > { %1880 = vmatmul.mubr.bf16.gmra.mrb[136].mxu0 %v1661_v3 }
 0x511   : > { %1887 = vmatprep.mubr.bf16.mxu0 %v7979_v63 }
 0x518   : > { %1888 = vmatmul.mubr.bf16.gmra.mrb[140].mxu0 %v1662_v58  ;;  %v6779_v21 = vpop.f32.mrb[68].mxu1 }
 0x519   : > { %1895 = vmatprep.mubr.bf16.mxu0 %v7988_v14  ;;  %v1645_v25 = vmax.f32 %v6779_v21, 0.0  ;;  %v1576_v26 = vpop.f32.mrb[69].mxu1  ;;  %v7364_v21 = vld [vmem:[#allocation5 + $0x238] sm:$0xff]  }
 0x51a   : > { %v1643_v29 = vmax.f32 %v1576_v26, 0.0  ;;  %v6780_v30 = vpop.f32.mrb[70].mxu1 }
 0x51b   : > { %v1646_v24 = vmax.f32 %v6780_v30, 0.0  ;;  %v1579_v31 = vpop.f32.mrb[71].mxu1 }
 0x51c   : > { %v1644_v9 = vmax.f32 %v1579_v31, 0.0 }
 0x51d   : > { %v1666_v36 = vpack.c.bf16 %v1646_v24, %v1645_v25 }
 0x51e   : > { %v1665_v37 = vpack.c.bf16 %v1644_v9, %v1643_v29 }
 0x520   : > { %1896 = vmatmul.mubr.bf16.gmra.mrb[144].mxu0 %v1663_v20  ;;  %v7363_v20 = vld [vmem:[#allocation5 + $0x230] sm:$0xff]  }
 0x521   : > { %1903 = vmatprep.mubr.bf16.mxu0 %v7986_v13  ;;  %6801 = vmatprep.subr.bf16.mxu1 %v7363_v20 }
 0x522   : > { %6802 = vmatpush3.bf16.msra.mxu1 %v7363_v20 }
 0x523   : > { %6803 = vmatprep.subr.bf16.mxu1 %v7364_v21 }
 0x526   : > { %6804 = vmatpush3.bf16.msra.mxu1 %v7364_v21  ;;  %v7544_v21 = vld [vmem:[%s7867_s14 + $0x18] sm:$0xff] }
 0x528   : > { %1904 = vmatmul.mubr.bf16.gmra.mrb[148].mxu0 %v1664_v17  ;;  %v6783_v38 = vpop.f32.mrb[72].mxu1 }
 0x529   : > { %1911 = vmatprep.mubr.bf16.mxu0 %v7994_v28  ;;  %v1649_v39 = vmax.f32 %v6783_v38, 0.0  ;;  %v1592_v40 = vpop.f32.mrb[73].mxu1 }
 0x52a   : > { %v1647_v45 = vmax.f32 %v1592_v40, 0.0  ;;  %v6784_v46 = vpop.f32.mrb[74].mxu1 }
 0x52b   : > { %v1650_v51 = vmax.f32 %v6784_v46, 0.0  ;;  %v1595_v52 = vpop.f32.mrb[75].mxu1 }
 0x52c   : > { %v1648_v55 = vmax.f32 %v1595_v52, 0.0 }
 0x52d   : > { %v1668_v56 = vpack.c.bf16 %v1650_v51, %v1649_v39 }
 0x52e   : > { %v1667_v57 = vpack.c.bf16 %v1648_v55, %v1647_v45  ;;  %v7365_v45 = vld [vmem:[#allocation5 + $0x240] sm:$0xff]  }
 0x52f   : > { %6837 = vmatprep.subr.bf16.mxu1 %v7365_v45 }
 0x530   : > { %1912 = vmatmul.mubr.bf16.gmra.mrb[152].mxu0 %v1665_v37 }
 0x531   : > { %1919 = vmatprep.mubr.bf16.mxu0 %v7992_v27 }
 0x538   : > { %1920 = vmatmul.mubr.bf16.gmra.mrb[156].mxu0 %v1666_v36  ;;  %v6787_v58 = vpop.f32.mrb[76].mxu1 }
 0x539   : > { %1927 = vmatprep.mubr.bf16.mxu0 %v8000_v44  ;;  %v1653_v3 = vmax.f32 %v6787_v58, 0.0  ;;  %v1608_v4 = vpop.f32.mrb[77].mxu1  ;;  %v7542_v58 = vld [vmem:[%s7867_s14 + $0x8] sm:$0xff] }
 0x53a   : > { %v1651_v8 = vmax.f32 %v1608_v4, 0.0  ;;  %v6788_v10 = vpop.f32.mrb[78].mxu1 }
 0x53b   : > { %v1654_v11 = vmax.f32 %v6788_v10, 0.0  ;;  %v1611_v12 = vpop.f32.mrb[79].mxu1 }
 0x53c   : > { %v1652_v15 = vmax.f32 %v1611_v12, 0.0 }
 0x53d   : > { %v1670_v16 = vpack.c.bf16 %v1654_v11, %v1653_v3 }
 0x53e   : > { %v1669_v17 = vpack.c.bf16 %v1652_v15, %v1651_v8 }
 0x540   : > { %1928 = vmatmul.mubr.bf16.gmra.mrb[160].mxu0 %v1667_v57 }
 0x541   : > { %1935 = vmatprep.mubr.bf16.mxu0 %v7998_v43 }
 0x548   : > { %1936 = vmatmul.mubr.bf16.gmra.mrb[164].mxu0 %v1668_v56  ;;  %v7541_v56 = vld [vmem:[%s7867_s14] sm:$0xff] }
 0x549   : > { %1943 = vmatprep.mubr.bf16.mxu0 %v8006_v62 }
 0x550   : > { %1944 = vmatmul.mubr.bf16.gmra.mrb[168].mxu0 %v1669_v17  ;;  %v7543_v17 = vld [vmem:[%s7867_s14 + $0x10] sm:$0xff] }
 0x551   : > { %1951 = vmatprep.mubr.bf16.mxu0 %v8004_v61 }
 0x558   : > { %1952 = vmatmul.mubr.bf16.gmra.mrb[172].mxu0 %v1670_v16 }
 0x5b3   : > { %v5949_v25 = vpop.f32.mrb[112].mxu0 }
 0x5b4   : > { %v5950_v26 = vpop.f32.mrb[113].mxu0 }
 0x5b5   : > { %v5951_v29 = vadd.f32 %v5950_v26, %v5949_v25  ;;  %v5952_v30 = vpop.f32.mrb[114].mxu0 }
 0x5b6   : > { %v5953_v24 = vpop.f32.mrb[115].mxu0 }
 0x5b7   : > { %7477 = vtanh.f32 %v5951_v29  ;;  %v5954_v31 = vadd.f32 %v5953_v24, %v5952_v30 }
 0x5b9   : > { %7479 = vtanh.f32 %v5954_v31 }
 0x5bb   : > { %v5955_v9 = vpop.f32.mrb[116].mxu0 }
 0x5bc   : > { %v5956_v36 = vpop.f32.mrb[117].mxu0 }
 0x5bd   : > { %v5957_v37 = vadd.f32 %v5956_v36, %v5955_v9  ;;  %v5958_v38 = vpop.f32.mrb[118].mxu0  ;;  %v7366_v9 = vld [vmem:[#allocation5 + $0x248] sm:$0xff]  }
 0x5be   : > { %v5959_v39 = vpop.f32.mrb[119].mxu0 }
 0x5bf   : > { %7481 = vtanh.f32 %v5957_v37  ;;  %v5960_v40 = vadd.f32 %v5959_v39, %v5958_v38  ;;  %v7367_v38 = vld [vmem:[#allocation5 + $0x250] sm:$0xff]  }
 0x5c1   : > { %v7478_v46 = vpop.eup %7477  ;;  %7483 = vtanh.f32 %v5960_v40 }
 0x5c2   : > { %v1992_v57 = vadd.f32 %v7541_v56, %v7478_v46 }
 0x5c3   : > { %v7480_v51 = vpop.eup %7479  ;;  %v5961_v52 = vpop.f32.mrb[120].mxu0 }
 0x5c4   : > { %v5962_v55 = vpop.f32.mrb[121].mxu0  ;;  %v1993_v3 = vadd.f32 %v7542_v58, %v7480_v51  ;;  %v7545_v51 = vld [vmem:[%s7867_s14 + $0x20] sm:$0xff] }
 0x5c5   : > { %v5963_v4 = vadd.f32 %v5962_v55, %v5961_v52  ;;  %v5964_v7 = vpop.f32.mrb[122].mxu0  ;;  %v7546_v55 = vld [vmem:[%s7867_s14 + $0x28] sm:$0xff] }
 0x5c6   : > { %v5965_v8 = vpop.f32.mrb[123].mxu0  ;;  %v2024_v10 = vpack.c.bf16 %v1993_v3, %v1992_v57 }
 0x5c7   : > { %7485 = vtanh.f32 %v5963_v4  ;;  %v5966_v11 = vadd.f32 %v5965_v8, %v5964_v7  ;;  %v7368_v7 = vld [vmem:[#allocation5 + $0x258] sm:$0xff]  }
 0x5c8   : > { %6805 = vmatprep.mubr.bf16.mxu1 %v2024_v10  ;;  %v7369_v10 = vld [vmem:[#allocation5 + $0x260] sm:$0xff]  }
 0x5c9   : > { %v7482_v12 = vpop.eup %7481  ;;  %7487 = vtanh.f32 %v5966_v11 }
 0x5ca   : > { %v1994_v20 = vadd.f32 %v7543_v17, %v7482_v12 }
 0x5cb   : > { %v7484_v15 = vpop.eup %7483  ;;  %v5967_v16 = vpop.f32.mrb[124].mxu0 }
 0x5cc   : > { %v1995_v25 = vadd.f32 %v7544_v21, %v7484_v15  ;;  %v5968_v26 = vpop.f32.mrb[125].mxu0 }
 0x5cd   : > { %v5969_v29 = vadd.f32 %v5968_v26, %v5967_v16  ;;  %v5970_v30 = vpop.f32.mrb[126].mxu0  ;;  %v7547_v16 = vld [vmem:[%s7867_s14 + $0x30] sm:$0xff] }
 0x5ce   : > { %v5971_v24 = vpop.f32.mrb[127].mxu0  ;;  %v2025_v31 = vpack.c.bf16 %v1995_v25, %v1994_v20  ;;  %v7548_v20 = vld [vmem:[%s7867_s14 + $0x38] sm:$0xff] }
 0x5cf   : > { %7489 = vtanh.f32 %v5969_v29  ;;  %v5972_v36 = vadd.f32 %v5971_v24, %v5970_v30  ;;  %v7370_v24 = vld [vmem:[#allocation5 + $0x268] sm:$0xff]  }
 0x5d0   : > { %6806 = vmatmul.mubr.bf16.vlgmr.msra.gmra.mrb[80].mxu1 %v2025_v31 }
 0x5d1   : > { %v7486_v37 = vpop.eup %7485  ;;  %7491 = vtanh.f32 %v5972_v36  ;;  %6838 = vmatpush3.bf16.msra.mxu1 %v7365_v45  ;;  %v7371_v36 = vld [vmem:[#allocation5 + $0x270] sm:$0xff]  }
 0x5d2   : > { %6839 = vmatprep.subr.bf16.mxu1 %v7366_v9  ;;  %v1996_v52 = vadd.f32 %v7545_v51, %v7486_v37  ;;  %v7550_v51 = vld [vmem:[%s7867_s14 + $0x48] sm:$0xff] }
 0x5d3   : > { %v7488_v39 = vpop.eup %7487  ;;  %v5973_v40 = vpop.f32.mrb[128].mxu0 }
 0x5d4   : > { %v5974_v46 = vpop.f32.mrb[129].mxu0  ;;  %v1997_v56 = vadd.f32 %v7546_v55, %v7488_v39 }
 0x5d5   : > { %v5975_v57 = vadd.f32 %v5974_v46, %v5973_v40  ;;  %v5976_v58 = vpop.f32.mrb[130].mxu0  ;;  %6840 = vmatpush3.bf16.msra.mxu1 %v7366_v9  ;;  %v7549_v40 = vld [vmem:[%s7867_s14 + $0x40] sm:$0xff] }
 0x5d6   : > { %v5977_v3 = vpop.f32.mrb[131].mxu0  ;;  %v2026_v4 = vpack.c.bf16 %v1997_v56, %v1996_v52  ;;  %6841 = vmatprep.subr.bf16.mxu1 %v7367_v38 }
 0x5d7   : > { %7493 = vtanh.f32 %v5975_v57  ;;  %v5978_v45 = vadd.f32 %v5977_v3, %v5976_v58 }
 0x5d8   : > { %6809 = vmatprep.mubr.bf16.mxu1 %v2026_v4 }
 0x5d9   : > { %v7490_v8 = vpop.eup %7489  ;;  %7495 = vtanh.f32 %v5978_v45  ;;  %6842 = vmatpush3.bf16.msra.mxu1 %v7367_v38 }
 0x5da   : > { %6843 = vmatprep.subr.bf16.mxu1 %v7368_v7  ;;  %v1998_v17 = vadd.f32 %v7547_v16, %v7490_v8 }
 0x5db   : > { %v7492_v11 = vpop.eup %7491  ;;  %v5979_v12 = vpop.f32.mrb[132].mxu0 }
 0x5dc   : > { %v5980_v15 = vpop.f32.mrb[133].mxu0  ;;  %v1999_v21 = vadd.f32 %v7548_v20, %v7492_v11 }
 0x5dd   : > { %v5981_v25 = vadd.f32 %v5980_v15, %v5979_v12  ;;  %v5982_v26 = vpop.f32.mrb[134].mxu0  ;;  %6844 = vmatpush3.bf16.msra.mxu1 %v7368_v7  ;;  %v7552_v12 = vld [vmem:[%s7867_s14 + $0x58] sm:$0xff] }
 0x5de   : > { %v5983_v29 = vpop.f32.mrb[135].mxu0  ;;  %v2027_v30 = vpack.c.bf16 %v1999_v21, %v1998_v17  ;;  %6845 = vmatprep.subr.bf16.mxu1 %v7369_v10 }
 0x5df   : > { %7497 = vtanh.f32 %v5981_v25  ;;  %v5984_v31 = vadd.f32 %v5983_v29, %v5982_v26 }
 0x5e0   : > { %6810 = vmatmul.mubr.bf16.gmra.mrb[84].mxu1 %v2027_v30 }
 0x5e1   : > { %v7494_v9 = vpop.eup %7493  ;;  %7499 = vtanh.f32 %v5984_v31  ;;  %6846 = vmatpush3.bf16.msra.mxu1 %v7369_v10  ;;  %v7551_v10 = vld [vmem:[%s7867_s14 + $0x50] sm:$0xff]  ;;  %v7553_v31 = vld [vmem:[%s7867_s14 + $0x60] sm:$0xff] }
 0x5e2   : > { %6847 = vmatprep.subr.bf16.mxu1 %v7370_v24  ;;  %v2000_v46 = vadd.f32 %v7549_v40, %v7494_v9 }
 0x5e3   : > { %v7496_v37 = vpop.eup %7495  ;;  %v5985_v38 = vpop.f32.mrb[136].mxu0 }
 0x5e4   : > { %v5986_v39 = vpop.f32.mrb[137].mxu0  ;;  %v2001_v52 = vadd.f32 %v7550_v51, %v7496_v37 }
 0x5e5   : > { %v5987_v55 = vadd.f32 %v5986_v39, %v5985_v38  ;;  %v5988_v56 = vpop.f32.mrb[138].mxu0  ;;  %6848 = vmatpush3.bf16.msra.mxu1 %v7370_v24 }
 0x5e6   : > { %v5989_v57 = vpop.f32.mrb[139].mxu0  ;;  %v2028_v58 = vpack.c.bf16 %v2001_v52, %v2000_v46  ;;  %6849 = vmatprep.subr.bf16.mxu1 %v7371_v36 }
 0x5e7   : > { %7501 = vtanh.f32 %v5987_v55  ;;  %v5990_v3 = vadd.f32 %v5989_v57, %v5988_v56 }
 0x5e8   : > { %6813 = vmatprep.mubr.bf16.mxu1 %v2028_v58  ;;  %v7555_v58 = vld [vmem:[%s7867_s14 + $0x70] sm:$0xff] }
 0x5e9   : > { %v7498_v4 = vpop.eup %7497  ;;  %7503 = vtanh.f32 %v5990_v3  ;;  %6850 = vmatpush3.bf16.msra.mxu1 %v7371_v36  ;;  %v7554_v36 = vld [vmem:[%s7867_s14 + $0x68] sm:$0xff] }
 0x5ea   : > { %v2002_v11 = vadd.f32 %v7551_v10, %v7498_v4  ;;  %v7556_v4 = vld [vmem:[%s7867_s14 + $0x78] sm:$0xff] }
 0x5eb   : > { %v7500_v7 = vpop.eup %7499  ;;  %v5991_v45 = vpop.f32.mrb[140].mxu0 }
 0x5ec   : > { %v5992_v8 = vpop.f32.mrb[141].mxu0  ;;  %v2003_v15 = vadd.f32 %v7552_v12, %v7500_v7 }
 0x5ed   : > { %v5993_v16 = vadd.f32 %v5992_v8, %v5991_v45  ;;  %v5994_v17 = vpop.f32.mrb[142].mxu0 }
 0x5ee   : > { %v5995_v20 = vpop.f32.mrb[143].mxu0  ;;  %v2029_v21 = vpack.c.bf16 %v2003_v15, %v2002_v11 }
 0x5ef   : > { %7505 = vtanh.f32 %v5993_v16  ;;  %v5996_v25 = vadd.f32 %v5995_v20, %v5994_v17 }
 0x5f0   : > { %6814 = vmatmul.mubr.bf16.gmra.mrb[88].mxu1 %v2029_v21  ;;  %v7557_v21 = vld [vmem:[%s7867_s14 + $0x80] sm:$0xff] }
 0x5f1   : > { %v7502_v26 = vpop.eup %7501  ;;  %7507 = vtanh.f32 %v5996_v25 }
 0x5f2   : > { %v2004_v9 = vadd.f32 %v7553_v31, %v7502_v26  ;;  %v7558_v26 = vld [vmem:[%s7867_s14 + $0x88] sm:$0xff] }
 0x5f3   : > { %v7504_v29 = vpop.eup %7503  ;;  %v5997_v30 = vpop.f32.mrb[144].mxu0 }
 0x5f4   : > { %v5998_v24 = vpop.f32.mrb[145].mxu0  ;;  %v2005_v37 = vadd.f32 %v7554_v36, %v7504_v29 }
 0x5f5   : > { %v5999_v38 = vadd.f32 %v5998_v24, %v5997_v30  ;;  %v6000_v39 = vpop.f32.mrb[146].mxu0 }
 0x5f6   : > { %v6001_v40 = vpop.f32.mrb[147].mxu0  ;;  %v2030_v46 = vpack.c.bf16 %v2005_v37, %v2004_v9 }
 0x5f7   : > { %7509 = vtanh.f32 %v5999_v38  ;;  %v6002_v51 = vadd.f32 %v6001_v40, %v6000_v39 }
 0x5f8   : > { %6817 = vmatprep.mubr.bf16.mxu1 %v2030_v46  ;;  %v7559_v46 = vld [vmem:[%s7867_s14 + $0x90] sm:$0xff] }
 0x5f9   : > { %v7506_v52 = vpop.eup %7505  ;;  %7511 = vtanh.f32 %v6002_v51 }
 0x5fa   : > { %v2006_v3 = vadd.f32 %v7555_v58, %v7506_v52  ;;  %v7560_v52 = vld [vmem:[%s7867_s14 + $0x98] sm:$0xff] }
 0x5fb   : > { %v7508_v55 = vpop.eup %7507  ;;  %v6003_v56 = vpop.f32.mrb[148].mxu0 }
 0x5fc   : > { %v6004_v57 = vpop.f32.mrb[149].mxu0  ;;  %v2007_v7 = vadd.f32 %v7556_v4, %v7508_v55 }
 0x5fd   : > { %v6005_v45 = vadd.f32 %v6004_v57, %v6003_v56  ;;  %v6006_v8 = vpop.f32.mrb[150].mxu0 }
 0x5fe   : > { %v6007_v10 = vpop.f32.mrb[151].mxu0  ;;  %v2031_v11 = vpack.c.bf16 %v2007_v7, %v2006_v3 }
 0x5ff   : > { %7513 = vtanh.f32 %v6005_v45  ;;  %v6008_v12 = vadd.f32 %v6007_v10, %v6006_v8 }
 0x600   : > { %6818 = vmatmul.mubr.bf16.gmra.mrb[92].mxu1 %v2031_v11  ;;  %v7561_v11 = vld [vmem:[%s7867_s14 + $0xa0] sm:$0xff] }
 0x601   : > { %v7510_v15 = vpop.eup %7509  ;;  %7515 = vtanh.f32 %v6008_v12 }
 0x602   : > { %v2008_v25 = vadd.f32 %v7557_v21, %v7510_v15  ;;  %v7562_v15 = vld [vmem:[%s7867_s14 + $0xa8] sm:$0xff] }
 0x603   : > { %v7512_v16 = vpop.eup %7511  ;;  %v6009_v17 = vpop.f32.mrb[152].mxu0 }
 0x604   : > { %v6010_v20 = vpop.f32.mrb[153].mxu0  ;;  %v2009_v29 = vadd.f32 %v7558_v26, %v7512_v16 }
 0x605   : > { %v6011_v30 = vadd.f32 %v6010_v20, %v6009_v17  ;;  %v6012_v24 = vpop.f32.mrb[154].mxu0 }
 0x606   : > { %v6013_v31 = vpop.f32.mrb[155].mxu0  ;;  %v2032_v9 = vpack.c.bf16 %v2009_v29, %v2008_v25 }
 0x607   : > { %7517 = vtanh.f32 %v6011_v30  ;;  %v6014_v36 = vadd.f32 %v6013_v31, %v6012_v24 }
 0x608   : > { %6821 = vmatprep.mubr.bf16.mxu1 %v2032_v9  ;;  %v7563_v9 = vld [vmem:[%s7867_s14 + $0xb0] sm:$0xff] }
 0x609   : > { %v7514_v37 = vpop.eup %7513  ;;  %7519 = vtanh.f32 %v6014_v36 }
 0x60a   : > { %v2010_v51 = vadd.f32 %v7559_v46, %v7514_v37  ;;  %v7564_v37 = vld [vmem:[%s7867_s14 + $0xb8] sm:$0xff] }
 0x60b   : > { %v7516_v38 = vpop.eup %7515  ;;  %v6015_v39 = vpop.f32.mrb[156].mxu0 }
 0x60c   : > { %v6016_v40 = vpop.f32.mrb[157].mxu0  ;;  %v2011_v55 = vadd.f32 %v7560_v52, %v7516_v38 }
 0x60d   : > { %v6017_v56 = vadd.f32 %v6016_v40, %v6015_v39  ;;  %v6018_v57 = vpop.f32.mrb[158].mxu0 }
 0x60e   : > { %v6019_v58 = vpop.f32.mrb[159].mxu0  ;;  %v2033_v3 = vpack.c.bf16 %v2011_v55, %v2010_v51 }
 0x60f   : > { %7521 = vtanh.f32 %v6017_v56  ;;  %v6020_v4 = vadd.f32 %v6019_v58, %v6018_v57 }
 0x610   : > { %6822 = vmatmul.mubr.bf16.gmra.mrb[96].mxu1 %v2033_v3  ;;  %v7565_v3 = vld [vmem:[%s7867_s14 + $0xc0] sm:$0xff] }
 0x611   : > { %v7518_v7 = vpop.eup %7517  ;;  %7523 = vtanh.f32 %v6020_v4 }
 0x612   : > { %v2012_v12 = vadd.f32 %v7561_v11, %v7518_v7  ;;  %v7566_v7 = vld [vmem:[%s7867_s14 + $0xc8] sm:$0xff] }
 0x613   : > { %v7520_v45 = vpop.eup %7519  ;;  %v6021_v8 = vpop.f32.mrb[160].mxu0 }
 0x614   : > { %v6022_v10 = vpop.f32.mrb[161].mxu0  ;;  %v2013_v16 = vadd.f32 %v7562_v15, %v7520_v45 }
 0x615   : > { %v6023_v17 = vadd.f32 %v6022_v10, %v6021_v8  ;;  %v6024_v20 = vpop.f32.mrb[162].mxu0  ;;  %v7372_v8 = vld [vmem:[#allocation5 + $0x278] sm:$0xff]  }
 0x616   : > { %v6025_v21 = vpop.f32.mrb[163].mxu0  ;;  %v2034_v25 = vpack.c.bf16 %v2013_v16, %v2012_v12  ;;  %6851 = vmatprep.subr.bf16.mxu1 %v7372_v8 }
 0x617   : > { %7525 = vtanh.f32 %v6023_v17  ;;  %v6026_v26 = vadd.f32 %v6025_v21, %v6024_v20  ;;  %6852 = vmatpush3.bf16.msra.mxu1 %v7372_v8 }
 0x618   : > { %6825 = vmatprep.mubr.bf16.mxu1 %v2034_v25 }
 0x619   : > { %v7522_v29 = vpop.eup %7521  ;;  %7527 = vtanh.f32 %v6026_v26  ;;  %v7567_v26 = vld [vmem:[%s7867_s14 + $0xd0] sm:$0xff] }
 0x61a   : > { %v2014_v36 = vadd.f32 %v7563_v9, %v7522_v29 }
 0x61b   : > { %v7524_v30 = vpop.eup %7523  ;;  %v6027_v24 = vpop.f32.mrb[164].mxu0 }
 0x61c   : > { %v6028_v31 = vpop.f32.mrb[165].mxu0  ;;  %v2015_v38 = vadd.f32 %v7564_v37, %v7524_v30  ;;  %v7568_v30 = vld [vmem:[%s7867_s14 + $0xd8] sm:$0xff] }
 0x61d   : > { %v6029_v39 = vadd.f32 %v6028_v31, %v6027_v24  ;;  %v6030_v40 = vpop.f32.mrb[166].mxu0 }
 0x61e   : > { %v6031_v46 = vpop.f32.mrb[167].mxu0  ;;  %v2035_v51 = vpack.c.bf16 %v2015_v38, %v2014_v36 }
 0x61f   : > { %7529 = vtanh.f32 %v6029_v39  ;;  %v6032_v52 = vadd.f32 %v6031_v46, %v6030_v40  ;;  %v7569_v46 = vld [vmem:[%s7867_s14 + $0xe0] sm:$0xff] }
 0x620   : > { %6826 = vmatmul.mubr.bf16.gmra.mrb[100].mxu1 %v2035_v51 }
 0x621   : > { %v7526_v55 = vpop.eup %7525  ;;  %7531 = vtanh.f32 %v6032_v52  ;;  %v7570_v52 = vld [vmem:[%s7867_s14 + $0xe8] sm:$0xff] }
 0x622   : > { %v2016_v4 = vadd.f32 %v7565_v3, %v7526_v55  ;;  %v7571_v3 = vld [vmem:[%s7867_s14 + $0xf0] sm:$0xff] }
 0x623   : > { %v7528_v56 = vpop.eup %7527  ;;  %v6033_v57 = vpop.f32.mrb[168].mxu0 }
 0x624   : > { %v6034_v58 = vpop.f32.mrb[169].mxu0  ;;  %v2017_v45 = vadd.f32 %v7566_v7, %v7528_v56  ;;  %v7572_v7 = vld [vmem:[%s7867_s14 + $0xf8] sm:$0xff] }
 0x625   : > { %v6035_v10 = vadd.f32 %v6034_v58, %v6033_v57  ;;  %v6036_v11 = vpop.f32.mrb[170].mxu0 }
 0x626   : > { %v6037_v12 = vpop.f32.mrb[171].mxu0  ;;  %v2036_v15 = vpack.c.bf16 %v2017_v45, %v2016_v4 }
 0x627   : > { %7533 = vtanh.f32 %v6035_v10  ;;  %v6038_v16 = vadd.f32 %v6037_v12, %v6036_v11  ;;  %v7373_v10 = vld [vmem:[#allocation5 + $0x280] sm:$0xff]   ;;  %v7374_v11 = vld [vmem:[#allocation5 + $0x288] sm:$0xff]   ;;  %v7375_v12 = vld [vmem:[#allocation5 + $0x290] sm:$0xff]  }
 0x628   : > { %6829 = vmatprep.mubr.bf16.mxu1 %v2036_v15  ;;  %6885 = vmatprep.subr.bf16.mxu0 %v7373_v10  ;;  %v7376_v15 = vld [vmem:[#allocation5 + $0x298] sm:$0xff]  }
 0x629   : > { %v7530_v17 = vpop.eup %7529  ;;  %7535 = vtanh.f32 %v6038_v16  ;;  %6886 = vmatpush3.bf16.msra.mxu0 %v7373_v10  ;;  %v7377_v16 = vld [vmem:[#allocation5 + $0x2a0] sm:$0xff]  }
 0x62a   : > { %v2018_v29 = vadd.f32 %v7567_v26, %v7530_v17  ;;  %6887 = vmatprep.subr.bf16.mxu0 %v7374_v11 }
 0x62b   : > { %v7532_v20 = vpop.eup %7531  ;;  %v6039_v21 = vpop.f32.mrb[172].mxu0 }
 0x62c   : > { %v6040_v25 = vpop.f32.mrb[173].mxu0  ;;  %v2019_v24 = vadd.f32 %v7568_v30, %v7532_v20 }
 0x62d   : > { %v6041_v31 = vadd.f32 %v6040_v25, %v6039_v21  ;;  %v6042_v9 = vpop.f32.mrb[174].mxu0  ;;  %6888 = vmatpush3.bf16.msra.mxu0 %v7374_v11  ;;  %v7378_v21 = vld [vmem:[#allocation5 + $0x2a8] sm:$0xff]  }
 0x62e   : > { %v6043_v36 = vpop.f32.mrb[175].mxu0  ;;  %v2037_v37 = vpack.c.bf16 %v2019_v24, %v2018_v29  ;;  %6889 = vmatprep.subr.bf16.mxu0 %v7375_v12 }
 0x62f   : > { %7537 = vtanh.f32 %v6041_v31  ;;  %v6044_v38 = vadd.f32 %v6043_v36, %v6042_v9  ;;  %v7379_v36 = vld [vmem:[#allocation5 + $0x2b0] sm:$0xff]  }
 0x630   : > { %6830 = vmatmul.mubr.bf16.gmra.mrb[104].mxu1 %v2037_v37 }
 0x631   : > { %v7534_v39 = vpop.eup %7533  ;;  %7539 = vtanh.f32 %v6044_v38  ;;  %6890 = vmatpush3.bf16.msra.mxu0 %v7375_v12  ;;  %v7380_v38 = vld [vmem:[#allocation5 + $0x2b8] sm:$0xff]  }
 0x632   : > { %v2020_v51 = vadd.f32 %v7569_v46, %v7534_v39  ;;  %6891 = vmatprep.subr.bf16.mxu0 %v7376_v15 }
 0x633   : > { %v7536_v40 = vpop.eup %7535 }
 0x634   : > { %v2021_v55 = vadd.f32 %v7570_v52, %v7536_v40 }
 0x635   : > { %6892 = vmatpush3.bf16.msra.mxu0 %v7376_v15 }
 0x636   : > { %v2038_v56 = vpack.c.bf16 %v2021_v55, %v2020_v51  ;;  %6893 = vmatprep.subr.bf16.mxu0 %v7377_v16 }
 0x638   : > { %6833 = vmatprep.mubr.bf16.mxu1 %v2038_v56 }
 0x639   : > { %v7538_v57 = vpop.eup %7537  ;;  %6894 = vmatpush3.bf16.msra.mxu0 %v7377_v16 }
 0x63a   : > { %v2022_v4 = vadd.f32 %v7571_v3, %v7538_v57  ;;  %6895 = vmatprep.subr.bf16.mxu0 %v7378_v21 }
 0x63b   : > { %v7540_v58 = vpop.eup %7539 }
 0x63c   : > { %v2023_v45 = vadd.f32 %v7572_v7, %v7540_v58 }
 0x63d   : > { %6896 = vmatpush3.bf16.msra.mxu0 %v7378_v21 }
 0x63e   : > { %v2039_v8 = vpack.c.bf16 %v2023_v45, %v2022_v4  ;;  %6897 = vmatprep.subr.bf16.mxu0 %v7379_v36 }
 0x640   : > { %6834 = vmatmul.mubr.bf16.gmra.mrb[108].mxu1 %v2039_v8 }
 0x641   : > { %6898 = vmatpush3.bf16.msra.mxu0 %v7379_v36 }
 0x642   : > { %6899 = vmatprep.subr.bf16.mxu0 %v7380_v38 }
 0x645   : > { %6900 = vmatpush3.bf16.msra.mxu0 %v7380_v38 }
 0x6a3   : > { %v6807_v17 = vpop.f32.mrb[80].mxu1 }
 0x6a4   : > { %v2138_v20 = vpop.f32.mrb[81].mxu1  ;;  %v2267_v26 = vmax.f32 %v6807_v17, 0.0 }
 0x6a5   : > { %v6808_v25 = vpop.f32.mrb[82].mxu1  ;;  %v2265_v24 = vmax.f32 %v2138_v20, 0.0 }
 0x6a6   : > { %v2268_v29 = vmax.f32 %v6808_v25, 0.0  ;;  %v2141_v30 = vpop.f32.mrb[83].mxu1 }
 0x6a7   : > { %v2266_v31 = vmax.f32 %v2141_v30, 0.0 }
 0x6a8   : > { %v2298_v9 = vpack.c.bf16 %v2268_v29, %v2267_v26 }
 0x6a9   : > { %v2297_v37 = vpack.c.bf16 %v2266_v31, %v2265_v24 }
 0x6ab   : > { %6853 = vmatprep.mubr.bf16.mxu1 %v2297_v37 }
 0x6ac   : > { %6854 = vmatmul.mubr.bf16.vlgmr.msra.gmra.mrb[112].mxu1 %v2298_v9 }
 0x6b3   : > { %v6811_v39 = vpop.f32.mrb[84].mxu1 }
 0x6b4   : > { %v2154_v40 = vpop.f32.mrb[85].mxu1  ;;  %v2271_v51 = vmax.f32 %v6811_v39, 0.0 }
 0x6b5   : > { %v6812_v46 = vpop.f32.mrb[86].mxu1  ;;  %v2269_v56 = vmax.f32 %v2154_v40, 0.0 }
 0x6b6   : > { %v2272_v52 = vmax.f32 %v6812_v46, 0.0  ;;  %v2157_v55 = vpop.f32.mrb[87].mxu1 }
 0x6b7   : > { %v2270_v57 = vmax.f32 %v2157_v55, 0.0 }
 0x6b8   : > { %v2300_v58 = vpack.c.bf16 %v2272_v52, %v2271_v51 }
 0x6b9   : > { %v2299_v3 = vpack.c.bf16 %v2270_v57, %v2269_v56 }
 0x6bb   : > { %6857 = vmatprep.mubr.bf16.mxu1 %v2299_v3 }
 0x6bc   : > { %6858 = vmatmul.mubr.bf16.gmra.mrb[116].mxu1 %v2300_v58 }
 0x6c3   : > { %v6815_v4 = vpop.f32.mrb[88].mxu1 }
 0x6c4   : > { %v2170_v7 = vpop.f32.mrb[89].mxu1  ;;  %v2275_v8 = vmax.f32 %v6815_v4, 0.0 }
 0x6c5   : > { %v6816_v45 = vpop.f32.mrb[90].mxu1  ;;  %v2273_v12 = vmax.f32 %v2170_v7, 0.0 }
 0x6c6   : > { %v2276_v10 = vmax.f32 %v6816_v45, 0.0  ;;  %v2173_v11 = vpop.f32.mrb[91].mxu1 }
 0x6c7   : > { %v2274_v15 = vmax.f32 %v2173_v11, 0.0 }
 0x6c8   : > { %v2302_v16 = vpack.c.bf16 %v2276_v10, %v2275_v8 }
 0x6c9   : > { %v2301_v17 = vpack.c.bf16 %v2274_v15, %v2273_v12 }
 0x6cb   : > { %6861 = vmatprep.mubr.bf16.mxu1 %v2301_v17 }
 0x6cc   : > { %6862 = vmatmul.mubr.bf16.gmra.mrb[120].mxu1 %v2302_v16 }
 0x6d3   : > { %v6819_v20 = vpop.f32.mrb[92].mxu1 }
 0x6d4   : > { %v2186_v21 = vpop.f32.mrb[93].mxu1  ;;  %v2279_v26 = vmax.f32 %v6819_v20, 0.0 }
 0x6d5   : > { %v6820_v25 = vpop.f32.mrb[94].mxu1  ;;  %v2277_v24 = vmax.f32 %v2186_v21, 0.0 }
 0x6d6   : > { %v2280_v29 = vmax.f32 %v6820_v25, 0.0  ;;  %v2189_v30 = vpop.f32.mrb[95].mxu1 }
 0x6d7   : > { %v2278_v31 = vmax.f32 %v2189_v30, 0.0 }
 0x6d8   : > { %v2304_v9 = vpack.c.bf16 %v2280_v29, %v2279_v26 }
 0x6d9   : > { %v2303_v36 = vpack.c.bf16 %v2278_v31, %v2277_v24 }
 0x6db   : > { %6865 = vmatprep.mubr.bf16.mxu1 %v2303_v36 }
 0x6dc   : > { %6866 = vmatmul.mubr.bf16.gmra.mrb[124].mxu1 %v2304_v9 }
 0x6e3   : > { %v6823_v37 = vpop.f32.mrb[96].mxu1 }
 0x6e4   : > { %v2202_v38 = vpop.f32.mrb[97].mxu1  ;;  %v2283_v40 = vmax.f32 %v6823_v37, 0.0 }
 0x6e5   : > { %v6824_v39 = vpop.f32.mrb[98].mxu1  ;;  %v2281_v52 = vmax.f32 %v2202_v38, 0.0 }
 0x6e6   : > { %v2284_v46 = vmax.f32 %v6824_v39, 0.0  ;;  %v2205_v51 = vpop.f32.mrb[99].mxu1 }
 0x6e7   : > { %v2282_v55 = vmax.f32 %v2205_v51, 0.0 }
 0x6e8   : > { %v2306_v56 = vpack.c.bf16 %v2284_v46, %v2283_v40 }
 0x6e9   : > { %v2305_v57 = vpack.c.bf16 %v2282_v55, %v2281_v52 }
 0x6eb   : > { %6869 = vmatprep.mubr.bf16.mxu1 %v2305_v57  ;;  %v7382_v57 = vld [vmem:[#allocation5 + $0x2c8] sm:$0xff]  }
 0x6ec   : > { %6870 = vmatmul.mubr.bf16.gmra.mrb[128].mxu1 %v2306_v56  ;;  %v7381_v56 = vld [vmem:[#allocation5 + $0x2c0] sm:$0xff]  }
 0x6ed   : > { %6933 = vmatprep.subr.bf16.mxu1 %v7381_v56 }
 0x6ee   : > { %6934 = vmatpush3.bf16.msra.mxu1 %v7381_v56 }
 0x6ef   : > { %6935 = vmatprep.subr.bf16.mxu1 %v7382_v57 }
 0x6f2   : > { %6936 = vmatpush3.bf16.msra.mxu1 %v7382_v57 }
 0x6f3   : > { %v6827_v58 = vpop.f32.mrb[100].mxu1 }
 0x6f4   : > { %v2218_v3 = vpop.f32.mrb[101].mxu1  ;;  %v2287_v7 = vmax.f32 %v6827_v58, 0.0  ;;  %v7383_v58 = vld [vmem:[#allocation5 + $0x2d0] sm:$0xff]  }
 0x6f5   : > { %v6828_v4 = vpop.f32.mrb[102].mxu1  ;;  %v2285_v10 = vmax.f32 %v2218_v3, 0.0  ;;  %6937 = vmatprep.subr.bf16.mxu1 %v7383_v58 }
 0x6f6   : > { %v2288_v45 = vmax.f32 %v6828_v4, 0.0  ;;  %v2221_v8 = vpop.f32.mrb[103].mxu1  ;;  %6938 = vmatpush3.bf16.msra.mxu1 %v7383_v58 }
 0x6f7   : > { %v2286_v11 = vmax.f32 %v2221_v8, 0.0 }
 0x6f8   : > { %v2308_v12 = vpack.c.bf16 %v2288_v45, %v2287_v7  ;;  %v7384_v7 = vld [vmem:[#allocation5 + $0x2d8] sm:$0xff]  }
 0x6f9   : > { %v2307_v15 = vpack.c.bf16 %v2286_v11, %v2285_v10  ;;  %6939 = vmatprep.subr.bf16.mxu1 %v7384_v7 }
 0x6fa   : > { %6940 = vmatpush3.bf16.msra.mxu1 %v7384_v7 }
 0x6fb   : > { %6873 = vmatprep.mubr.bf16.mxu1 %v2307_v15 }
 0x6fc   : > { %6874 = vmatmul.mubr.bf16.gmra.mrb[132].mxu1 %v2308_v12 }
 0x703   : > { %v6831_v16 = vpop.f32.mrb[104].mxu1 }
 0x704   : > { %v2234_v17 = vpop.f32.mrb[105].mxu1  ;;  %v2291_v21 = vmax.f32 %v6831_v16, 0.0 }
 0x705   : > { %v6832_v20 = vpop.f32.mrb[106].mxu1  ;;  %v2289_v29 = vmax.f32 %v2234_v17, 0.0  ;;  %v7385_v17 = vld [vmem:[#allocation5 + $0x2e0] sm:$0xff]  }
 0x706   : > { %v2292_v25 = vmax.f32 %v6832_v20, 0.0  ;;  %v2237_v26 = vpop.f32.mrb[107].mxu1  ;;  %6941 = vmatprep.subr.bf16.mxu1 %v7385_v17 }
 0x707   : > { %v2290_v30 = vmax.f32 %v2237_v26, 0.0  ;;  %6942 = vmatpush3.bf16.msra.mxu1 %v7385_v17 }
 0x708   : > { %v2310_v24 = vpack.c.bf16 %v2292_v25, %v2291_v21  ;;  %v7386_v21 = vld [vmem:[#allocation5 + $0x2e8] sm:$0xff]   ;;  %v7387_v25 = vld [vmem:[#allocation5 + $0x2f0] sm:$0xff]  }
 0x709   : > { %v2309_v31 = vpack.c.bf16 %v2290_v30, %v2289_v29  ;;  %6943 = vmatprep.subr.bf16.mxu1 %v7386_v21 }
 0x70b   : > { %6877 = vmatprep.mubr.bf16.mxu1 %v2309_v31  ;;  %6944 = vmatpush3.bf16.msra.mxu1 %v7386_v21 }
 0x70c   : > { %6878 = vmatmul.mubr.bf16.gmra.mrb[136].mxu1 %v2310_v24  ;;  %6945 = vmatprep.subr.bf16.mxu1 %v7387_v25 }
 0x70f   : > { %6946 = vmatpush3.bf16.msra.mxu1 %v7387_v25 }
 0x713   : > { %v6835_v9 = vpop.f32.mrb[108].mxu1 }
 0x714   : > { %v2250_v36 = vpop.f32.mrb[109].mxu1  ;;  %v2295_v38 = vmax.f32 %v6835_v9, 0.0 }
 0x715   : > { %v6836_v37 = vpop.f32.mrb[110].mxu1  ;;  %v2293_v46 = vmax.f32 %v2250_v36, 0.0 }
 0x716   : > { %v2296_v39 = vmax.f32 %v6836_v37, 0.0  ;;  %v2253_v40 = vpop.f32.mrb[111].mxu1 }
 0x717   : > { %v2294_v51 = vmax.f32 %v2253_v40, 0.0 }
 0x718   : > { %v2312_v52 = vpack.c.bf16 %v2296_v39, %v2295_v38 }
 0x719   : > { %v2311_v55 = vpack.c.bf16 %v2294_v51, %v2293_v46 }
 0x71b   : > { %6881 = vmatprep.mubr.bf16.mxu1 %v2311_v55 }
 0x71c   : > { %6882 = vmatmul.mubr.bf16.gmra.mrb[140].mxu1 %v2312_v52 }
 0x77f   : > { %v6855_v3 = vpop.f32.mrb[112].mxu1 }
 0x780   : > { %v2411_v4 = vpop.f32.mrb[113].mxu1  ;;  %v2540_v8 = vmax.f32 %v6855_v3, 0.0 }
 0x781   : > { %v6856_v45 = vpop.f32.mrb[114].mxu1  ;;  %v2538_v12 = vmax.f32 %v2411_v4, 0.0 }
 0x782   : > { %v2541_v10 = vmax.f32 %v6856_v45, 0.0  ;;  %v2414_v11 = vpop.f32.mrb[115].mxu1 }
 0x783   : > { %v2539_v15 = vmax.f32 %v2414_v11, 0.0 }
 0x784   : > { %v2571_v16 = vpack.c.bf16 %v2541_v10, %v2540_v8 }
 0x785   : > { %v2570_v20 = vpack.c.bf16 %v2539_v15, %v2538_v12 }
 0x787   : > { %6901 = vmatprep.mubr.bf16.mxu0 %v2570_v20 }
 0x788   : > { %6902 = vmatmul.mubr.bf16.vlgmr.msra.gmra.mrb[176].mxu0 %v2571_v16 }
 0x78f   : > { %v6859_v26 = vpop.f32.mrb[116].mxu1 }
 0x790   : > { %v2427_v29 = vpop.f32.mrb[117].mxu1  ;;  %v2544_v24 = vmax.f32 %v6859_v26, 0.0 }
 0x791   : > { %v6860_v30 = vpop.f32.mrb[118].mxu1  ;;  %v2542_v36 = vmax.f32 %v2427_v29, 0.0 }
 0x792   : > { %v2545_v31 = vmax.f32 %v6860_v30, 0.0  ;;  %v2430_v9 = vpop.f32.mrb[119].mxu1 }
 0x793   : > { %v2543_v37 = vmax.f32 %v2430_v9, 0.0 }
 0x794   : > { %v2573_v38 = vpack.c.bf16 %v2545_v31, %v2544_v24 }
 0x795   : > { %v2572_v39 = vpack.c.bf16 %v2543_v37, %v2542_v36 }
 0x797   : > { %6905 = vmatprep.mubr.bf16.mxu0 %v2572_v39 }
 0x798   : > { %6906 = vmatmul.mubr.bf16.gmra.mrb[180].mxu0 %v2573_v38 }
 0x79f   : > { %v6863_v40 = vpop.f32.mrb[120].mxu1 }
 0x7a0   : > { %v2443_v46 = vpop.f32.mrb[121].mxu1  ;;  %v2548_v52 = vmax.f32 %v6863_v40, 0.0 }
 0x7a1   : > { %v6864_v51 = vpop.f32.mrb[122].mxu1  ;;  %v2546_v57 = vmax.f32 %v2443_v46, 0.0 }
 0x7a2   : > { %v2549_v55 = vmax.f32 %v6864_v51, 0.0  ;;  %v2446_v56 = vpop.f32.mrb[123].mxu1 }
 0x7a3   : > { %v2547_v58 = vmax.f32 %v2446_v56, 0.0 }
 0x7a4   : > { %v2575_v3 = vpack.c.bf16 %v2549_v55, %v2548_v52 }
 0x7a5   : > { %v2574_v4 = vpack.c.bf16 %v2547_v58, %v2546_v57 }
 0x7a7   : > { %6909 = vmatprep.mubr.bf16.mxu0 %v2574_v4 }
 0x7a8   : > { %6910 = vmatmul.mubr.bf16.gmra.mrb[184].mxu0 %v2575_v3  ;;  %v7388_v3 = vld [vmem:[#allocation5 + $0x2f8] sm:$0xff]  }
 0x7a9   : > { %6947 = vmatprep.subr.bf16.mxu1 %v7388_v3 }
 0x7aa   : > { %6948 = vmatpush3.bf16.msra.mxu1 %v7388_v3 }
 0x7af   : > { %v6867_v7 = vpop.f32.mrb[124].mxu1 }
 0x7b0   : > { %v2459_v45 = vpop.f32.mrb[125].mxu1  ;;  %v2552_v10 = vmax.f32 %v6867_v7, 0.0 }
 0x7b1   : > { %v6868_v8 = vpop.f32.mrb[126].mxu1  ;;  %v2550_v15 = vmax.f32 %v2459_v45, 0.0 }
 0x7b2   : > { %v2553_v11 = vmax.f32 %v6868_v8, 0.0  ;;  %v2462_v12 = vpop.f32.mrb[127].mxu1 }
 0x7b3   : > { %v2551_v16 = vmax.f32 %v2462_v12, 0.0 }
 0x7b4   : > { %v2577_v17 = vpack.c.bf16 %v2553_v11, %v2552_v10 }
 0x7b5   : > { %v2576_v20 = vpack.c.bf16 %v2551_v16, %v2550_v15 }
 0x7b7   : > { %6913 = vmatprep.mubr.bf16.mxu0 %v2576_v20 }
 0x7b8   : > { %6914 = vmatmul.mubr.bf16.gmra.mrb[188].mxu0 %v2577_v17 }
 0x7bf   : > { %v6871_v21 = vpop.f32.mrb[128].mxu1 }
 0x7c0   : > { %v2475_v25 = vpop.f32.mrb[129].mxu1  ;;  %v2556_v29 = vmax.f32 %v6871_v21, 0.0 }
 0x7c1   : > { %v6872_v26 = vpop.f32.mrb[130].mxu1  ;;  %v2554_v31 = vmax.f32 %v2475_v25, 0.0 }
 0x7c2   : > { %v2557_v30 = vmax.f32 %v6872_v26, 0.0  ;;  %v2478_v24 = vpop.f32.mrb[131].mxu1 }
 0x7c3   : > { %v2555_v9 = vmax.f32 %v2478_v24, 0.0 }
 0x7c4   : > { %v2579_v36 = vpack.c.bf16 %v2557_v30, %v2556_v29 }
 0x7c5   : > { %v2578_v37 = vpack.c.bf16 %v2555_v9, %v2554_v31 }
 0x7c7   : > { %6917 = vmatprep.mubr.bf16.mxu0 %v2578_v37  ;;  %v7389_v37 = vld [vmem:[#allocation5 + $0x300] sm:$0xff]  }
 0x7c8   : > { %6918 = vmatmul.mubr.bf16.gmra.mrb[192].mxu0 %v2579_v36  ;;  %6981 = vmatprep.subr.bf16.mxu0 %v7389_v37 }
 0x7c9   : > { %6982 = vmatpush3.bf16.msra.mxu0 %v7389_v37 }
 0x7cf   : > { %v6875_v38 = vpop.f32.mrb[132].mxu1 }
 0x7d0   : > { %v2491_v39 = vpop.f32.mrb[133].mxu1  ;;  %v2560_v46 = vmax.f32 %v6875_v38, 0.0  ;;  %v7390_v38 = vld [vmem:[#allocation5 + $0x308] sm:$0xff]  }
 0x7d1   : > { %v6876_v40 = vpop.f32.mrb[134].mxu1  ;;  %v2558_v55 = vmax.f32 %v2491_v39, 0.0  ;;  %6983 = vmatprep.subr.bf16.mxu0 %v7390_v38  ;;  %v7391_v39 = vld [vmem:[#allocation5 + $0x310] sm:$0xff]  }
 0x7d2   : > { %v2561_v51 = vmax.f32 %v6876_v40, 0.0  ;;  %v2494_v52 = vpop.f32.mrb[135].mxu1  ;;  %6984 = vmatpush3.bf16.msra.mxu0 %v7390_v38 }
 0x7d3   : > { %v2559_v56 = vmax.f32 %v2494_v52, 0.0  ;;  %6985 = vmatprep.subr.bf16.mxu0 %v7391_v39 }
 0x7d4   : > { %v2581_v57 = vpack.c.bf16 %v2561_v51, %v2560_v46  ;;  %v7392_v51 = vld [vmem:[#allocation5 + $0x318] sm:$0xff]  }
 0x7d5   : > { %v2580_v58 = vpack.c.bf16 %v2559_v56, %v2558_v55 }
 0x7d6   : > { %6986 = vmatpush3.bf16.msra.mxu0 %v7391_v39 }
 0x7d7   : > { %6921 = vmatprep.mubr.bf16.mxu0 %v2580_v58  ;;  %6987 = vmatprep.subr.bf16.mxu0 %v7392_v51 }
 0x7d8   : > { %6922 = vmatmul.mubr.bf16.gmra.mrb[196].mxu0 %v2581_v57 }
 0x7da   : > { %6988 = vmatpush3.bf16.msra.mxu0 %v7392_v51 }
 0x7df   : > { %v6879_v4 = vpop.f32.mrb[136].mxu1 }
 0x7e0   : > { %v2507_v7 = vpop.f32.mrb[137].mxu1  ;;  %v2564_v8 = vmax.f32 %v6879_v4, 0.0 }
 0x7e1   : > { %v6880_v45 = vpop.f32.mrb[138].mxu1  ;;  %v2562_v12 = vmax.f32 %v2507_v7, 0.0  ;;  %v7393_v7 = vld [vmem:[#allocation5 + $0x320] sm:$0xff]  }
 0x7e2   : > { %v2565_v10 = vmax.f32 %v6880_v45, 0.0  ;;  %v2510_v11 = vpop.f32.mrb[139].mxu1  ;;  %6989 = vmatprep.subr.bf16.mxu0 %v7393_v7 }
 0x7e3   : > { %v2563_v15 = vmax.f32 %v2510_v11, 0.0  ;;  %6990 = vmatpush3.bf16.msra.mxu0 %v7393_v7 }
 0x7e4   : > { %v2583_v16 = vpack.c.bf16 %v2565_v10, %v2564_v8  ;;  %v7394_v8 = vld [vmem:[#allocation5 + $0x328] sm:$0xff]   ;;  %v7395_v10 = vld [vmem:[#allocation5 + $0x330] sm:$0xff]  }
 0x7e5   : > { %v2582_v17 = vpack.c.bf16 %v2563_v15, %v2562_v12  ;;  %6991 = vmatprep.subr.bf16.mxu0 %v7394_v8 }
 0x7e7   : > { %6925 = vmatprep.mubr.bf16.mxu0 %v2582_v17  ;;  %6992 = vmatpush3.bf16.msra.mxu0 %v7394_v8 }
 0x7e8   : > { %6926 = vmatmul.mubr.bf16.gmra.mrb[200].mxu0 %v2583_v16  ;;  %6993 = vmatprep.subr.bf16.mxu0 %v7395_v10 }
 0x7eb   : > { %6994 = vmatpush3.bf16.msra.mxu0 %v7395_v10 }
 0x7ef   : > { %v6883_v20 = vpop.f32.mrb[140].mxu1 }
 0x7f0   : > { %v2523_v21 = vpop.f32.mrb[141].mxu1  ;;  %v2568_v26 = vmax.f32 %v6883_v20, 0.0 }
 0x7f1   : > { %v6884_v25 = vpop.f32.mrb[142].mxu1  ;;  %v2566_v24 = vmax.f32 %v2523_v21, 0.0 }
 0x7f2   : > { %v2569_v29 = vmax.f32 %v6884_v25, 0.0  ;;  %v2526_v30 = vpop.f32.mrb[143].mxu1 }
 0x7f3   : > { %v2567_v31 = vmax.f32 %v2526_v30, 0.0 }
 0x7f4   : > { %v2585_v9 = vpack.c.bf16 %v2569_v29, %v2568_v26 }
 0x7f5   : > { %v2584_v36 = vpack.c.bf16 %v2567_v31, %v2566_v24 }
 0x7f7   : > { %6929 = vmatprep.mubr.bf16.mxu0 %v2584_v36 }
 0x7f8   : > { %6930 = vmatmul.mubr.bf16.gmra.mrb[204].mxu0 %v2585_v9 }
 0x85b   : > { %v6903_v40 = vpop.f32.mrb[176].mxu0 }
 0x85c   : > { %v2684_v46 = vpop.f32.mrb[177].mxu0  ;;  %v2813_v55 = vmax.f32 %v6903_v40, 0.0 }
 0x85d   : > { %v6904_v52 = vpop.f32.mrb[178].mxu0  ;;  %v2811_v58 = vmax.f32 %v2684_v46, 0.0 }
 0x85e   : > { %v2814_v56 = vmax.f32 %v6904_v52, 0.0  ;;  %v2687_v57 = vpop.f32.mrb[179].mxu0 }
 0x85f   : > { %v2812_v3 = vmax.f32 %v2687_v57, 0.0 }
 0x860   : > { %v2844_v4 = vpack.c.bf16 %v2814_v56, %v2813_v55 }
 0x861   : > { %v2843_v45 = vpack.c.bf16 %v2812_v3, %v2811_v58 }
 0x863   : > { %6949 = vmatprep.mubr.bf16.mxu1 %v2843_v45 }
 0x864   : > { %6950 = vmatmul.mubr.bf16.vlgmr.msra.gmra.mrb[144].mxu1 %v2844_v4 }
 0x86b   : > { %v6907_v11 = vpop.f32.mrb[180].mxu0 }
 0x86c   : > { %v2700_v12 = vpop.f32.mrb[181].mxu0  ;;  %v2817_v16 = vmax.f32 %v6907_v11, 0.0 }
 0x86d   : > { %v6908_v15 = vpop.f32.mrb[182].mxu0  ;;  %v2815_v21 = vmax.f32 %v2700_v12, 0.0 }
 0x86e   : > { %v2818_v17 = vmax.f32 %v6908_v15, 0.0  ;;  %v2703_v20 = vpop.f32.mrb[183].mxu0 }
 0x86f   : > { %v2816_v25 = vmax.f32 %v2703_v20, 0.0 }
 0x870   : > { %v2846_v26 = vpack.c.bf16 %v2818_v17, %v2817_v16 }
 0x871   : > { %v2845_v29 = vpack.c.bf16 %v2816_v25, %v2815_v21 }
 0x873   : > { %6953 = vmatprep.mubr.bf16.mxu1 %v2845_v29 }
 0x874   : > { %6954 = vmatmul.mubr.bf16.gmra.mrb[148].mxu1 %v2846_v26 }
 0x87b   : > { %v6911_v30 = vpop.f32.mrb[184].mxu0 }
 0x87c   : > { %v2716_v24 = vpop.f32.mrb[185].mxu0  ;;  %v2821_v9 = vmax.f32 %v6911_v30, 0.0 }
 0x87d   : > { %v6912_v31 = vpop.f32.mrb[186].mxu0  ;;  %v2819_v38 = vmax.f32 %v2716_v24, 0.0 }
 0x87e   : > { %v2822_v36 = vmax.f32 %v6912_v31, 0.0  ;;  %v2719_v37 = vpop.f32.mrb[187].mxu0 }
 0x87f   : > { %v2820_v39 = vmax.f32 %v2719_v37, 0.0 }
 0x880   : > { %v2848_v40 = vpack.c.bf16 %v2822_v36, %v2821_v9 }
 0x881   : > { %v2847_v46 = vpack.c.bf16 %v2820_v39, %v2819_v38 }
 0x883   : > { %6957 = vmatprep.mubr.bf16.mxu1 %v2847_v46 }
 0x884   : > { %6958 = vmatmul.mubr.bf16.gmra.mrb[152].mxu1 %v2848_v40  ;;  %v7396_v40 = vld [vmem:[#allocation5 + $0x338] sm:$0xff]  }
 0x885   : > { %6995 = vmatprep.subr.bf16.mxu0 %v7396_v40 }
 0x886   : > { %6996 = vmatpush3.bf16.msra.mxu0 %v7396_v40 }
 0x88b   : > { %v6915_v51 = vpop.f32.mrb[188].mxu0 }
 0x88c   : > { %v2732_v52 = vpop.f32.mrb[189].mxu0  ;;  %v2825_v56 = vmax.f32 %v6915_v51, 0.0 }
 0x88d   : > { %v6916_v55 = vpop.f32.mrb[190].mxu0  ;;  %v2823_v3 = vmax.f32 %v2732_v52, 0.0 }
 0x88e   : > { %v2826_v57 = vmax.f32 %v6916_v55, 0.0  ;;  %v2735_v58 = vpop.f32.mrb[191].mxu0 }
 0x88f   : > { %v2824_v4 = vmax.f32 %v2735_v58, 0.0 }
 0x890   : > { %v2850_v7 = vpack.c.bf16 %v2826_v57, %v2825_v56 }
 0x891   : > { %v2849_v45 = vpack.c.bf16 %v2824_v4, %v2823_v3 }
 0x893   : > { %6961 = vmatprep.mubr.bf16.mxu1 %v2849_v45 }
 0x894   : > { %6962 = vmatmul.mubr.bf16.gmra.mrb[156].mxu1 %v2850_v7 }
 0x89b   : > { %v6919_v8 = vpop.f32.mrb[192].mxu0 }
 0x89c   : > { %v2748_v10 = vpop.f32.mrb[193].mxu0  ;;  %v2829_v12 = vmax.f32 %v6919_v8, 0.0 }
 0x89d   : > { %v6920_v11 = vpop.f32.mrb[194].mxu0  ;;  %v2827_v17 = vmax.f32 %v2748_v10, 0.0 }
 0x89e   : > { %v2830_v15 = vmax.f32 %v6920_v11, 0.0  ;;  %v2751_v16 = vpop.f32.mrb[195].mxu0 }
 0x89f   : > { %v2828_v20 = vmax.f32 %v2751_v16, 0.0 }
 0x8a0   : > { %v2852_v21 = vpack.c.bf16 %v2830_v15, %v2829_v12 }
 0x8a1   : > { %v2851_v25 = vpack.c.bf16 %v2828_v20, %v2827_v17 }
 0x8a3   : > { %6965 = vmatprep.mubr.bf16.mxu1 %v2851_v25  ;;  %v7397_v25 = vld [vmem:[#allocation5 + $0x380] sm:$0xff]  }
 0x8a4   : > { %6966 = vmatmul.mubr.bf16.gmra.mrb[160].mxu1 %v2852_v21  ;;  %6165 = vmatprep.subr.bf16.mxu1 %v7397_v25 }
 0x8ab   : > { %v6923_v26 = vpop.f32.mrb[196].mxu0 }
 0x8ac   : > { %v2764_v29 = vpop.f32.mrb[197].mxu0  ;;  %v2833_v24 = vmax.f32 %v6923_v26, 0.0  ;;  %v7398_v26 = vld [vmem:[#allocation5 + $0x340] sm:$0xff]  }
 0x8ad   : > { %v6924_v30 = vpop.f32.mrb[198].mxu0  ;;  %v2831_v36 = vmax.f32 %v2764_v29, 0.0  ;;  %v7399_v29 = vld [vmem:[#allocation5 + $0x388] sm:$0xff]   ;;  %6166 = vmatpush3.bf16.msra.mxu1 %v7398_v26 }
 0x8ae   : > { %v2834_v31 = vmax.f32 %v6924_v30, 0.0  ;;  %v2767_v9 = vpop.f32.mrb[199].mxu0  ;;  %v7400_v30 = vld [vmem:[#allocation5 + $0x348] sm:$0xff]   ;;  %6167 = vmatprep.subr.bf16.mxu1 %v7399_v29 }
 0x8af   : > { %v2832_v37 = vmax.f32 %v2767_v9, 0.0  ;;  %v7402_v9 = vld [vmem:[#allocation5 + $0x350] sm:$0xff]  }
 0x8b0   : > { %v2854_v38 = vpack.c.bf16 %v2834_v31, %v2833_v24  ;;  %v7401_v24 = vld [vmem:[#allocation5 + $0x390] sm:$0xff]  }
 0x8b1   : > { %v2853_v39 = vpack.c.bf16 %v2832_v37, %v2831_v36  ;;  %6168 = vmatpush3.bf16.msra.mxu1 %v7400_v30  ;;  %v7403_v37 = vld [vmem:[#allocation5 + $0x398] sm:$0xff]  }
 0x8b2   : > { %6169 = vmatprep.subr.bf16.mxu1 %v7401_v24 }
 0x8b3   : > { %6969 = vmatprep.mubr.bf16.mxu1 %v2853_v39 }
 0x8b4   : > { %6970 = vmatmul.mubr.bf16.gmra.mrb[164].mxu1 %v2854_v38 }
 0x8b5   : > { %6170 = vmatpush3.bf16.msra.mxu1 %v7402_v9 }
 0x8b6   : > { %6171 = vmatprep.subr.bf16.mxu1 %v7403_v37 }
 0x8bb   : > { %v6927_v46 = vpop.f32.mrb[200].mxu0 }
 0x8bc   : > { %v2780_v51 = vpop.f32.mrb[201].mxu0  ;;  %v2837_v55 = vmax.f32 %v6927_v46, 0.0 }
 0x8bd   : > { %v6928_v52 = vpop.f32.mrb[202].mxu0  ;;  %v2835_v58 = vmax.f32 %v2780_v51, 0.0 }
 0x8be   : > { %v2838_v56 = vmax.f32 %v6928_v52, 0.0  ;;  %v2783_v57 = vpop.f32.mrb[203].mxu0 }
 0x8bf   : > { %v2836_v3 = vmax.f32 %v2783_v57, 0.0  ;;  %v7405_v57 = vld [vmem:[#allocation5 + $0x3a0] sm:$0xff]  }
 0x8c0   : > { %v2856_v4 = vpack.c.bf16 %v2838_v56, %v2837_v55  ;;  %v7404_v55 = vld [vmem:[#allocation5 + $0x358] sm:$0xff]  }
 0x8c1   : > { %v2855_v7 = vpack.c.bf16 %v2836_v3, %v2835_v58  ;;  %6172 = vmatpush3.bf16.msra.mxu1 %v7404_v55  ;;  %v7406_v3 = vld [vmem:[#allocation5 + $0x360] sm:$0xff]  }
 0x8c2   : > { %6173 = vmatprep.subr.bf16.mxu1 %v7405_v57 }
 0x8c3   : > { %6973 = vmatprep.mubr.bf16.mxu1 %v2855_v7  ;;  %v7408_v7 = vld [vmem:[#allocation5 + $0x368] sm:$0xff]  }
 0x8c4   : > { %6974 = vmatmul.mubr.bf16.gmra.mrb[168].mxu1 %v2856_v4  ;;  %v7407_v4 = vld [vmem:[#allocation5 + $0x3a8] sm:$0xff]  }
 0x8c5   : > { %6174 = vmatpush3.bf16.msra.mxu1 %v7406_v3 }
 0x8c6   : > { %6175 = vmatprep.subr.bf16.mxu1 %v7407_v4 }
 0x8c9   : > { %6176 = vmatpush3.bf16.msra.mxu1 %v7408_v7 }
 0x8cb   : > { %v6931_v45 = vpop.f32.mrb[204].mxu0 }
 0x8cc   : > { %v2796_v8 = vpop.f32.mrb[205].mxu0  ;;  %v2841_v11 = vmax.f32 %v6931_v45, 0.0  ;;  %v7409_v45 = vld [vmem:[#allocation5 + $0x3b0] sm:$0xff]  }
 0x8cd   : > { %v6932_v10 = vpop.f32.mrb[206].mxu0  ;;  %v2839_v16 = vmax.f32 %v2796_v8, 0.0  ;;  %6177 = vmatprep.subr.bf16.mxu1 %v7409_v45 }
 0x8ce   : > { %v2842_v12 = vmax.f32 %v6932_v10, 0.0  ;;  %v2799_v15 = vpop.f32.mrb[207].mxu0  ;;  %v7410_v10 = vld [vmem:[#allocation5 + $0x370] sm:$0xff]  }
 0x8cf   : > { %v2840_v17 = vmax.f32 %v2799_v15, 0.0  ;;  %6178 = vmatpush3.bf16.msra.mxu1 %v7410_v10 }
 0x8d0   : > { %v2858_v20 = vpack.c.bf16 %v2842_v12, %v2841_v11 }
 0x8d1   : > { %v2857_v21 = vpack.c.bf16 %v2840_v17, %v2839_v16 }
 0x8d3   : > { %6977 = vmatprep.mubr.bf16.mxu1 %v2857_v21 }
 0x8d4   : > { %6978 = vmatmul.mubr.bf16.gmra.mrb[172].mxu1 %v2858_v20 }
 0x937   : > { %v6951_v31 = vpop.f32.mrb[144].mxu1 }
 0x938   : > { %v2957_v36 = vpop.f32.mrb[145].mxu1  ;;  %v3086_v39 = vmax.f32 %v6951_v31, 0.0 }
 0x939   : > { %v6952_v38 = vpop.f32.mrb[146].mxu1  ;;  %v3084_v51 = vmax.f32 %v2957_v36, 0.0 }
 0x93a   : > { %v3087_v40 = vmax.f32 %v6952_v38, 0.0  ;;  %v2960_v46 = vpop.f32.mrb[147].mxu1 }
 0x93b   : > { %v3085_v52 = vmax.f32 %v2960_v46, 0.0 }
 0x93c   : > { %v3117_v56 = vpack.c.bf16 %v3087_v40, %v3086_v39 }
 0x93d   : > { %v3116_v58 = vpack.c.bf16 %v3085_v52, %v3084_v51 }
 0x93f   : > { %6997 = vmatprep.mubr.bf16.mxu0 %v3116_v58 }
 0x940   : > { %6998 = vmatmul.mubr.bf16.vlgmr.msra.gmra.mrb[208].mxu0 %v3117_v56 }
 0x947   : > { %v6955_v8 = vpop.f32.mrb[148].mxu1 }
 0x948   : > { %v2973_v11 = vpop.f32.mrb[149].mxu1  ;;  %v3090_v15 = vmax.f32 %v6955_v8, 0.0 }
 0x949   : > { %v6956_v12 = vpop.f32.mrb[150].mxu1  ;;  %v3088_v20 = vmax.f32 %v2973_v11, 0.0 }
 0x94a   : > { %v3091_v16 = vmax.f32 %v6956_v12, 0.0  ;;  %v2976_v17 = vpop.f32.mrb[151].mxu1 }
 0x94b   : > { %v3089_v21 = vmax.f32 %v2976_v17, 0.0 }
 0x94c   : > { %v3119_v25 = vpack.c.bf16 %v3091_v16, %v3090_v15 }
 0x94d   : > { %v3118_v26 = vpack.c.bf16 %v3089_v21, %v3088_v20 }
 0x94f   : > { %7001 = vmatprep.mubr.bf16.mxu0 %v3118_v26 }
 0x950   : > { %7002 = vmatmul.mubr.bf16.gmra.mrb[212].mxu0 %v3119_v25 }
 0x957   : > { %v6959_v29 = vpop.f32.mrb[152].mxu1 }
 0x958   : > { %v2989_v30 = vpop.f32.mrb[153].mxu1  ;;  %v3094_v31 = vmax.f32 %v6959_v29, 0.0 }
 0x959   : > { %v6960_v24 = vpop.f32.mrb[154].mxu1  ;;  %v3092_v37 = vmax.f32 %v2989_v30, 0.0 }
 0x95a   : > { %v3095_v9 = vmax.f32 %v6960_v24, 0.0  ;;  %v2992_v36 = vpop.f32.mrb[155].mxu1 }
 0x95b   : > { %v3093_v38 = vmax.f32 %v2992_v36, 0.0 }
 0x95c   : > { %v3121_v39 = vpack.c.bf16 %v3095_v9, %v3094_v31 }
 0x95d   : > { %v3120_v40 = vpack.c.bf16 %v3093_v38, %v3092_v37 }
 0x95f   : > { %7005 = vmatprep.mubr.bf16.mxu0 %v3120_v40  ;;  %v7412_v40 = vld [vmem:[#allocation5 + $0x378] sm:$0xff]  }
 0x960   : > { %7006 = vmatmul.mubr.bf16.gmra.mrb[216].mxu0 %v3121_v39  ;;  %v7411_v39 = vld [vmem:[#allocation5 + $0x3b8] sm:$0xff]  }
 0x961   : > { %6179 = vmatprep.subr.bf16.mxu1 %v7411_v39 }
 0x962   : > { %6180 = vmatpush3.bf16.msra.mxu1 %v7412_v40  ;;  %v7415_v40 = vld [vmem:[#allocation5 + $0x3d0] sm:$0xff]  }
 0x967   : > { %v6963_v46 = vpop.f32.mrb[156].mxu1 }
 0x968   : > { %v3005_v51 = vpop.f32.mrb[157].mxu1  ;;  %v3098_v55 = vmax.f32 %v6963_v46, 0.0 }
 0x969   : > { %v6964_v52 = vpop.f32.mrb[158].mxu1  ;;  %v3096_v58 = vmax.f32 %v3005_v51, 0.0 }
 0x96a   : > { %v3099_v56 = vmax.f32 %v6964_v52, 0.0  ;;  %v3008_v57 = vpop.f32.mrb[159].mxu1 }
 0x96b   : > { %v3097_v3 = vmax.f32 %v3008_v57, 0.0 }
 0x96c   : > { %v3123_v4 = vpack.c.bf16 %v3099_v56, %v3098_v55 }
 0x96d   : > { %v3122_v7 = vpack.c.bf16 %v3097_v3, %v3096_v58 }
 0x96f   : > { %7009 = vmatprep.mubr.bf16.mxu0 %v3122_v7 }
 0x970   : > { %7010 = vmatmul.mubr.bf16.gmra.mrb[220].mxu0 %v3123_v4 }
 0x977   : > { %v6967_v45 = vpop.f32.mrb[160].mxu1 }
 0x978   : > { %v3021_v8 = vpop.f32.mrb[161].mxu1  ;;  %v3102_v11 = vmax.f32 %v6967_v45, 0.0 }
 0x979   : > { %v6968_v10 = vpop.f32.mrb[162].mxu1  ;;  %v3100_v16 = vmax.f32 %v3021_v8, 0.0 }
 0x97a   : > { %v3103_v12 = vmax.f32 %v6968_v10, 0.0  ;;  %v3024_v15 = vpop.f32.mrb[163].mxu1 }
 0x97b   : > { %v3101_v17 = vmax.f32 %v3024_v15, 0.0 }
 0x97c   : > { %v3125_v20 = vpack.c.bf16 %v3103_v12, %v3102_v11 }
 0x97d   : > { %v3124_v21 = vpack.c.bf16 %v3101_v17, %v3100_v16 }
 0x97f   : > { %7013 = vmatprep.mubr.bf16.mxu0 %v3124_v21 }
 0x980   : > { %7014 = vmatmul.mubr.bf16.gmra.mrb[224].mxu0 %v3125_v20 }
 0x987   : > { %v6971_v25 = vpop.f32.mrb[164].mxu1 }
 0x988   : > { %v3037_v26 = vpop.f32.mrb[165].mxu1  ;;  %v3106_v30 = vmax.f32 %v6971_v25, 0.0 }
 0x989   : > { %v6972_v29 = vpop.f32.mrb[166].mxu1  ;;  %v3104_v9 = vmax.f32 %v3037_v26, 0.0 }
 0x98a   : > { %v3107_v24 = vmax.f32 %v6972_v29, 0.0  ;;  %v3040_v31 = vpop.f32.mrb[167].mxu1  ;;  %v7413_v29 = vld [vmem:[#allocation5 + $0x3c0] sm:$0xff]  }
 0x98b   : > { %v3105_v36 = vmax.f32 %v3040_v31, 0.0  ;;  %7029 = vmatprep.subr.bf16.mxu0 %v7413_v29 }
 0x98c   : > { %v3127_v37 = vpack.c.bf16 %v3107_v24, %v3106_v30  ;;  %v7414_v30 = vld [vmem:[#allocation5 + $0x3c8] sm:$0xff]   ;;  %7030 = vmatpush3.bf16.msra.mxu0 %v7413_v29 }
 0x98d   : > { %v3126_v38 = vpack.c.bf16 %v3105_v36, %v3104_v9  ;;  %7031 = vmatprep.subr.bf16.mxu0 %v7414_v30 }
 0x98f   : > { %7017 = vmatprep.mubr.bf16.mxu0 %v3126_v38 }
 0x990   : > { %7018 = vmatmul.mubr.bf16.gmra.mrb[228].mxu0 %v3127_v37 }
 0x991   : > { %7032 = vmatpush3.bf16.msra.mxu0 %v7414_v30 }
 0x992   : > { %7033 = vmatprep.subr.bf16.mxu0 %v7415_v40 }
 0x995   : > { %7034 = vmatpush3.bf16.msra.mxu0 %v7415_v40 }
 0x997   : > { %v6975_v46 = vpop.f32.mrb[168].mxu1 }
 0x998   : > { %v3053_v51 = vpop.f32.mrb[169].mxu1  ;;  %v3110_v55 = vmax.f32 %v6975_v46, 0.0 }
 0x999   : > { %v6976_v52 = vpop.f32.mrb[170].mxu1  ;;  %v3108_v58 = vmax.f32 %v3053_v51, 0.0  ;;  %v7416_v51 = vld [vmem:[#allocation5 + $0x3d8] sm:$0xff]  }
 0x99a   : > { %v3111_v56 = vmax.f32 %v6976_v52, 0.0  ;;  %v3056_v57 = vpop.f32.mrb[171].mxu1  ;;  %7035 = vmatprep.subr.bf16.mxu0 %v7416_v51  ;;  %v7417_v52 = vld [vmem:[#allocation5 + $0x3e0] sm:$0xff]  }
 0x99b   : > { %v3109_v3 = vmax.f32 %v3056_v57, 0.0  ;;  %7036 = vmatpush3.bf16.msra.mxu0 %v7416_v51  ;;  %v7418_v57 = vld [vmem:[#allocation5 + $0x3e8] sm:$0xff]  }
 0x99c   : > { %v3129_v4 = vpack.c.bf16 %v3111_v56, %v3110_v55  ;;  %7037 = vmatprep.subr.bf16.mxu0 %v7417_v52 }
 0x99d   : > { %v3128_v7 = vpack.c.bf16 %v3109_v3, %v3108_v58 }
 0x99f   : > { %7021 = vmatprep.mubr.bf16.mxu0 %v3128_v7  ;;  %7038 = vmatpush3.bf16.msra.mxu0 %v7417_v52 }
 0x9a0   : > { %7022 = vmatmul.mubr.bf16.gmra.mrb[232].mxu0 %v3129_v4  ;;  %7039 = vmatprep.subr.bf16.mxu0 %v7418_v57 }
 0x9a3   : > { %7040 = vmatpush3.bf16.msra.mxu0 %v7418_v57 }
 0x9a7   : > { %v6979_v45 = vpop.f32.mrb[172].mxu1 }
 0x9a8   : > { %v3069_v8 = vpop.f32.mrb[173].mxu1  ;;  %v3114_v11 = vmax.f32 %v6979_v45, 0.0 }
 0x9a9   : > { %v6980_v10 = vpop.f32.mrb[174].mxu1  ;;  %v3112_v16 = vmax.f32 %v3069_v8, 0.0 }
 0x9aa   : > { %v3115_v12 = vmax.f32 %v6980_v10, 0.0  ;;  %v3072_v15 = vpop.f32.mrb[175].mxu1 }
 0x9ab   : > { %v3113_v17 = vmax.f32 %v3072_v15, 0.0 }
 0x9ac   : > { %v3131_v20 = vpack.c.bf16 %v3115_v12, %v3114_v11 }
 0x9ad   : > { %v3130_v21 = vpack.c.bf16 %v3113_v17, %v3112_v16 }
 0x9af   : > { %7025 = vmatprep.mubr.bf16.mxu0 %v3130_v21 }
 0x9b0   : > { %7026 = vmatmul.mubr.bf16.gmra.mrb[236].mxu0 %v3131_v20 }
 0xa13   : > { %v6999_v25 = vpop.f32.mrb[208].mxu0 }
 0xa14   : > { %v3230_v26 = vpop.f32.mrb[209].mxu0  ;;  %v3359_v31 = vmax.f32 %v6999_v25, 0.0 }
 0xa15   : > { %v7000_v24 = vpop.f32.mrb[210].mxu0  ;;  %v3357_v37 = vmax.f32 %v3230_v26, 0.0 }
 0xa16   : > { %v3360_v9 = vmax.f32 %v7000_v24, 0.0  ;;  %v3233_v36 = vpop.f32.mrb[211].mxu0 }
 0xa17   : > { %v3358_v38 = vmax.f32 %v3233_v36, 0.0 }
 0xa18   : > { %v3390_v39 = vpack.c.bf16 %v3360_v9, %v3359_v31 }
 0xa19   : > { %v3389_v46 = vpack.c.bf16 %v3358_v38, %v3357_v37 }
 0xa1b   : > { %3565 = vmatprep.mubr.bf16.mxu1 %v3389_v46 }
 0xa1c   : > { %3566 = vmatmul.mubr.bf16.vlgmr.msra.gmra.mrb[176].mxu1 %v7879_v6 }
 0xa1d   : > { %3573 = vmatprep.mubr.bf16.mxu1 %v3390_v39 }
 0xa23   : > { %v7003_v55 = vpop.f32.mrb[212].mxu0 }
 0xa24   : > { %v3246_v56 = vpop.f32.mrb[213].mxu0  ;;  %3574 = vmatmul.mubr.bf16.gmra.mrb[180].mxu1 %v7886_v22  ;;  %v3363_v3 = vmax.f32 %v7003_v55, 0.0 }
 0xa25   : > { %v7004_v58 = vpop.f32.mrb[214].mxu0  ;;  %v3361_v45 = vmax.f32 %v3246_v56, 0.0 }
 0xa26   : > { %v3364_v4 = vmax.f32 %v7004_v58, 0.0  ;;  %v3249_v7 = vpop.f32.mrb[215].mxu0 }
 0xa27   : > { %v3362_v8 = vmax.f32 %v3249_v7, 0.0 }
 0xa28   : > { %v3392_v10 = vpack.c.bf16 %v3364_v4, %v3363_v3 }
 0xa29   : > { %v3391_v11 = vpack.c.bf16 %v3362_v8, %v3361_v45 }
 0xa2b   : > { %3581 = vmatprep.mubr.bf16.mxu1 %v3391_v11 }
 0xa2c   : > { %3582 = vmatmul.mubr.bf16.gmra.mrb[184].mxu1 %v7888_v23 }
 0xa2d   : > { %3589 = vmatprep.mubr.bf16.mxu1 %v3392_v10 }
 0xa33   : > { %v7007_v12 = vpop.f32.mrb[216].mxu0 }
 0xa34   : > { %v3262_v15 = vpop.f32.mrb[217].mxu0  ;;  %3590 = vmatmul.mubr.bf16.gmra.mrb[188].mxu1 %v7896_v32  ;;  %v3367_v17 = vmax.f32 %v7007_v12, 0.0 }
 0xa35   : > { %v7008_v16 = vpop.f32.mrb[218].mxu0  ;;  %v3365_v25 = vmax.f32 %v3262_v15, 0.0 }
 0xa36   : > { %v3368_v20 = vmax.f32 %v7008_v16, 0.0  ;;  %v3265_v21 = vpop.f32.mrb[219].mxu0 }
 0xa37   : > { %v3366_v26 = vmax.f32 %v3265_v21, 0.0 }
 0xa38   : > { %v3394_v29 = vpack.c.bf16 %v3368_v20, %v3367_v17 }
 0xa39   : > { %v3393_v30 = vpack.c.bf16 %v3366_v26, %v3365_v25 }
 0xa3b   : > { %3597 = vmatprep.mubr.bf16.mxu1 %v3393_v30  ;;  %v7419_v30 = vld [vmem:[#allocation5 + $0x3f0] sm:$0xff]  }
 0xa3c   : > { %3598 = vmatmul.mubr.bf16.gmra.mrb[192].mxu1 %v7898_v34  ;;  %7041 = vmatprep.subr.bf16.mxu0 %v7419_v30 }
 0xa3d   : > { %3605 = vmatprep.mubr.bf16.mxu1 %v3394_v29  ;;  %7042 = vmatpush3.bf16.msra.mxu0 %v7419_v30 }
 0xa43   : > { %v7011_v24 = vpop.f32.mrb[220].mxu0 }
 0xa44   : > { %v3278_v31 = vpop.f32.mrb[221].mxu0  ;;  %3606 = vmatmul.mubr.bf16.gmra.mrb[196].mxu1 %v7906_v41  ;;  %v3371_v36 = vmax.f32 %v7011_v24, 0.0 }
 0xa45   : > { %v7012_v9 = vpop.f32.mrb[222].mxu0  ;;  %v3369_v39 = vmax.f32 %v3278_v31, 0.0 }
 0xa46   : > { %v3372_v37 = vmax.f32 %v7012_v9, 0.0  ;;  %v3281_v38 = vpop.f32.mrb[223].mxu0 }
 0xa47   : > { %v3370_v40 = vmax.f32 %v3281_v38, 0.0 }
 0xa48   : > { %v3396_v46 = vpack.c.bf16 %v3372_v37, %v3371_v36 }
 0xa49   : > { %v3395_v51 = vpack.c.bf16 %v3370_v40, %v3369_v39 }
 0xa4b   : > { %3613 = vmatprep.mubr.bf16.mxu1 %v3395_v51  ;;  %v7420_v51 = vld [vmem:[#allocation5 + $0x3f8] sm:$0xff]  }
 0xa4c   : > { %3614 = vmatmul.mubr.bf16.gmra.mrb[200].mxu1 %v7908_v42  ;;  %7043 = vmatprep.subr.bf16.mxu0 %v7420_v51 }
 0xa4d   : > { %3621 = vmatprep.mubr.bf16.mxu1 %v3396_v46  ;;  %7044 = vmatpush3.bf16.msra.mxu0 %v7420_v51 }
 0xa53   : > { %v7015_v52 = vpop.f32.mrb[224].mxu0 }
 0xa54   : > { %v3294_v55 = vpop.f32.mrb[225].mxu0  ;;  %3622 = vmatmul.mubr.bf16.gmra.mrb[204].mxu1 %v7916_v47  ;;  %v3375_v57 = vmax.f32 %v7015_v52, 0.0 }
 0xa55   : > { %v7016_v56 = vpop.f32.mrb[226].mxu0  ;;  %v3373_v4 = vmax.f32 %v3294_v55, 0.0 }
 0xa56   : > { %v3376_v58 = vmax.f32 %v7016_v56, 0.0  ;;  %v3297_v3 = vpop.f32.mrb[227].mxu0 }
 0xa57   : > { %v3374_v7 = vmax.f32 %v3297_v3, 0.0 }
 0xa58   : > { %v3398_v45 = vpack.c.bf16 %v3376_v58, %v3375_v57 }
 0xa59   : > { %v3397_v8 = vpack.c.bf16 %v3374_v7, %v3373_v4 }
 0xa5b   : > { %3629 = vmatprep.mubr.bf16.mxu1 %v3397_v8 }
 0xa5c   : > { %3630 = vmatmul.mubr.bf16.gmra.mrb[208].mxu1 %v7918_v48 }
 0xa5d   : > { %3637 = vmatprep.mubr.bf16.mxu1 %v3398_v45 }
 0xa63   : > { %v7019_v10 = vpop.f32.mrb[228].mxu0 }
 0xa64   : > { %v3310_v11 = vpop.f32.mrb[229].mxu0  ;;  %3638 = vmatmul.mubr.bf16.gmra.mrb[212].mxu1 %v7926_v53  ;;  %v3379_v15 = vmax.f32 %v7019_v10, 0.0 }
 0xa65   : > { %v7020_v12 = vpop.f32.mrb[230].mxu0  ;;  %v3377_v20 = vmax.f32 %v3310_v11, 0.0 }
 0xa66   : > { %v3380_v16 = vmax.f32 %v7020_v12, 0.0  ;;  %v3313_v17 = vpop.f32.mrb[231].mxu0 }
 0xa67   : > { %v3378_v21 = vmax.f32 %v3313_v17, 0.0 }
 0xa68   : > { %v3400_v25 = vpack.c.bf16 %v3380_v16, %v3379_v15  ;;  %v7421_v16 = vld [vmem:[#allocation5 + $0x400] sm:$0xff]  }
 0xa69   : > { %v3399_v26 = vpack.c.bf16 %v3378_v21, %v3377_v20  ;;  %7077 = vmatprep.subr.bf16.mxu0 %v7421_v16 }
 0xa6b   : > { %3645 = vmatprep.mubr.bf16.mxu1 %v3399_v26 }
 0xa6c   : > { %3646 = vmatmul.mubr.bf16.gmra.mrb[216].mxu1 %v7928_v54 }
 0xa6d   : > { %3653 = vmatprep.mubr.bf16.mxu1 %v3400_v25 }
 0xa73   : > { %v7023_v29 = vpop.f32.mrb[232].mxu0 }
 0xa74   : > { %v3326_v24 = vpop.f32.mrb[233].mxu0  ;;  %3654 = vmatmul.mubr.bf16.gmra.mrb[220].mxu1 %v7936_v59  ;;  %v3383_v9 = vmax.f32 %v7023_v29, 0.0 }
 0xa75   : > { %v7024_v31 = vpop.f32.mrb[234].mxu0  ;;  %v3381_v38 = vmax.f32 %v3326_v24, 0.0 }
 0xa76   : > { %v3384_v36 = vmax.f32 %v7024_v31, 0.0  ;;  %v3329_v37 = vpop.f32.mrb[235].mxu0 }
 0xa77   : > { %v3382_v39 = vmax.f32 %v3329_v37, 0.0 }
 0xa78   : > { %v3402_v40 = vpack.c.bf16 %v3384_v36, %v3383_v9 }
 0xa79   : > { %v3401_v46 = vpack.c.bf16 %v3382_v39, %v3381_v38 }
 0xa7b   : > { %3661 = vmatprep.mubr.bf16.mxu1 %v3401_v46  ;;  %v7422_v46 = vld [vmem:[#allocation5 + $0x408] sm:$0xff]  }
 0xa7c   : > { %3662 = vmatmul.mubr.bf16.gmra.mrb[224].mxu1 %v7938_v60 }
 0xa7d   : > { %3669 = vmatprep.mubr.bf16.mxu1 %v3402_v40 }
 0xa83   : > { %v7027_v52 = vpop.f32.mrb[236].mxu0 }
 0xa84   : > { %v3342_v55 = vpop.f32.mrb[237].mxu0  ;;  %3670 = vmatmul.mubr.bf16.gmra.mrb[228].mxu1 %v7946_v1  ;;  %v3387_v57 = vmax.f32 %v7027_v52, 0.0 }
 0xa85   : > { %v7028_v56 = vpop.f32.mrb[238].mxu0  ;;  %v3385_v4 = vmax.f32 %v3342_v55, 0.0 }
 0xa86   : > { %v3388_v58 = vmax.f32 %v7028_v56, 0.0  ;;  %v3345_v3 = vpop.f32.mrb[239].mxu0 }
 0xa87   : > { %v3386_v7 = vmax.f32 %v3345_v3, 0.0 }
 0xa88   : > { %v3404_v45 = vpack.c.bf16 %v3388_v58, %v3387_v57  ;;  %v7423_v58 = vld [vmem:[#allocation5 + $0x410] sm:$0xff]  }
 0xa89   : > { %v3403_v8 = vpack.c.bf16 %v3386_v7, %v3385_v4 }
 0xa8b   : > { %3677 = vmatprep.mubr.bf16.mxu1 %v3403_v8  ;;  %v7424_v8 = vld [vmem:[#allocation5 + $0x418] sm:$0xff]  }
 0xa8c   : > { %3678 = vmatmul.mubr.bf16.gmra.mrb[232].mxu1 %v7948_v2 }
 0xa8d   : > { %3685 = vmatprep.mubr.bf16.mxu1 %v3404_v45 }
 0xa94   : > { %3686 = vmatmul.mubr.bf16.gmra.mrb[236].mxu1 %v7954_v5 }
 0xaef   : > { %v6181_v10 = vpop.f32.mrb[176].mxu1 }
 0xaf0   : > { %v6182_v11 = vpop.f32.mrb[177].mxu1 }
 0xaf1   : > { %v6183_v12 = vadd.f32 %v6182_v11, %v6181_v10  ;;  %v6184_v15 = vpop.f32.mrb[178].mxu1 }
 0xaf2   : > { %v6185_v17 = vpop.f32.mrb[179].mxu1 }
 0xaf3   : > { %v6186_v20 = vadd.f32 %v6185_v17, %v6184_v15  ;;  %v3694_v21 = vmax.f32 %v6183_v12, 0.0 }
 0xaf5   : > { %v3695_v25 = vmax.f32 %v6186_v20, 0.0  ;;  %v7425_v20 = vld [vmem:[#allocation5 + $0x420] sm:$0xff]  }
 0xaf7   : > { %v3726_v26 = vpack.c.bf16 %v3695_v25, %v3694_v21  ;;  %v6187_v29 = vpop.f32.mrb[180].mxu1 }
 0xaf8   : > { %v6188_v30 = vpop.f32.mrb[181].mxu1 }
 0xaf9   : > { %v6189_v24 = vadd.f32 %v6188_v30, %v6187_v29  ;;  %v6190_v31 = vpop.f32.mrb[182].mxu1  ;;  %7045 = vmatprep.mubr.bf16.mxu0 %v3726_v26  ;;  %v7426_v29 = vld [vmem:[#allocation5 + $0x428] sm:$0xff]  }
 0xafa   : > { %v6191_v9 = vpop.f32.mrb[183].mxu1 }
 0xafb   : > { %v6192_v36 = vadd.f32 %v6191_v9, %v6190_v31  ;;  %v3696_v37 = vmax.f32 %v6189_v24, 0.0 }
 0xafd   : > { %v3697_v38 = vmax.f32 %v6192_v36, 0.0 }
 0xaff   : > { %v3727_v39 = vpack.c.bf16 %v3697_v38, %v3696_v37  ;;  %v6193_v40 = vpop.f32.mrb[184].mxu1  ;;  %v7427_v37 = vld [vmem:[#allocation5 + $0x430] sm:$0xff]  }
 0xb00   : > { %v6194_v51 = vpop.f32.mrb[185].mxu1 }
 0xb01   : > { %v6195_v52 = vadd.f32 %v6194_v51, %v6193_v40  ;;  %v6196_v55 = vpop.f32.mrb[186].mxu1  ;;  %7046 = vmatmul.mubr.bf16.vlgmr.msra.gmra.mrb[240].mxu0 %v3727_v39 }
 0xb02   : > { %v6197_v56 = vpop.f32.mrb[187].mxu1  ;;  %7078 = vmatpush3.bf16.msra.mxu0 %v7421_v16 }
 0xb03   : > { %v6198_v57 = vadd.f32 %v6197_v56, %v6196_v55  ;;  %7079 = vmatprep.subr.bf16.mxu0 %v7422_v46  ;;  %v3698_v3 = vmax.f32 %v6195_v52, 0.0 }
 0xb05   : > { %v3699_v4 = vmax.f32 %v6198_v57, 0.0 }
 0xb06   : > { %7080 = vmatpush3.bf16.msra.mxu0 %v7422_v46 }
 0xb07   : > { %v3728_v7 = vpack.c.bf16 %v3699_v4, %v3698_v3  ;;  %v6199_v45 = vpop.f32.mrb[188].mxu1  ;;  %7081 = vmatprep.subr.bf16.mxu0 %v7423_v58 }
 0xb08   : > { %v6200_v10 = vpop.f32.mrb[189].mxu1 }
 0xb09   : > { %v6201_v11 = vadd.f32 %v6200_v10, %v6199_v45  ;;  %v6202_v12 = vpop.f32.mrb[190].mxu1  ;;  %7049 = vmatprep.mubr.bf16.mxu0 %v3728_v7 }
 0xb0a   : > { %v6203_v15 = vpop.f32.mrb[191].mxu1  ;;  %7082 = vmatpush3.bf16.msra.mxu0 %v7423_v58 }
 0xb0b   : > { %v6204_v17 = vadd.f32 %v6203_v15, %v6202_v12  ;;  %7083 = vmatprep.subr.bf16.mxu0 %v7424_v8  ;;  %v3700_v16 = vmax.f32 %v6201_v11, 0.0 }
 0xb0d   : > { %v3701_v21 = vmax.f32 %v6204_v17, 0.0 }
 0xb0e   : > { %7084 = vmatpush3.bf16.msra.mxu0 %v7424_v8 }
 0xb0f   : > { %v3729_v25 = vpack.c.bf16 %v3701_v21, %v3700_v16  ;;  %v6205_v26 = vpop.f32.mrb[192].mxu1  ;;  %7085 = vmatprep.subr.bf16.mxu0 %v7425_v20 }
 0xb10   : > { %v6206_v30 = vpop.f32.mrb[193].mxu1 }
 0xb11   : > { %v6207_v24 = vadd.f32 %v6206_v30, %v6205_v26  ;;  %v6208_v31 = vpop.f32.mrb[194].mxu1  ;;  %7050 = vmatmul.mubr.bf16.gmra.mrb[244].mxu0 %v3729_v25 }
 0xb12   : > { %v6209_v9 = vpop.f32.mrb[195].mxu1  ;;  %7086 = vmatpush3.bf16.msra.mxu0 %v7425_v20 }
 0xb13   : > { %v6210_v36 = vadd.f32 %v6209_v9, %v6208_v31  ;;  %7087 = vmatprep.subr.bf16.mxu0 %v7426_v29  ;;  %v3702_v38 = vmax.f32 %v6207_v24, 0.0 }
 0xb15   : > { %v3703_v39 = vmax.f32 %v6210_v36, 0.0 }
 0xb16   : > { %7088 = vmatpush3.bf16.msra.mxu0 %v7426_v29 }
 0xb17   : > { %v3730_v40 = vpack.c.bf16 %v3703_v39, %v3702_v38  ;;  %v6211_v46 = vpop.f32.mrb[196].mxu1  ;;  %7089 = vmatprep.subr.bf16.mxu0 %v7427_v37 }
 0xb18   : > { %v6212_v51 = vpop.f32.mrb[197].mxu1 }
 0xb19   : > { %v6213_v52 = vadd.f32 %v6212_v51, %v6211_v46  ;;  %v6214_v55 = vpop.f32.mrb[198].mxu1  ;;  %7053 = vmatprep.mubr.bf16.mxu0 %v3730_v40 }
 0xb1a   : > { %v6215_v56 = vpop.f32.mrb[199].mxu1  ;;  %7090 = vmatpush3.bf16.msra.mxu0 %v7427_v37 }
 0xb1b   : > { %v6216_v57 = vadd.f32 %v6215_v56, %v6214_v55  ;;  %v3704_v58 = vmax.f32 %v6213_v52, 0.0 }
 0xb1d   : > { %v3705_v3 = vmax.f32 %v6216_v57, 0.0 }
 0xb1f   : > { %v3731_v4 = vpack.c.bf16 %v3705_v3, %v3704_v58  ;;  %v6217_v7 = vpop.f32.mrb[200].mxu1 }
 0xb20   : > { %v6218_v45 = vpop.f32.mrb[201].mxu1 }
 0xb21   : > { %v6219_v8 = vadd.f32 %v6218_v45, %v6217_v7  ;;  %v6220_v10 = vpop.f32.mrb[202].mxu1  ;;  %7054 = vmatmul.mubr.bf16.gmra.mrb[248].mxu0 %v3731_v4 }
 0xb22   : > { %v6221_v11 = vpop.f32.mrb[203].mxu1 }
 0xb23   : > { %v6222_v12 = vadd.f32 %v6221_v11, %v6220_v10  ;;  %v3706_v15 = vmax.f32 %v6219_v8, 0.0 }
 0xb25   : > { %v3707_v17 = vmax.f32 %v6222_v12, 0.0 }
 0xb27   : > { %v3732_v20 = vpack.c.bf16 %v3707_v17, %v3706_v15  ;;  %v6223_v16 = vpop.f32.mrb[204].mxu1 }
 0xb28   : > { %v6224_v21 = vpop.f32.mrb[205].mxu1 }
 0xb29   : > { %v6225_v25 = vadd.f32 %v6224_v21, %v6223_v16  ;;  %v6226_v26 = vpop.f32.mrb[206].mxu1  ;;  %7057 = vmatprep.mubr.bf16.mxu0 %v3732_v20 }
 0xb2a   : > { %v6227_v29 = vpop.f32.mrb[207].mxu1 }
 0xb2b   : > { %v6228_v30 = vadd.f32 %v6227_v29, %v6226_v26  ;;  %v3708_v24 = vmax.f32 %v6225_v25, 0.0 }
 0xb2d   : > { %v3709_v31 = vmax.f32 %v6228_v30, 0.0 }
 0xb2f   : > { %v3733_v9 = vpack.c.bf16 %v3709_v31, %v3708_v24  ;;  %v6229_v36 = vpop.f32.mrb[208].mxu1 }
 0xb30   : > { %v6230_v37 = vpop.f32.mrb[209].mxu1 }
 0xb31   : > { %v6231_v38 = vadd.f32 %v6230_v37, %v6229_v36  ;;  %v6232_v39 = vpop.f32.mrb[210].mxu1  ;;  %7058 = vmatmul.mubr.bf16.gmra.mrb[252].mxu0 %v3733_v9 }
 0xb32   : > { %v6233_v40 = vpop.f32.mrb[211].mxu1 }
 0xb33   : > { %v6234_v46 = vadd.f32 %v6233_v40, %v6232_v39  ;;  %v3710_v51 = vmax.f32 %v6231_v38, 0.0 }
 0xb35   : > { %v3711_v52 = vmax.f32 %v6234_v46, 0.0 }
 0xb37   : > { %v3734_v55 = vpack.c.bf16 %v3711_v52, %v3710_v51  ;;  %v6235_v56 = vpop.f32.mrb[212].mxu1 }
 0xb38   : > { %v6236_v57 = vpop.f32.mrb[213].mxu1 }
 0xb39   : > { %v6237_v58 = vadd.f32 %v6236_v57, %v6235_v56  ;;  %v6238_v3 = vpop.f32.mrb[214].mxu1  ;;  %7061 = vmatprep.mubr.bf16.mxu0 %v3734_v55 }
 0xb3a   : > { %v6239_v4 = vpop.f32.mrb[215].mxu1 }
 0xb3b   : > { %v6240_v7 = vadd.f32 %v6239_v4, %v6238_v3  ;;  %v3712_v45 = vmax.f32 %v6237_v58, 0.0  ;;  %v7428_v3 = vld [vmem:[#allocation5 + $0x438] sm:$0xff]  }
 0xb3c   : > { %7091 = vmatprep.subr.bf16.mxu0 %v7428_v3 }
 0xb3d   : > { %v3713_v8 = vmax.f32 %v6240_v7, 0.0  ;;  %7092 = vmatpush3.bf16.msra.mxu0 %v7428_v3  ;;  %v7432_v3 = vld [vmem:[#allocation5 + $0x458] sm:$0xff]  }
 0xb3f   : > { %v3735_v10 = vpack.c.bf16 %v3713_v8, %v3712_v45  ;;  %v6241_v11 = vpop.f32.mrb[216].mxu1 }
 0xb40   : > { %v6242_v12 = vpop.f32.mrb[217].mxu1 }
 0xb41   : > { %v6243_v15 = vadd.f32 %v6242_v12, %v6241_v11  ;;  %v6244_v17 = vpop.f32.mrb[218].mxu1  ;;  %7062 = vmatmul.mubr.bf16.gmra.mrb[0].mxu0 %v3735_v10 }
 0xb42   : > { %v6245_v20 = vpop.f32.mrb[219].mxu1 }
 0xb43   : > { %v6246_v16 = vadd.f32 %v6245_v20, %v6244_v17  ;;  %v3714_v21 = vmax.f32 %v6243_v15, 0.0 }
 0xb45   : > { %v3715_v25 = vmax.f32 %v6246_v16, 0.0 }
 0xb47   : > { %v3736_v26 = vpack.c.bf16 %v3715_v25, %v3714_v21  ;;  %v6247_v29 = vpop.f32.mrb[220].mxu1 }
 0xb48   : > { %v6248_v30 = vpop.f32.mrb[221].mxu1 }
 0xb49   : > { %v6249_v24 = vadd.f32 %v6248_v30, %v6247_v29  ;;  %v6250_v31 = vpop.f32.mrb[222].mxu1  ;;  %7065 = vmatprep.mubr.bf16.mxu0 %v3736_v26 }
 0xb4a   : > { %v6251_v9 = vpop.f32.mrb[223].mxu1 }
 0xb4b   : > { %v6252_v36 = vadd.f32 %v6251_v9, %v6250_v31  ;;  %v3716_v37 = vmax.f32 %v6249_v24, 0.0 }
 0xb4d   : > { %v3717_v38 = vmax.f32 %v6252_v36, 0.0 }
 0xb4f   : > { %v3737_v39 = vpack.c.bf16 %v3717_v38, %v3716_v37  ;;  %v6253_v40 = vpop.f32.mrb[224].mxu1 }
 0xb50   : > { %v6254_v46 = vpop.f32.mrb[225].mxu1 }
 0xb51   : > { %v6255_v51 = vadd.f32 %v6254_v46, %v6253_v40  ;;  %v6256_v52 = vpop.f32.mrb[226].mxu1  ;;  %7066 = vmatmul.mubr.bf16.gmra.mrb[4].mxu0 %v3737_v39 }
 0xb52   : > { %v6257_v55 = vpop.f32.mrb[227].mxu1 }
 0xb53   : > { %v6258_v56 = vadd.f32 %v6257_v55, %v6256_v52  ;;  %v3718_v57 = vmax.f32 %v6255_v51, 0.0 }
 0xb55   : > { %v3719_v58 = vmax.f32 %v6258_v56, 0.0  ;;  %v7429_v56 = vld [vmem:[#allocation5 + $0x440] sm:$0xff]  }
 0xb56   : > { %7125 = vmatprep.subr.bf16.mxu1 %v7429_v56 }
 0xb57   : > { %v3738_v4 = vpack.c.bf16 %v3719_v58, %v3718_v57  ;;  %v6259_v7 = vpop.f32.mrb[228].mxu1  ;;  %7126 = vmatpush3.bf16.msra.mxu1 %v7429_v56  ;;  %v7430_v57 = vld [vmem:[#allocation5 + $0x448] sm:$0xff]   ;;  %v7431_v58 = vld [vmem:[#allocation5 + $0x450] sm:$0xff]  }
 0xb58   : > { %v6260_v45 = vpop.f32.mrb[229].mxu1  ;;  %7127 = vmatprep.subr.bf16.mxu1 %v7430_v57 }
 0xb59   : > { %v6261_v8 = vadd.f32 %v6260_v45, %v6259_v7  ;;  %v6262_v10 = vpop.f32.mrb[230].mxu1  ;;  %7069 = vmatprep.mubr.bf16.mxu0 %v3738_v4  ;;  %v7433_v4 = vld [vmem:[#allocation5 + $0x460] sm:$0xff]  }
 0xb5a   : > { %v6263_v11 = vpop.f32.mrb[231].mxu1 }
 0xb5b   : > { %v6264_v12 = vadd.f32 %v6263_v11, %v6262_v10  ;;  %v3720_v15 = vmax.f32 %v6261_v8, 0.0  ;;  %7128 = vmatpush3.bf16.msra.mxu1 %v7430_v57  ;;  %v7434_v10 = vld [vmem:[#allocation5 + $0x468] sm:$0xff]  }
 0xb5c   : > { %7129 = vmatprep.subr.bf16.mxu1 %v7431_v58 }
 0xb5d   : > { %v3721_v17 = vmax.f32 %v6264_v12, 0.0 }
 0xb5f   : > { %v3739_v20 = vpack.c.bf16 %v3721_v17, %v3720_v15  ;;  %v6265_v16 = vpop.f32.mrb[232].mxu1  ;;  %7130 = vmatpush3.bf16.msra.mxu1 %v7431_v58 }
 0xb60   : > { %v6266_v21 = vpop.f32.mrb[233].mxu1  ;;  %7131 = vmatprep.subr.bf16.mxu1 %v7432_v3 }
 0xb61   : > { %v6267_v25 = vadd.f32 %v6266_v21, %v6265_v16  ;;  %v6268_v26 = vpop.f32.mrb[234].mxu1  ;;  %7070 = vmatmul.mubr.bf16.gmra.mrb[8].mxu0 %v3739_v20 }
 0xb62   : > { %v6269_v29 = vpop.f32.mrb[235].mxu1 }
 0xb63   : > { %v6270_v30 = vadd.f32 %v6269_v29, %v6268_v26  ;;  %v3722_v24 = vmax.f32 %v6267_v25, 0.0  ;;  %7132 = vmatpush3.bf16.msra.mxu1 %v7432_v3  ;;  %v7435_v25 = vld [vmem:[#allocation5 + $0x470] sm:$0xff]   ;;  %v7436_v26 = vld [vmem:[#allocation5 + $0x478] sm:$0xff]  }
 0xb64   : > { %7133 = vmatprep.subr.bf16.mxu1 %v7433_v4 }
 0xb65   : > { %v3723_v31 = vmax.f32 %v6270_v30, 0.0 }
 0xb67   : > { %v3740_v9 = vpack.c.bf16 %v3723_v31, %v3722_v24  ;;  %v6271_v36 = vpop.f32.mrb[236].mxu1  ;;  %7134 = vmatpush3.bf16.msra.mxu1 %v7433_v4 }
 0xb68   : > { %v6272_v37 = vpop.f32.mrb[237].mxu1  ;;  %7135 = vmatprep.subr.bf16.mxu1 %v7434_v10 }
 0xb69   : > { %v6273_v38 = vadd.f32 %v6272_v37, %v6271_v36  ;;  %v6274_v39 = vpop.f32.mrb[238].mxu1  ;;  %7073 = vmatprep.mubr.bf16.mxu0 %v3740_v9 }
 0xb6a   : > { %v6275_v40 = vpop.f32.mrb[239].mxu1 }
 0xb6b   : > { %v6276_v46 = vadd.f32 %v6275_v40, %v6274_v39  ;;  %v3724_v51 = vmax.f32 %v6273_v38, 0.0  ;;  %7136 = vmatpush3.bf16.msra.mxu1 %v7434_v10 }
 0xb6c   : > { %7137 = vmatprep.subr.bf16.mxu1 %v7435_v25 }
 0xb6d   : > { %v3725_v52 = vmax.f32 %v6276_v46, 0.0 }
 0xb6f   : > { %v3741_v55 = vpack.c.bf16 %v3725_v52, %v3724_v51  ;;  %7138 = vmatpush3.bf16.msra.mxu1 %v7435_v25 }
 0xb70   : > { %7139 = vmatprep.subr.bf16.mxu1 %v7436_v26 }
 0xb71   : > { %7074 = vmatmul.mubr.bf16.gmra.mrb[12].mxu0 %v3741_v55 }
 0xb73   : > { %7140 = vmatpush3.bf16.msra.mxu1 %v7436_v26 }
 0xbd4   : > { %v7047_v7 = vpop.f32.mrb[240].mxu0 }
 0xbd5   : > { %v3840_v45 = vpop.f32.mrb[241].mxu0  ;;  %v3969_v11 = vmax.f32 %v7047_v7, 0.0 }
 0xbd6   : > { %v7048_v8 = vpop.f32.mrb[242].mxu0  ;;  %v3967_v17 = vmax.f32 %v3840_v45, 0.0 }
 0xbd7   : > { %v3970_v12 = vmax.f32 %v7048_v8, 0.0  ;;  %v3843_v15 = vpop.f32.mrb[243].mxu0 }
 0xbd8   : > { %v3968_v20 = vmax.f32 %v3843_v15, 0.0 }
 0xbd9   : > { %v4000_v16 = vpack.c.bf16 %v3970_v12, %v3969_v11 }
 0xbda   : > { %v3999_v21 = vpack.c.bf16 %v3968_v20, %v3967_v17 }
 0xbdc   : > { %7093 = vmatprep.mubr.bf16.mxu0 %v3999_v21 }
 0xbdd   : > { %7094 = vmatmul.mubr.bf16.vlgmr.msra.gmra.mrb[16].mxu0 %v4000_v16 }
 0xbe4   : > { %v7051_v29 = vpop.f32.mrb[244].mxu0 }
 0xbe5   : > { %v3856_v30 = vpop.f32.mrb[245].mxu0  ;;  %v3973_v31 = vmax.f32 %v7051_v29, 0.0 }
 0xbe6   : > { %v7052_v24 = vpop.f32.mrb[246].mxu0  ;;  %v3971_v37 = vmax.f32 %v3856_v30, 0.0 }
 0xbe7   : > { %v3974_v9 = vmax.f32 %v7052_v24, 0.0  ;;  %v3859_v36 = vpop.f32.mrb[247].mxu0 }
 0xbe8   : > { %v3972_v38 = vmax.f32 %v3859_v36, 0.0 }
 0xbe9   : > { %v4002_v39 = vpack.c.bf16 %v3974_v9, %v3973_v31 }
 0xbea   : > { %v4001_v40 = vpack.c.bf16 %v3972_v38, %v3971_v37 }
 0xbec   : > { %7097 = vmatprep.mubr.bf16.mxu0 %v4001_v40 }
 0xbed   : > { %7098 = vmatmul.mubr.bf16.gmra.mrb[20].mxu0 %v4002_v39 }
 0xbf4   : > { %v7055_v46 = vpop.f32.mrb[248].mxu0 }
 0xbf5   : > { %v3872_v51 = vpop.f32.mrb[249].mxu0  ;;  %v3977_v55 = vmax.f32 %v7055_v46, 0.0 }
 0xbf6   : > { %v7056_v52 = vpop.f32.mrb[250].mxu0  ;;  %v3975_v58 = vmax.f32 %v3872_v51, 0.0 }
 0xbf7   : > { %v3978_v56 = vmax.f32 %v7056_v52, 0.0  ;;  %v3875_v57 = vpop.f32.mrb[251].mxu0 }
 0xbf8   : > { %v3976_v3 = vmax.f32 %v3875_v57, 0.0 }
 0xbf9   : > { %v4004_v4 = vpack.c.bf16 %v3978_v56, %v3977_v55 }
 0xbfa   : > { %v4003_v7 = vpack.c.bf16 %v3976_v3, %v3975_v58 }
 0xbfc   : > { %7101 = vmatprep.mubr.bf16.mxu0 %v4003_v7 }
 0xbfd   : > { %7102 = vmatmul.mubr.bf16.gmra.mrb[24].mxu0 %v4004_v4 }
 0xc04   : > { %v7059_v45 = vpop.f32.mrb[252].mxu0 }
 0xc05   : > { %v3888_v8 = vpop.f32.mrb[253].mxu0  ;;  %v3981_v11 = vmax.f32 %v7059_v45, 0.0 }
 0xc06   : > { %v7060_v10 = vpop.f32.mrb[254].mxu0  ;;  %v3979_v17 = vmax.f32 %v3888_v8, 0.0 }
 0xc07   : > { %v3982_v12 = vmax.f32 %v7060_v10, 0.0  ;;  %v3891_v15 = vpop.f32.mrb[255].mxu0 }
 0xc08   : > { %v3980_v20 = vmax.f32 %v3891_v15, 0.0 }
 0xc09   : > { %v4006_v16 = vpack.c.bf16 %v3982_v12, %v3981_v11 }
 0xc0a   : > { %v4005_v21 = vpack.c.bf16 %v3980_v20, %v3979_v17 }
 0xc0c   : > { %7105 = vmatprep.mubr.bf16.mxu0 %v4005_v21 }
 0xc0d   : > { %7106 = vmatmul.mubr.bf16.gmra.mrb[28].mxu0 %v4006_v16 }
 0xc14   : > { %v7063_v25 = vpop.f32.mrb[0].mxu0 }
 0xc15   : > { %v3904_v26 = vpop.f32.mrb[1].mxu0  ;;  %v3985_v30 = vmax.f32 %v7063_v25, 0.0 }
 0xc16   : > { %v7064_v29 = vpop.f32.mrb[2].mxu0  ;;  %v3983_v9 = vmax.f32 %v3904_v26, 0.0 }
 0xc17   : > { %v3986_v24 = vmax.f32 %v7064_v29, 0.0  ;;  %v3907_v31 = vpop.f32.mrb[3].mxu0 }
 0xc18   : > { %v3984_v36 = vmax.f32 %v3907_v31, 0.0 }
 0xc19   : > { %v4008_v37 = vpack.c.bf16 %v3986_v24, %v3985_v30 }
 0xc1a   : > { %v4007_v38 = vpack.c.bf16 %v3984_v36, %v3983_v9 }
 0xc1c   : > { %7109 = vmatprep.mubr.bf16.mxu0 %v4007_v38 }
 0xc1d   : > { %7110 = vmatmul.mubr.bf16.gmra.mrb[32].mxu0 %v4008_v37  ;;  %v7437_v37 = vld [vmem:[#allocation5 + $0x500] sm:$0xff]  }
 0xc1e   : > { %7173 = vmatprep.subr.bf16.mxu1 %v7437_v37 }
 0xc24   : > { %v7067_v39 = vpop.f32.mrb[4].mxu0 }
 0xc25   : > { %v3920_v40 = vpop.f32.mrb[5].mxu0  ;;  %v3989_v51 = vmax.f32 %v7067_v39, 0.0 }
 0xc26   : > { %v7068_v46 = vpop.f32.mrb[6].mxu0  ;;  %v3987_v56 = vmax.f32 %v3920_v40, 0.0 }
 0xc27   : > { %v3990_v52 = vmax.f32 %v7068_v46, 0.0  ;;  %v3923_v55 = vpop.f32.mrb[7].mxu0 }
 0xc28   : > { %v3988_v57 = vmax.f32 %v3923_v55, 0.0 }
 0xc29   : > { %v4010_v58 = vpack.c.bf16 %v3990_v52, %v3989_v51 }
 0xc2a   : > { %v4009_v3 = vpack.c.bf16 %v3988_v57, %v3987_v56 }
 0xc2c   : > { %7113 = vmatprep.mubr.bf16.mxu0 %v4009_v3  ;;  %v7438_v3 = vld [vmem:[#allocation5 + $0x508] sm:$0xff]  }
 0xc2d   : > { %7114 = vmatmul.mubr.bf16.gmra.mrb[36].mxu0 %v4010_v58 }
 0xc34   : > { %v7071_v4 = vpop.f32.mrb[8].mxu0 }
 0xc35   : > { %v3936_v7 = vpop.f32.mrb[9].mxu0  ;;  %v3993_v8 = vmax.f32 %v7071_v4, 0.0  ;;  %v7439_v4 = vld [vmem:[#allocation5 + $0x510] sm:$0xff]  }
 0xc36   : > { %v7072_v45 = vpop.f32.mrb[10].mxu0  ;;  %v3991_v12 = vmax.f32 %v3936_v7, 0.0  ;;  %v7440_v7 = vld [vmem:[#allocation5 + $0x518] sm:$0xff]  }
 0xc37   : > { %v3994_v10 = vmax.f32 %v7072_v45, 0.0  ;;  %v3939_v11 = vpop.f32.mrb[11].mxu0 }
 0xc38   : > { %v3992_v15 = vmax.f32 %v3939_v11, 0.0 }
 0xc39   : > { %v4012_v17 = vpack.c.bf16 %v3994_v10, %v3993_v8 }
 0xc3a   : > { %v4011_v20 = vpack.c.bf16 %v3992_v15, %v3991_v12 }
 0xc3c   : > { %7117 = vmatprep.mubr.bf16.mxu0 %v4011_v20 }
 0xc3d   : > { %7118 = vmatmul.mubr.bf16.gmra.mrb[40].mxu0 %v4012_v17  ;;  %v7441_v17 = vld [vmem:[#allocation5 + $0x520] sm:$0xff]  }
 0xc44   : > { %v7075_v16 = vpop.f32.mrb[12].mxu0 }
 0xc45   : > { %v3952_v21 = vpop.f32.mrb[13].mxu0  ;;  %v3997_v26 = vmax.f32 %v7075_v16, 0.0 }
 0xc46   : > { %v7076_v25 = vpop.f32.mrb[14].mxu0  ;;  %v3995_v24 = vmax.f32 %v3952_v21, 0.0 }
 0xc47   : > { %v3998_v29 = vmax.f32 %v7076_v25, 0.0  ;;  %v3955_v30 = vpop.f32.mrb[15].mxu0 }
 0xc48   : > { %v3996_v31 = vmax.f32 %v3955_v30, 0.0  ;;  %v7444_v30 = vld [vmem:[#allocation5 + $0x538] sm:$0xff]  }
 0xc49   : > { %v4014_v9 = vpack.c.bf16 %v3998_v29, %v3997_v26  ;;  %v7442_v26 = vld [vmem:[#allocation5 + $0x528] sm:$0xff]   ;;  %v7443_v29 = vld [vmem:[#allocation5 + $0x530] sm:$0xff]  }
 0xc4a   : > { %v4013_v36 = vpack.c.bf16 %v3996_v31, %v3995_v24 }
 0xc4c   : > { %7121 = vmatprep.mubr.bf16.mxu0 %v4013_v36 }
 0xc4d   : > { %7122 = vmatmul.mubr.bf16.gmra.mrb[44].mxu0 %v4014_v9  ;;  %v7445_v9 = vld [vmem:[#allocation5 + $0x4c0] sm:$0xff]  }
 0xc4e   : > { %6349 = vmatprep.subr.bf16.mxu0 %v7445_v9  ;;  %v7457_v9 = vld [vmem:[#allocation5 + $0x4f0] sm:$0xff]  }
 0xcb0   : > { %v7095_v38 = vpop.f32.mrb[16].mxu0 }
 0xcb1   : > { %v4113_v39 = vpop.f32.mrb[17].mxu0  ;;  %v4242_v46 = vmax.f32 %v7095_v38, 0.0 }
 0xcb2   : > { %v7096_v40 = vpop.f32.mrb[18].mxu0  ;;  %v4240_v55 = vmax.f32 %v4113_v39, 0.0 }
 0xcb3   : > { %v4243_v51 = vmax.f32 %v7096_v40, 0.0  ;;  %v4116_v52 = vpop.f32.mrb[19].mxu0 }
 0xcb4   : > { %v4241_v56 = vmax.f32 %v4116_v52, 0.0 }
 0xcb5   : > { %v4273_v57 = vpack.c.bf16 %v4243_v51, %v4242_v46 }
 0xcb6   : > { %v4272_v58 = vpack.c.bf16 %v4241_v56, %v4240_v55  ;;  %v7447_v56 = vld [vmem:[#allocation5 + $0x4c8] sm:$0xff]  }
 0xcb8   : > { %7141 = vmatprep.mubr.bf16.mxu1 %v4272_v58 }
 0xcb9   : > { %7142 = vmatmul.mubr.bf16.vlgmr.msra.gmra.mrb[240].mxu1 %v4273_v57  ;;  %v7448_v57 = vld [vmem:[#allocation5 + $0x488] sm:$0xff]  }
 0xcba   : > { %7174 = vmatpush3.bf16.msra.mxu1 %v7437_v37  ;;  %v7446_v37 = vld [vmem:[#allocation5 + $0x480] sm:$0xff]  }
 0xcbb   : > { %7175 = vmatprep.subr.bf16.mxu1 %v7438_v3  ;;  %6350 = vmatpush3.bf16.msra.mxu0 %v7446_v37 }
 0xcbc   : > { %6351 = vmatprep.subr.bf16.mxu0 %v7447_v56 }
 0xcbe   : > { %7176 = vmatpush3.bf16.msra.mxu1 %v7438_v3 }
 0xcbf   : > { %7177 = vmatprep.subr.bf16.mxu1 %v7439_v4  ;;  %6352 = vmatpush3.bf16.msra.mxu0 %v7448_v57  ;;  %v7460_v57 = vld [vmem:[#allocation5 + $0x4b8] sm:$0xff]  }
 0xcc0   : > { %v7099_v45 = vpop.f32.mrb[20].mxu0 }
 0xcc1   : > { %v4129_v8 = vpop.f32.mrb[21].mxu0  ;;  %v4246_v11 = vmax.f32 %v7099_v45, 0.0  ;;  %v7450_v45 = vld [vmem:[#allocation5 + $0x490] sm:$0xff]  }
 0xcc2   : > { %v7100_v10 = vpop.f32.mrb[22].mxu0  ;;  %7178 = vmatpush3.bf16.msra.mxu1 %v7439_v4  ;;  %v4244_v20 = vmax.f32 %v4129_v8, 0.0  ;;  %v7449_v4 = vld [vmem:[#allocation5 + $0x4d0] sm:$0xff]  }
 0xcc3   : > { %v4247_v12 = vmax.f32 %v7100_v10, 0.0  ;;  %v4132_v15 = vpop.f32.mrb[23].mxu0  ;;  %7179 = vmatprep.subr.bf16.mxu1 %v7440_v7  ;;  %6353 = vmatprep.subr.bf16.mxu0 %v7449_v4 }
 0xcc4   : > { %v4245_v16 = vmax.f32 %v4132_v15, 0.0  ;;  %6354 = vmatpush3.bf16.msra.mxu0 %v7450_v45 }
 0xcc5   : > { %v4275_v21 = vpack.c.bf16 %v4247_v12, %v4246_v11 }
 0xcc6   : > { %v4274_v25 = vpack.c.bf16 %v4245_v16, %v4244_v20  ;;  %7180 = vmatpush3.bf16.msra.mxu1 %v7440_v7  ;;  %v7451_v16 = vld [vmem:[#allocation5 + $0x4d8] sm:$0xff]  }
 0xcc7   : > { %7181 = vmatprep.subr.bf16.mxu1 %v7441_v17  ;;  %6355 = vmatprep.subr.bf16.mxu0 %v7451_v16 }
 0xcc8   : > { %7145 = vmatprep.mubr.bf16.mxu1 %v4274_v25  ;;  %v7453_v25 = vld [vmem:[#allocation5 + $0x4e0] sm:$0xff]  }
 0xcc9   : > { %7146 = vmatmul.mubr.bf16.gmra.mrb[244].mxu1 %v4275_v21  ;;  %v7452_v21 = vld [vmem:[#allocation5 + $0x498] sm:$0xff]  }
 0xcca   : > { %7182 = vmatpush3.bf16.msra.mxu1 %v7441_v17  ;;  %6356 = vmatpush3.bf16.msra.mxu0 %v7452_v21 }
 0xccb   : > { %7183 = vmatprep.subr.bf16.mxu1 %v7442_v26  ;;  %6357 = vmatprep.subr.bf16.mxu0 %v7453_v25 }
 0xcce   : > { %7184 = vmatpush3.bf16.msra.mxu1 %v7442_v26  ;;  %v7454_v26 = vld [vmem:[#allocation5 + $0x4a0] sm:$0xff]  }
 0xccf   : > { %7185 = vmatprep.subr.bf16.mxu1 %v7443_v29  ;;  %6358 = vmatpush3.bf16.msra.mxu0 %v7454_v26 }
 0xcd0   : > { %v7103_v24 = vpop.f32.mrb[24].mxu0 }
 0xcd1   : > { %v4145_v31 = vpop.f32.mrb[25].mxu0  ;;  %v4250_v38 = vmax.f32 %v7103_v24, 0.0  ;;  %v7456_v24 = vld [vmem:[#allocation5 + $0x4a8] sm:$0xff]  }
 0xcd2   : > { %v7104_v36 = vpop.f32.mrb[26].mxu0  ;;  %7186 = vmatpush3.bf16.msra.mxu1 %v7443_v29  ;;  %v4248_v46 = vmax.f32 %v4145_v31, 0.0  ;;  %v7455_v29 = vld [vmem:[#allocation5 + $0x4e8] sm:$0xff]  }
 0xcd3   : > { %v4251_v39 = vmax.f32 %v7104_v36, 0.0  ;;  %v4148_v40 = vpop.f32.mrb[27].mxu0  ;;  %7187 = vmatprep.subr.bf16.mxu1 %v7444_v30  ;;  %6359 = vmatprep.subr.bf16.mxu0 %v7455_v29 }
 0xcd4   : > { %v4249_v51 = vmax.f32 %v4148_v40, 0.0  ;;  %6360 = vmatpush3.bf16.msra.mxu0 %v7456_v24 }
 0xcd5   : > { %v4277_v52 = vpack.c.bf16 %v4251_v39, %v4250_v38  ;;  %6361 = vmatprep.subr.bf16.mxu0 %v7457_v9 }
 0xcd6   : > { %v4276_v55 = vpack.c.bf16 %v4249_v51, %v4248_v46  ;;  %7188 = vmatpush3.bf16.msra.mxu1 %v7444_v30  ;;  %v7458_v51 = vld [vmem:[#allocation5 + $0x4b0] sm:$0xff]  }
 0xcd8   : > { %7149 = vmatprep.mubr.bf16.mxu1 %v4276_v55  ;;  %v7459_v55 = vld [vmem:[#allocation5 + $0x4f8] sm:$0xff]   ;;  %6362 = vmatpush3.bf16.msra.mxu0 %v7458_v51 }
 0xcd9   : > { %7150 = vmatmul.mubr.bf16.gmra.mrb[248].mxu1 %v4277_v52  ;;  %6363 = vmatprep.subr.bf16.mxu0 %v7459_v55 }
 0xcdc   : > { %6364 = vmatpush3.bf16.msra.mxu0 %v7460_v57 }
 0xce0   : > { %v7107_v58 = vpop.f32.mrb[28].mxu0 }
 0xce1   : > { %v4161_v3 = vpop.f32.mrb[29].mxu0  ;;  %v4254_v8 = vmax.f32 %v7107_v58, 0.0 }
 0xce2   : > { %v7108_v7 = vpop.f32.mrb[30].mxu0  ;;  %v4252_v12 = vmax.f32 %v4161_v3, 0.0 }
 0xce3   : > { %v4255_v10 = vmax.f32 %v7108_v7, 0.0  ;;  %v4164_v11 = vpop.f32.mrb[31].mxu0 }
 0xce4   : > { %v4253_v15 = vmax.f32 %v4164_v11, 0.0 }
 0xce5   : > { %v4279_v17 = vpack.c.bf16 %v4255_v10, %v4254_v8 }
 0xce6   : > { %v4278_v20 = vpack.c.bf16 %v4253_v15, %v4252_v12 }
 0xce8   : > { %7153 = vmatprep.mubr.bf16.mxu1 %v4278_v20 }
 0xce9   : > { %7154 = vmatmul.mubr.bf16.gmra.mrb[252].mxu1 %v4279_v17 }
 0xcf0   : > { %v7111_v30 = vpop.f32.mrb[32].mxu0 }
 0xcf1   : > { %v4177_v31 = vpop.f32.mrb[33].mxu0  ;;  %v4258_v37 = vmax.f32 %v7111_v30, 0.0 }
 0xcf2   : > { %v7112_v36 = vpop.f32.mrb[34].mxu0  ;;  %v4256_v40 = vmax.f32 %v4177_v31, 0.0 }
 0xcf3   : > { %v4259_v38 = vmax.f32 %v7112_v36, 0.0  ;;  %v4180_v39 = vpop.f32.mrb[35].mxu0 }
 0xcf4   : > { %v4257_v46 = vmax.f32 %v4180_v39, 0.0 }
 0xcf5   : > { %v4281_v52 = vpack.c.bf16 %v4259_v38, %v4258_v37 }
 0xcf6   : > { %v4280_v56 = vpack.c.bf16 %v4257_v46, %v4256_v40 }
 0xcf8   : > { %7157 = vmatprep.mubr.bf16.mxu1 %v4280_v56  ;;  %v7462_v56 = vld [vmem:[#allocation5 + $0x540] sm:$0xff]  }
 0xcf9   : > { %7158 = vmatmul.mubr.bf16.gmra.mrb[0].mxu1 %v4281_v52 }
 0xd00   : > { %v7115_v58 = vpop.f32.mrb[36].mxu0 }
 0xd01   : > { %v4193_v3 = vpop.f32.mrb[37].mxu0  ;;  %v4262_v7 = vmax.f32 %v7115_v58, 0.0 }
 0xd02   : > { %v7116_v4 = vpop.f32.mrb[38].mxu0  ;;  %v4260_v10 = vmax.f32 %v4193_v3, 0.0 }
 0xd03   : > { %v4263_v45 = vmax.f32 %v7116_v4, 0.0  ;;  %v4196_v8 = vpop.f32.mrb[39].mxu0 }
 0xd04   : > { %v4261_v11 = vmax.f32 %v4196_v8, 0.0  ;;  %v7465_v8 = vld [vmem:[#allocation5 + $0x590] sm:$0xff]  }
 0xd05   : > { %v4283_v12 = vpack.c.bf16 %v4263_v45, %v4262_v7 }
 0xd06   : > { %v4282_v15 = vpack.c.bf16 %v4261_v11, %v4260_v10  ;;  %v7466_v10 = vld [vmem:[#allocation5 + $0x550] sm:$0xff]   ;;  %v7467_v11 = vld [vmem:[#allocation5 + $0x598] sm:$0xff]  }
 0xd08   : > { %7161 = vmatprep.mubr.bf16.mxu1 %v4282_v15  ;;  %v7470_v15 = vld [vmem:[#allocation5 + $0x560] sm:$0xff]  }
 0xd09   : > { %7162 = vmatmul.mubr.bf16.gmra.mrb[4].mxu1 %v4283_v12 }
 0xd10   : > { %v7119_v17 = vpop.f32.mrb[40].mxu0 }
 0xd11   : > { %v4209_v20 = vpop.f32.mrb[41].mxu0  ;;  %v4266_v21 = vmax.f32 %v7119_v17, 0.0  ;;  %v7471_v17 = vld [vmem:[#allocation5 + $0x5a8] sm:$0xff]  }
 0xd12   : > { %v7120_v16 = vpop.f32.mrb[42].mxu0  ;;  %v4264_v29 = vmax.f32 %v4209_v20, 0.0  ;;  %v7472_v20 = vld [vmem:[#allocation5 + $0x568] sm:$0xff]  }
 0xd13   : > { %v4267_v25 = vmax.f32 %v7120_v16, 0.0  ;;  %v4212_v26 = vpop.f32.mrb[43].mxu0  ;;  %v7473_v16 = vld [vmem:[#allocation5 + $0x5b0] sm:$0xff]  }
 0xd14   : > { %v4265_v30 = vmax.f32 %v4212_v26, 0.0 }
 0xd15   : > { %v4285_v24 = vpack.c.bf16 %v4267_v25, %v4266_v21 }
 0xd16   : > { %v4284_v31 = vpack.c.bf16 %v4265_v30, %v4264_v29  ;;  %v7474_v29 = vld [vmem:[#allocation5 + $0x570] sm:$0xff]  }
 0xd18   : > { %7165 = vmatprep.mubr.bf16.mxu1 %v4284_v31 }
 0xd19   : > { %7166 = vmatmul.mubr.bf16.gmra.mrb[8].mxu1 %v4285_v24 }
 0xd20   : > { %v7123_v9 = vpop.f32.mrb[44].mxu0 }
 0xd21   : > { %v4225_v36 = vpop.f32.mrb[45].mxu0  ;;  %v4270_v38 = vmax.f32 %v7123_v9, 0.0 }
 0xd22   : > { %v7124_v37 = vpop.f32.mrb[46].mxu0  ;;  %v4268_v46 = vmax.f32 %v4225_v36, 0.0 }
 0xd23   : > { %v4271_v39 = vmax.f32 %v7124_v37, 0.0  ;;  %v4228_v40 = vpop.f32.mrb[47].mxu0 }
 0xd24   : > { %v4269_v51 = vmax.f32 %v4228_v40, 0.0 }
 0xd25   : > { %v4287_v52 = vpack.c.bf16 %v4271_v39, %v4270_v38  ;;  %v7475_v39 = vld [vmem:[#allocation5 + $0x5b8] sm:$0xff]  }
 0xd26   : > { %v4286_v55 = vpack.c.bf16 %v4269_v51, %v4268_v46 }
 0xd28   : > { %7169 = vmatprep.mubr.bf16.mxu1 %v4286_v55 }
 0xd29   : > { %7170 = vmatmul.mubr.bf16.gmra.mrb[12].mxu1 %v4287_v52 }
 0xd2a   : > { %7189 = vmatprep.mubr.bf16.mxu1 %v7959_v19 }
 0xd31   : > { %7190 = vmatmul.mubr.bf16.vlgmr.msra.gmra.mrb[16].mxu1 %v7957_v18 }
 0xd32   : > { %7193 = vmatprep.mubr.bf16.mxu1 %v7966_v35 }
 0xd39   : > { %7194 = vmatmul.mubr.bf16.gmra.mrb[20].mxu1 %v7964_v33 }
 0xd3a   : > { %7197 = vmatprep.mubr.bf16.mxu1 %v7972_v50 }
 0xd41   : > { %7198 = vmatmul.mubr.bf16.gmra.mrb[24].mxu1 %v7970_v49 }
 0xd42   : > { %7201 = vmatprep.mubr.bf16.mxu1 %v7981_v0 }
 0xd49   : > { %7202 = vmatmul.mubr.bf16.gmra.mrb[28].mxu1 %v7979_v63 }
 0xd4a   : > { %7205 = vmatprep.mubr.bf16.mxu1 %v7988_v14 }
 0xd51   : > { %7206 = vmatmul.mubr.bf16.gmra.mrb[32].mxu1 %v7986_v13 }
 0xd52   : > { %7209 = vmatprep.mubr.bf16.mxu1 %v7994_v28 }
 0xd59   : > { %7210 = vmatmul.mubr.bf16.gmra.mrb[36].mxu1 %v7992_v27 }
 0xd5a   : > { %7213 = vmatprep.mubr.bf16.mxu1 %v8000_v44 }
 0xd61   : > { %7214 = vmatmul.mubr.bf16.gmra.mrb[40].mxu1 %v7998_v43 }
 0xd62   : > { %7217 = vmatprep.mubr.bf16.mxu1 %v8006_v62  ;;  %v7461_v62 = vld [vmem:[#allocation5 + $0x580] sm:$0xff]  }
 0xd63   : > { %6485 = vmatprep.subr.bf16.mxu1 %v7461_v62 }
 0xd64   : > { %6486 = vmatpush3.bf16.msra.mxu1 %v7462_v56 }
 0xd69   : > { %7218 = vmatmul.mubr.bf16.gmra.mrb[44].mxu1 %v8004_v61 }
 0xd8c   : > { %v7143_v18 = vpop.f32.mrb[240].mxu1 }
 0xd8d   : > { %v4386_v19 = vpop.f32.mrb[241].mxu1 }
 0xd8e   : > { %v7144_v33 = vpop.f32.mrb[242].mxu1 }
 0xd8f   : > { %v8101_v35 = vpack.c.bf16 %v7144_v33, %v7143_v18  ;;  %v4389_v49 = vpop.f32.mrb[243].mxu1 }
 0xd90   : > { %v4513_v50 = vpack.c.bf16 %v4389_v49, %v4386_v19 }
 0xd92   : > { %4753 = vmatprep.mubr.bf16.mxu0 %v4513_v50  ;;  %5251 = vmatprep.mubr.bf16.mxu1 %v4513_v50 }
 0xd93   : > { %4754 = vmatmul.mubr.bf16.vlgmr.msra.gmra.mrb[48].mxu0 %v7879_v6 }
 0xd94   : > { %4761 = vmatprep.mubr.bf16.mxu0 %v8101_v35 }
 0xd9b   : > { %4762 = vmatmul.mubr.bf16.gmra.mrb[52].mxu0 %v7886_v22 }
 0xd9c   : > { %v7147_v63 = vpop.f32.mrb[244].mxu1 }
 0xd9d   : > { %v4402_v0 = vpop.f32.mrb[245].mxu1 }
 0xd9e   : > { %v7148_v13 = vpop.f32.mrb[246].mxu1 }
 0xd9f   : > { %v8106_v14 = vpack.c.bf16 %v7148_v13, %v7147_v63  ;;  %v4405_v27 = vpop.f32.mrb[247].mxu1 }
 0xda0   : > { %v8108_v28 = vpack.c.bf16 %v4405_v27, %v4402_v0 }
 0xda2   : > { %4769 = vmatprep.mubr.bf16.mxu0 %v8108_v28 }
 0xda3   : > { %4770 = vmatmul.mubr.bf16.gmra.mrb[56].mxu0 %v7888_v23  ;;  %v7463_v23 = vld [vmem:[#allocation5 + $0x588] sm:$0xff]  }
 0xda4   : > { %4777 = vmatprep.mubr.bf16.mxu0 %v8106_v14  ;;  %6487 = vmatprep.subr.bf16.mxu1 %v7463_v23 }
 0xdab   : > { %4778 = vmatmul.mubr.bf16.gmra.mrb[60].mxu0 %v7896_v32  ;;  %v7464_v32 = vld [vmem:[#allocation5 + $0x548] sm:$0xff]  }
 0xdac   : > { %v7151_v6 = vpop.f32.mrb[248].mxu1  ;;  %6488 = vmatpush3.bf16.msra.mxu1 %v7464_v32 }
 0xdad   : > { %v4418_v43 = vpop.f32.mrb[249].mxu1  ;;  %6489 = vmatprep.subr.bf16.mxu1 %v7465_v8 }
 0xdae   : > { %v7152_v44 = vpop.f32.mrb[250].mxu1 }
 0xdaf   : > { %v8114_v22 = vpack.c.bf16 %v7152_v44, %v7151_v6  ;;  %v4421_v61 = vpop.f32.mrb[251].mxu1 }
 0xdb0   : > { %v8116_v57 = vpack.c.bf16 %v4421_v61, %v4418_v43  ;;  %6490 = vmatpush3.bf16.msra.mxu1 %v7466_v10 }
 0xdb1   : > { %6491 = vmatprep.subr.bf16.mxu1 %v7467_v11 }
 0xdb2   : > { %4785 = vmatprep.mubr.bf16.mxu0 %v8116_v57 }
 0xdb3   : > { %4786 = vmatmul.mubr.bf16.gmra.mrb[64].mxu0 %v7898_v34  ;;  %v7468_v34 = vld [vmem:[#allocation5 + $0x558] sm:$0xff]  }
 0xdb4   : > { %4793 = vmatprep.mubr.bf16.mxu0 %v8114_v22  ;;  %6492 = vmatpush3.bf16.msra.mxu1 %v7468_v34 }
 0xdbb   : > { %4794 = vmatmul.mubr.bf16.gmra.mrb[68].mxu0 %v7906_v41  ;;  %v7469_v41 = vld [vmem:[#allocation5 + $0x5a0] sm:$0xff]  }
 0xdbc   : > { %v7155_v58 = vpop.f32.mrb[252].mxu1  ;;  %6493 = vmatprep.subr.bf16.mxu1 %v7469_v41 }
 0xdbd   : > { %v4434_v3 = vpop.f32.mrb[253].mxu1  ;;  %6494 = vmatpush3.bf16.msra.mxu1 %v7470_v15 }
 0xdbe   : > { %v7156_v4 = vpop.f32.mrb[254].mxu1  ;;  %6495 = vmatprep.subr.bf16.mxu1 %v7471_v17 }
 0xdbf   : > { %v8122_v7 = vpack.c.bf16 %v7156_v4, %v7155_v58  ;;  %v4437_v45 = vpop.f32.mrb[255].mxu1 }
 0xdc0   : > { %v8124_v12 = vpack.c.bf16 %v4437_v45, %v4434_v3 }
 0xdc1   : > { %6496 = vmatpush3.bf16.msra.mxu1 %v7472_v20 }
 0xdc2   : > { %4801 = vmatprep.mubr.bf16.mxu0 %v8124_v12  ;;  %6497 = vmatprep.subr.bf16.mxu1 %v7473_v16 }
 0xdc3   : > { %4802 = vmatmul.mubr.bf16.gmra.mrb[72].mxu0 %v7908_v42 }
 0xdc4   : > { %4809 = vmatprep.mubr.bf16.mxu0 %v8122_v7 }
 0xdc5   : > { %6498 = vmatpush3.bf16.msra.mxu1 %v7474_v29 }
 0xdc6   : > { %6499 = vmatprep.subr.bf16.mxu1 %v7475_v39 }
 0xdcb   : > { %4810 = vmatmul.mubr.bf16.gmra.mrb[76].mxu0 %v7916_v47 }
 0xdcc   : > { %v7159_v21 = vpop.f32.mrb[0].mxu1 }
 0xdcd   : > { %v4450_v25 = vpop.f32.mrb[1].mxu1 }
 0xdce   : > { %v7160_v26 = vpop.f32.mrb[2].mxu1 }
 0xdcf   : > { %v8130_v42 = vpack.c.bf16 %v7160_v26, %v7159_v21  ;;  %v4453_v30 = vpop.f32.mrb[3].mxu1 }
 0xdd0   : > { %v8132_v24 = vpack.c.bf16 %v4453_v30, %v4450_v25 }
 0xdd2   : > { %4817 = vmatprep.mubr.bf16.mxu0 %v8132_v24 }
 0xdd3   : > { %4818 = vmatmul.mubr.bf16.gmra.mrb[80].mxu0 %v7918_v48 }
 0xdd4   : > { %4825 = vmatprep.mubr.bf16.mxu0 %v8130_v42 }
 0xddb   : > { %4826 = vmatmul.mubr.bf16.gmra.mrb[84].mxu0 %v7926_v53  ;;  %v7476_v53 = vld [vmem:[#allocation5 + $0x578] sm:$0xff]  }
 0xddc   : > { %v7163_v47 = vpop.f32.mrb[4].mxu1  ;;  %6500 = vmatpush3.bf16.msra.mxu1 %v7476_v53 }
 0xddd   : > { %v4466_v31 = vpop.f32.mrb[5].mxu1 }
 0xdde   : > { %v7164_v9 = vpop.f32.mrb[6].mxu1 }
 0xddf   : > { %v8138_v36 = vpack.c.bf16 %v7164_v9, %v7163_v47  ;;  %v4469_v37 = vpop.f32.mrb[7].mxu1 }
 0xde0   : > { %v8140_v38 = vpack.c.bf16 %v4469_v37, %v4466_v31 }
 0xde2   : > { %4833 = vmatprep.mubr.bf16.mxu0 %v8140_v38 }
 0xde3   : > { %4834 = vmatmul.mubr.bf16.gmra.mrb[88].mxu0 %v7928_v54 }
 0xde4   : > { %4841 = vmatprep.mubr.bf16.mxu0 %v8138_v36 }
 0xdeb   : > { %4842 = vmatmul.mubr.bf16.gmra.mrb[92].mxu0 %v7936_v59 }
 0xdec   : > { %v7167_v48 = vpop.f32.mrb[8].mxu1 }
 0xded   : > { %v4482_v40 = vpop.f32.mrb[9].mxu1 }
 0xdee   : > { %v7168_v46 = vpop.f32.mrb[10].mxu1 }
 0xdef   : > { %v8146_v51 = vpack.c.bf16 %v7168_v46, %v7167_v48  ;;  %v4485_v52 = vpop.f32.mrb[11].mxu1 }
 0xdf0   : > { %v8148_v55 = vpack.c.bf16 %v4485_v52, %v4482_v40 }
 0xdf2   : > { %4849 = vmatprep.mubr.bf16.mxu0 %v8148_v55 }
 0xdf3   : > { %4850 = vmatmul.mubr.bf16.gmra.mrb[96].mxu0 %v7938_v60 }
 0xdf4   : > { %4857 = vmatprep.mubr.bf16.mxu0 %v8146_v51 }
 0xdfb   : > { %4858 = vmatmul.mubr.bf16.gmra.mrb[100].mxu0 %v7946_v1 }
 0xdfc   : > { %v7171_v54 = vpop.f32.mrb[12].mxu1 }
 0xdfd   : > { %v4498_v59 = vpop.f32.mrb[13].mxu1 }
 0xdfe   : > { %v7172_v18 = vpop.f32.mrb[14].mxu1 }
 0xdff   : > { %v8154_v19 = vpack.c.bf16 %v7172_v18, %v7171_v54  ;;  %v4501_v33 = vpop.f32.mrb[15].mxu1 }
 0xe00   : > { %v8156_v49 = vpack.c.bf16 %v4501_v33, %v4498_v59 }
 0xe01   : > { %8371 = vst [vmem:[#allocation11_spill] sm:$0xff] %v8154_v19 }
 0xe02   : > { %4865 = vmatprep.mubr.bf16.mxu0 %v8156_v49 }
 0xe03   : > { %4866 = vmatmul.mubr.bf16.gmra.mrb[104].mxu0 %v7948_v2 }
 0xe04   : > { %4873 = vmatprep.mubr.bf16.mxu0 %v8154_v19  ;;  %v7191_v50 = vpop.f32.mrb[16].mxu1 }
 0xe05   : > { %v4916_v60 = vpop.f32.mrb[17].mxu1 }
 0xe06   : > { %v7192_v63 = vpop.f32.mrb[18].mxu1 }
 0xe07   : > { %v4919_v0 = vpop.f32.mrb[19].mxu1 }
 0xe0b   : > { %4874 = vmatmul.mubr.bf16.gmra.mrb[108].mxu0 %v7954_v5 }
 0xe0c   : > { %v8162_v1 = vpop.f32.mrb[20].mxu1 }
 0xe0d   : > { %v4932_v13 = vpop.f32.mrb[21].mxu1 }
 0xe0e   : > { %v8164_v27 = vpop.f32.mrb[22].mxu1 }
 0xe0f   : > { %v4935_v6 = vpop.f32.mrb[23].mxu1 }
 0xe14   : > { %v8166_v43 = vpop.f32.mrb[24].mxu1 }
 0xe15   : > { %v8168_v44 = vpop.f32.mrb[25].mxu1 }
 0xe16   : > { %v8170_v61 = vpop.f32.mrb[26].mxu1 }
 0xe17   : > { %v8172_v2 = vpop.f32.mrb[27].mxu1 }
 0xe1c   : > { %v8174_v62 = vpop.f32.mrb[28].mxu1 }
 0xe1d   : > { %v8176_v56 = vpop.f32.mrb[29].mxu1 }
 0xe1e   : > { %v8178_v23 = vpop.f32.mrb[30].mxu1 }
 0xe1f   : > { %v8180_v5 = vpop.f32.mrb[31].mxu1 }
 0xe24   : > { %v8182_v32 = vpop.f32.mrb[32].mxu1 }
 0xe25   : > { %v8184_v58 = vpop.f32.mrb[33].mxu1 }
 0xe26   : > { %v8186_v3 = vpop.f32.mrb[34].mxu1 }
 0xe27   : > { %v8188_v4 = vpop.f32.mrb[35].mxu1 }
 0xe2c   : > { %v8190_v45 = vpop.f32.mrb[36].mxu1 }
 0xe2d   : > { %v8192_v8 = vpop.f32.mrb[37].mxu1 }
 0xe2e   : > { %v8194_v10 = vpop.f32.mrb[38].mxu1 }
 0xe2f   : > { %v8196_v11 = vpop.f32.mrb[39].mxu1 }
 0xe34   : > { %v8198_v34 = vpop.f32.mrb[40].mxu1 }
 0xe35   : > { %v8200_v41 = vpop.f32.mrb[41].mxu1 }
 0xe36   : > { %v8202_v15 = vpop.f32.mrb[42].mxu1 }
 0xe37   : > { %v8204_v17 = vpop.f32.mrb[43].mxu1 }
 0xe3c   : > { %v8206_v20 = vpop.f32.mrb[44].mxu1 }
 0xe3d   : > { %8372 = vst [vmem:[#allocation12_spill] sm:$0xff] %v8206_v20  ;;  %v8208_v16 = vpop.f32.mrb[45].mxu1 }
 0xe3e   : > { %v8210_v21 = vpop.f32.mrb[46].mxu1 }
 0xe3f   : > { %8373 = vst [vmem:[#allocation13_spill] sm:$0xff] %v8210_v21  ;;  %v8212_v25 = vpop.f32.mrb[47].mxu1 }
 0xe66   : > { %v6365_v26 = vpop.f32.mrb[48].mxu0 }
 0xe67   : > { %v6366_v29 = vpop.f32.mrb[49].mxu0 }
 0xe68   : > { %v6367_v30 = vadd.f32 %v6366_v29, %v6365_v26  ;;  %v6368_v47 = vpop.f32.mrb[50].mxu0 }
 0xe69   : > { %v6369_v31 = vpop.f32.mrb[51].mxu0 }
 0xe6a   : > { %v4917_v9 = vadd.f32 %v6367_v30, %v4916_v60  ;;  %v6370_v37 = vadd.f32 %v6369_v31, %v6368_v47 }
 0xe6c   : > { %v4920_v48 = vadd.f32 %v6370_v37, %v4919_v0  ;;  %v5043_v39 = vmax.f32 %v4917_v9, 0.0 }
 0xe6e   : > { %v5044_v40 = vmax.f32 %v4920_v48, 0.0  ;;  %v6371_v53 = vpop.f32.mrb[52].mxu0 }
 0xe6f   : > { %v6372_v46 = vpop.f32.mrb[53].mxu0 }
 0xe70   : > { %v5075_v52 = vpack.c.bf16 %v5044_v40, %v5043_v39  ;;  %v6373_v54 = vadd.f32 %v6372_v46, %v6371_v53  ;;  %v6374_v59 = vpop.f32.mrb[54].mxu0 }
 0xe71   : > { %v6375_v18 = vpop.f32.mrb[55].mxu0 }
 0xe72   : > { %v4925_v33 = vadd.f32 %v7191_v50, %v6373_v54  ;;  %v6376_v21 = vadd.f32 %v6375_v18, %v6374_v59  ;;  %5252 = vmatmul.mubr.bf16.vlgmr.msra.gmra.mrb[48].mxu1 %v5075_v52 }
 0xe73   : > { %5259 = vmatprep.mubr.bf16.mxu1 %v8101_v35 }
 0xe74   : > { %v4928_v19 = vadd.f32 %v7192_v63, %v6376_v21  ;;  %v5045_v26 = vmax.f32 %v4925_v33, 0.0 }
 0xe76   : > { %v5046_v29 = vmax.f32 %v4928_v19, 0.0  ;;  %v6377_v20 = vpop.f32.mrb[56].mxu0 }
 0xe77   : > { %v6378_v60 = vpop.f32.mrb[57].mxu0 }
 0xe78   : > { %v5076_v30 = vpack.c.bf16 %v5046_v29, %v5045_v26  ;;  %v6379_v0 = vadd.f32 %v6378_v60, %v6377_v20  ;;  %v6380_v47 = vpop.f32.mrb[58].mxu0 }
 0xe79   : > { %v6381_v31 = vpop.f32.mrb[59].mxu0 }
 0xe7a   : > { %v4933_v9 = vadd.f32 %v6379_v0, %v4932_v13  ;;  %v6382_v37 = vadd.f32 %v6381_v31, %v6380_v47  ;;  %5260 = vmatmul.mubr.bf16.gmra.mrb[52].mxu1 %v5076_v30 }
 0xe7b   : > { %5267 = vmatprep.mubr.bf16.mxu1 %v8108_v28 }
 0xe7c   : > { %v4936_v48 = vadd.f32 %v6382_v37, %v4935_v6  ;;  %v5047_v50 = vmax.f32 %v4933_v9, 0.0 }
 0xe7e   : > { %v5048_v39 = vmax.f32 %v4936_v48, 0.0  ;;  %v6383_v40 = vpop.f32.mrb[60].mxu0 }
 0xe7f   : > { %v6384_v53 = vpop.f32.mrb[61].mxu0 }
 0xe80   : > { %v5077_v35 = vpack.c.bf16 %v5048_v39, %v5047_v50  ;;  %v6385_v63 = vadd.f32 %v6384_v53, %v6383_v40  ;;  %v6386_v21 = vpop.f32.mrb[62].mxu0 }
 0xe81   : > { %v6387_v19 = vpop.f32.mrb[63].mxu0 }
 0xe82   : > { %v4941_v46 = vadd.f32 %v8162_v1, %v6385_v63  ;;  %v6388_v52 = vadd.f32 %v6387_v19, %v6386_v21  ;;  %5268 = vmatmul.mubr.bf16.gmra.mrb[56].mxu1 %v5077_v35 }
 0xe83   : > { %5275 = vmatprep.mubr.bf16.mxu1 %v8106_v14 }
 0xe84   : > { %v4944_v13 = vadd.f32 %v8164_v27, %v6388_v52  ;;  %v5049_v20 = vmax.f32 %v4941_v46, 0.0 }
 0xe86   : > { %v5050_v54 = vmax.f32 %v4944_v13, 0.0  ;;  %v6389_v28 = vpop.f32.mrb[64].mxu0 }
 0xe87   : > { %v6390_v6 = vpop.f32.mrb[65].mxu0 }
 0xe88   : > { %v5078_v59 = vpack.c.bf16 %v5050_v54, %v5049_v20  ;;  %v6391_v18 = vadd.f32 %v6390_v6, %v6389_v28  ;;  %v6392_v33 = vpop.f32.mrb[66].mxu0 }
 0xe89   : > { %v6393_v26 = vpop.f32.mrb[67].mxu0 }
 0xe8a   : > { %v4949_v29 = vadd.f32 %v6391_v18, %v8168_v44  ;;  %v6394_v60 = vadd.f32 %v6393_v26, %v6392_v33  ;;  %5276 = vmatmul.mubr.bf16.gmra.mrb[60].mxu1 %v5078_v59 }
 0xe8b   : > { %5283 = vmatprep.mubr.bf16.mxu1 %v8116_v57 }
 0xe8c   : > { %v4952_v1 = vadd.f32 %v6394_v60, %v8172_v2  ;;  %v5051_v30 = vmax.f32 %v4949_v29, 0.0 }
 0xe8e   : > { %v5052_v14 = vmax.f32 %v4952_v1, 0.0  ;;  %v6395_v0 = vpop.f32.mrb[68].mxu0 }
 0xe8f   : > { %v6396_v27 = vpop.f32.mrb[69].mxu0 }
 0xe90   : > { %v5079_v47 = vpack.c.bf16 %v5052_v14, %v5051_v30  ;;  %v6397_v31 = vadd.f32 %v6396_v27, %v6395_v0  ;;  %v6398_v9 = vpop.f32.mrb[70].mxu0 }
 0xe91   : > { %v6399_v37 = vpop.f32.mrb[71].mxu0 }
 0xe92   : > { %v4957_v48 = vadd.f32 %v8166_v43, %v6397_v31  ;;  %v6400_v50 = vadd.f32 %v6399_v37, %v6398_v9  ;;  %5284 = vmatmul.mubr.bf16.gmra.mrb[64].mxu1 %v5079_v47 }
 0xe93   : > { %5291 = vmatprep.mubr.bf16.mxu1 %v8114_v22 }
 0xe94   : > { %v4960_v44 = vadd.f32 %v8170_v61, %v6400_v50  ;;  %v5053_v39 = vmax.f32 %v4957_v48, 0.0 }
 0xe96   : > { %v5054_v57 = vmax.f32 %v4960_v44, 0.0  ;;  %v6401_v40 = vpop.f32.mrb[72].mxu0 }
 0xe97   : > { %v6402_v2 = vpop.f32.mrb[73].mxu0 }
 0xe98   : > { %v5080_v53 = vpack.c.bf16 %v5054_v57, %v5053_v39  ;;  %v6403_v35 = vadd.f32 %v6402_v2, %v6401_v40  ;;  %v6404_v63 = vpop.f32.mrb[74].mxu0 }
 0xe99   : > { %v6405_v21 = vpop.f32.mrb[75].mxu0 }
 0xe9a   : > { %v4965_v19 = vadd.f32 %v6403_v35, %v8176_v56  ;;  %v6406_v46 = vadd.f32 %v6405_v21, %v6404_v63  ;;  %5292 = vmatmul.mubr.bf16.gmra.mrb[68].mxu1 %v5080_v53 }
 0xe9b   : > { %5299 = vmatprep.mubr.bf16.mxu1 %v8124_v12 }
 0xe9c   : > { %v4968_v43 = vadd.f32 %v6406_v46, %v8180_v5  ;;  %v5055_v52 = vmax.f32 %v4965_v19, 0.0 }
 0xe9e   : > { %v5056_v22 = vmax.f32 %v4968_v43, 0.0  ;;  %v6407_v13 = vpop.f32.mrb[76].mxu0 }
 0xe9f   : > { %v6408_v61 = vpop.f32.mrb[77].mxu0 }
 0xea0   : > { %v5081_v20 = vpack.c.bf16 %v5056_v22, %v5055_v52  ;;  %v6409_v54 = vadd.f32 %v6408_v61, %v6407_v13  ;;  %v6410_v28 = vpop.f32.mrb[78].mxu0 }
 0xea1   : > { %v6411_v6 = vpop.f32.mrb[79].mxu0 }
 0xea2   : > { %v4973_v59 = vadd.f32 %v8174_v62, %v6409_v54  ;;  %v6412_v18 = vadd.f32 %v6411_v6, %v6410_v28  ;;  %5300 = vmatmul.mubr.bf16.gmra.mrb[72].mxu1 %v5081_v20 }
 0xea3   : > { %5307 = vmatprep.mubr.bf16.mxu1 %v8122_v7 }
 0xea4   : > { %v4976_v56 = vadd.f32 %v8178_v23, %v6412_v18  ;;  %v5057_v33 = vmax.f32 %v4973_v59, 0.0 }
 0xea6   : > { %v5058_v12 = vmax.f32 %v4976_v56, 0.0  ;;  %v6413_v26 = vpop.f32.mrb[80].mxu0 }
 0xea7   : > { %v6414_v5 = vpop.f32.mrb[81].mxu0 }
 0xea8   : > { %v5082_v29 = vpack.c.bf16 %v5058_v12, %v5057_v33  ;;  %v6415_v60 = vadd.f32 %v6414_v5, %v6413_v26  ;;  %v6416_v1 = vpop.f32.mrb[82].mxu0 }
 0xea9   : > { %v6417_v30 = vpop.f32.mrb[83].mxu0 }
 0xeaa   : > { %v4981_v14 = vadd.f32 %v6415_v60, %v8184_v58  ;;  %v6418_v0 = vadd.f32 %v6417_v30, %v6416_v1  ;;  %5308 = vmatmul.mubr.bf16.gmra.mrb[76].mxu1 %v5082_v29 }
 0xeab   : > { %5315 = vmatprep.mubr.bf16.mxu1 %v8132_v24 }
 0xeac   : > { %v4984_v62 = vadd.f32 %v6418_v0, %v8188_v4  ;;  %v5059_v27 = vmax.f32 %v4981_v14, 0.0 }
 0xeae   : > { %v5060_v7 = vmax.f32 %v4984_v62, 0.0  ;;  %v6419_v47 = vpop.f32.mrb[84].mxu0 }
 0xeaf   : > { %v6420_v23 = vpop.f32.mrb[85].mxu0 }
 0xeb0   : > { %v5083_v31 = vpack.c.bf16 %v5060_v7, %v5059_v27  ;;  %v6421_v9 = vadd.f32 %v6420_v23, %v6419_v47  ;;  %v6422_v37 = vpop.f32.mrb[86].mxu0 }
 0xeb1   : > { %v6423_v48 = vpop.f32.mrb[87].mxu0 }
 0xeb2   : > { %v4989_v50 = vadd.f32 %v8182_v32, %v6421_v9  ;;  %v6424_v44 = vadd.f32 %v6423_v48, %v6422_v37  ;;  %5316 = vmatmul.mubr.bf16.gmra.mrb[80].mxu1 %v5083_v31 }
 0xeb3   : > { %5323 = vmatprep.mubr.bf16.mxu1 %v8130_v42 }
 0xeb4   : > { %v4992_v58 = vadd.f32 %v8186_v3, %v6424_v44  ;;  %v5061_v39 = vmax.f32 %v4989_v50, 0.0 }
 0xeb6   : > { %v5062_v24 = vmax.f32 %v4992_v58, 0.0  ;;  %v6425_v57 = vpop.f32.mrb[88].mxu0 }
 0xeb7   : > { %v6426_v4 = vpop.f32.mrb[89].mxu0 }
 0xeb8   : > { %v5084_v40 = vpack.c.bf16 %v5062_v24, %v5061_v39  ;;  %v6427_v2 = vadd.f32 %v6426_v4, %v6425_v57  ;;  %v6428_v53 = vpop.f32.mrb[90].mxu0  ;;  %v8374_v57 = vld [vmem:[#allocation12_spill] sm:$0xff] }
 0xeb9   : > { %v6429_v35 = vpop.f32.mrb[91].mxu0 }
 0xeba   : > { %v4997_v63 = vadd.f32 %v6427_v2, %v8192_v8  ;;  %v6430_v21 = vadd.f32 %v6429_v35, %v6428_v53  ;;  %5324 = vmatmul.mubr.bf16.gmra.mrb[84].mxu1 %v5084_v40  ;;  %v8376_v2 = vld [vmem:[#allocation13_spill] sm:$0xff] }
 0xebb   : > { %5331 = vmatprep.mubr.bf16.mxu1 %v8140_v38 }
 0xebc   : > { %v5000_v32 = vadd.f32 %v6430_v21, %v8196_v11  ;;  %v5063_v19 = vmax.f32 %v4997_v63, 0.0 }
 0xebe   : > { %v5064_v42 = vmax.f32 %v5000_v32, 0.0  ;;  %v6431_v46 = vpop.f32.mrb[92].mxu0 }
 0xebf   : > { %v6432_v3 = vpop.f32.mrb[93].mxu0 }
 0xec0   : > { %v5085_v43 = vpack.c.bf16 %v5064_v42, %v5063_v19  ;;  %v6433_v52 = vadd.f32 %v6432_v3, %v6431_v46  ;;  %v6434_v22 = vpop.f32.mrb[94].mxu0 }
 0xec1   : > { %v6435_v13 = vpop.f32.mrb[95].mxu0 }
 0xec2   : > { %v5005_v61 = vadd.f32 %v8190_v45, %v6433_v52  ;;  %v6436_v20 = vadd.f32 %v6435_v13, %v6434_v22  ;;  %5332 = vmatmul.mubr.bf16.gmra.mrb[88].mxu1 %v5085_v43 }
 0xec3   : > { %5339 = vmatprep.mubr.bf16.mxu1 %v8138_v36 }
 0xec4   : > { %v5008_v8 = vadd.f32 %v8194_v10, %v6436_v20  ;;  %v5065_v54 = vmax.f32 %v5005_v61, 0.0 }
 0xec6   : > { %v5066_v38 = vmax.f32 %v5008_v8, 0.0  ;;  %v6437_v28 = vpop.f32.mrb[96].mxu0 }
 0xec7   : > { %v6438_v11 = vpop.f32.mrb[97].mxu0 }
 0xec8   : > { %v5086_v6 = vpack.c.bf16 %v5066_v38, %v5065_v54  ;;  %v6439_v59 = vadd.f32 %v6438_v11, %v6437_v28  ;;  %v6440_v18 = vpop.f32.mrb[98].mxu0 }
 0xec9   : > { %v6441_v56 = vpop.f32.mrb[99].mxu0 }
 0xeca   : > { %v5013_v33 = vadd.f32 %v6439_v59, %v8200_v41  ;;  %v6442_v12 = vadd.f32 %v6441_v56, %v6440_v18  ;;  %5340 = vmatmul.mubr.bf16.gmra.mrb[92].mxu1 %v5086_v6 }
 0xecb   : > { %5347 = vmatprep.mubr.bf16.mxu1 %v8148_v55 }
 0xecc   : > { %v5016_v45 = vadd.f32 %v6442_v12, %v8204_v17  ;;  %v5067_v26 = vmax.f32 %v5013_v33, 0.0 }
 0xece   : > { %v5068_v36 = vmax.f32 %v5016_v45, 0.0  ;;  %v6443_v5 = vpop.f32.mrb[100].mxu0 }
 0xecf   : > { %v6444_v10 = vpop.f32.mrb[101].mxu0 }
 0xed0   : > { %v5087_v29 = vpack.c.bf16 %v5068_v36, %v5067_v26  ;;  %v6445_v60 = vadd.f32 %v6444_v10, %v6443_v5  ;;  %v6446_v1 = vpop.f32.mrb[102].mxu0 }
 0xed1   : > { %v6447_v30 = vpop.f32.mrb[103].mxu0 }
 0xed2   : > { %v5021_v14 = vadd.f32 %v8198_v34, %v6445_v60  ;;  %v6448_v0 = vadd.f32 %v6447_v30, %v6446_v1  ;;  %5348 = vmatmul.mubr.bf16.gmra.mrb[96].mxu1 %v5087_v29 }
 0xed3   : > { %5355 = vmatprep.mubr.bf16.mxu1 %v8146_v51 }
 0xed4   : > { %v5024_v41 = vadd.f32 %v8202_v15, %v6448_v0  ;;  %v5069_v62 = vmax.f32 %v5021_v14, 0.0 }
 0xed6   : > { %v5070_v55 = vmax.f32 %v5024_v41, 0.0  ;;  %v6449_v27 = vpop.f32.mrb[104].mxu0 }
 0xed7   : > { %v6450_v17 = vpop.f32.mrb[105].mxu0 }
 0xed8   : > { %v5088_v7 = vpack.c.bf16 %v5070_v55, %v5069_v62  ;;  %v6451_v47 = vadd.f32 %v6450_v17, %v6449_v27  ;;  %v6452_v23 = vpop.f32.mrb[106].mxu0 }
 0xed9   : > { %v6453_v31 = vpop.f32.mrb[107].mxu0 }
 0xeda   : > { %v5029_v9 = vadd.f32 %v6451_v47, %v8208_v16  ;;  %v6454_v37 = vadd.f32 %v6453_v31, %v6452_v23  ;;  %5356 = vmatmul.mubr.bf16.gmra.mrb[100].mxu1 %v5088_v7  ;;  %v8375_v16 = vld [vmem:[#allocation11_spill] sm:$0xff] }
 0xedb   : > { %5363 = vmatprep.mubr.bf16.mxu1 %v8156_v49 }
 0xedc   : > { %v5032_v34 = vadd.f32 %v6454_v37, %v8212_v25  ;;  %v5071_v48 = vmax.f32 %v5029_v9, 0.0 }
 0xede   : > { %v5072_v51 = vmax.f32 %v5032_v34, 0.0  ;;  %v6455_v50 = vpop.f32.mrb[108].mxu0 }
 0xedf   : > { %v6456_v15 = vpop.f32.mrb[109].mxu0 }
 0xee0   : > { %v5089_v44 = vpack.c.bf16 %v5072_v51, %v5071_v48  ;;  %v6457_v58 = vadd.f32 %v6456_v15, %v6455_v50  ;;  %v6458_v39 = vpop.f32.mrb[110].mxu0 }
 0xee1   : > { %v6459_v24 = vpop.f32.mrb[111].mxu0 }
 0xee2   : > { %v5037_v4 = vadd.f32 %v8374_v57, %v6457_v58  ;;  %v6460_v40 = vadd.f32 %v6459_v24, %v6458_v39  ;;  %5364 = vmatmul.mubr.bf16.gmra.mrb[104].mxu1 %v5089_v44 }
 0xee3   : > { %5371 = vmatprep.mubr.bf16.mxu1 %v8375_v16 }
 0xee4   : > { %v5040_v53 = vadd.f32 %v8376_v2, %v6460_v40  ;;  %v5073_v49 = vmax.f32 %v5037_v4, 0.0 }
 0xee6   : > { %v5074_v35 = vmax.f32 %v5040_v53, 0.0 }
 0xee8   : > { %v5090_v25 = vpack.c.bf16 %v5074_v35, %v5073_v49 }
 0xeea   : > { %5372 = vmatmul.mubr.bf16.gmra.mrb[108].mxu1 %v5090_v25 }
 0xf45   : > { %v6501_v63 = vpop.f32.mrb[48].mxu1 }
 0xf46   : > { %v6502_v21 = vpop.f32.mrb[49].mxu1 }
 0xf47   : > { %v6503_v32 = vadd.f32 %v6502_v21, %v6501_v63  ;;  %v6504_v19 = vpop.f32.mrb[50].mxu1 }
 0xf48   : > { %v6505_v42 = vpop.f32.mrb[51].mxu1 }
 0xf49   : > { %5380 = vst [vmem:[%s8257_s20] sm:$0xff] %v6503_v32  ;;  %v6506_v46 = vadd.f32 %v6505_v42, %v6504_v19 }
 0xf4b   : > { %5381 = vst [vmem:[%s8257_s20 + $0x8] sm:$0xff] %v6506_v46 }
 0xf4d   : > { %v6507_v3 = vpop.f32.mrb[52].mxu1 }
 0xf4e   : > { %v6508_v43 = vpop.f32.mrb[53].mxu1 }
 0xf4f   : > { %v6509_v52 = vadd.f32 %v6508_v43, %v6507_v3  ;;  %v6510_v22 = vpop.f32.mrb[54].mxu1 }
 0xf50   : > { %v6511_v13 = vpop.f32.mrb[55].mxu1 }
 0xf51   : > { %5382 = vst [vmem:[%s8257_s20 + $0x10] sm:$0xff] %v6509_v52  ;;  %v6512_v61 = vadd.f32 %v6511_v13, %v6510_v22 }
 0xf53   : > { %5383 = vst [vmem:[%s8257_s20 + $0x18] sm:$0xff] %v6512_v61 }
 0xf55   : > { %v6513_v20 = vpop.f32.mrb[56].mxu1 }
 0xf56   : > { %v6514_v8 = vpop.f32.mrb[57].mxu1 }
 0xf57   : > { %v6515_v54 = vadd.f32 %v6514_v8, %v6513_v20  ;;  %v6516_v38 = vpop.f32.mrb[58].mxu1 }
 0xf58   : > { %v6517_v28 = vpop.f32.mrb[59].mxu1 }
 0xf59   : > { %5384 = vst [vmem:[%s8257_s20 + $0x20] sm:$0xff] %v6515_v54  ;;  %v6518_v11 = vadd.f32 %v6517_v28, %v6516_v38 }
 0xf5b   : > { %5385 = vst [vmem:[%s8257_s20 + $0x28] sm:$0xff] %v6518_v11 }
 0xf5d   : > { %v6519_v6 = vpop.f32.mrb[60].mxu1 }
 0xf5e   : > { %v6520_v59 = vpop.f32.mrb[61].mxu1 }
 0xf5f   : > { %v6521_v18 = vadd.f32 %v6520_v59, %v6519_v6  ;;  %v6522_v56 = vpop.f32.mrb[62].mxu1 }
 0xf60   : > { %v6523_v33 = vpop.f32.mrb[63].mxu1 }
 0xf61   : > { %5386 = vst [vmem:[%s8257_s20 + $0x30] sm:$0xff] %v6521_v18  ;;  %v6524_v12 = vadd.f32 %v6523_v33, %v6522_v56 }
 0xf63   : > { %5387 = vst [vmem:[%s8257_s20 + $0x38] sm:$0xff] %v6524_v12 }
 0xf65   : > { %v6525_v45 = vpop.f32.mrb[64].mxu1 }
 0xf66   : > { %v6526_v26 = vpop.f32.mrb[65].mxu1 }
 0xf67   : > { %v6527_v36 = vadd.f32 %v6526_v26, %v6525_v45  ;;  %v6528_v5 = vpop.f32.mrb[66].mxu1 }
 0xf68   : > { %v6529_v10 = vpop.f32.mrb[67].mxu1 }
 0xf69   : > { %5388 = vst [vmem:[%s8257_s20 + $0x40] sm:$0xff] %v6527_v36  ;;  %v6530_v29 = vadd.f32 %v6529_v10, %v6528_v5 }
 0xf6b   : > { %5389 = vst [vmem:[%s8257_s20 + $0x48] sm:$0xff] %v6530_v29 }
 0xf6d   : > { %v6531_v60 = vpop.f32.mrb[68].mxu1 }
 0xf6e   : > { %v6532_v1 = vpop.f32.mrb[69].mxu1 }
 0xf6f   : > { %v6533_v30 = vadd.f32 %v6532_v1, %v6531_v60  ;;  %v6534_v14 = vpop.f32.mrb[70].mxu1 }
 0xf70   : > { %v6535_v0 = vpop.f32.mrb[71].mxu1 }
 0xf71   : > { %5390 = vst [vmem:[%s8257_s20 + $0x50] sm:$0xff] %v6533_v30  ;;  %v6536_v41 = vadd.f32 %v6535_v0, %v6534_v14 }
 0xf73   : > { %5391 = vst [vmem:[%s8257_s20 + $0x58] sm:$0xff] %v6536_v41 }
 0xf75   : > { %v6537_v62 = vpop.f32.mrb[72].mxu1 }
 0xf76   : > { %v6538_v55 = vpop.f32.mrb[73].mxu1 }
 0xf77   : > { %v6539_v27 = vadd.f32 %v6538_v55, %v6537_v62  ;;  %v6540_v17 = vpop.f32.mrb[74].mxu1 }
 0xf78   : > { %v6541_v7 = vpop.f32.mrb[75].mxu1 }
 0xf79   : > { %5392 = vst [vmem:[%s8257_s20 + $0x60] sm:$0xff] %v6539_v27  ;;  %v6542_v47 = vadd.f32 %v6541_v7, %v6540_v17 }
 0xf7b   : > { %5393 = vst [vmem:[%s8257_s20 + $0x68] sm:$0xff] %v6542_v47 }
 0xf7d   : > { %v6543_v23 = vpop.f32.mrb[76].mxu1 }
 0xf7e   : > { %v6544_v31 = vpop.f32.mrb[77].mxu1 }
 0xf7f   : > { %v6545_v9 = vadd.f32 %v6544_v31, %v6543_v23  ;;  %v6546_v37 = vpop.f32.mrb[78].mxu1 }
 0xf80   : > { %v6547_v34 = vpop.f32.mrb[79].mxu1 }
 0xf81   : > { %5394 = vst [vmem:[%s8257_s20 + $0x70] sm:$0xff] %v6545_v9  ;;  %v6548_v48 = vadd.f32 %v6547_v34, %v6546_v37 }
 0xf83   : > { %5395 = vst [vmem:[%s8257_s20 + $0x78] sm:$0xff] %v6548_v48 }
 0xf85   : > { %v6549_v51 = vpop.f32.mrb[80].mxu1 }
 0xf86   : > { %v6550_v50 = vpop.f32.mrb[81].mxu1 }
 0xf87   : > { %v6551_v15 = vadd.f32 %v6550_v50, %v6549_v51  ;;  %v6552_v44 = vpop.f32.mrb[82].mxu1 }
 0xf88   : > { %v6553_v58 = vpop.f32.mrb[83].mxu1 }
 0xf89   : > { %5396 = vst [vmem:[%s8257_s20 + $0x80] sm:$0xff] %v6551_v15  ;;  %v6554_v39 = vadd.f32 %v6553_v58, %v6552_v44 }
 0xf8b   : > { %5397 = vst [vmem:[%s8257_s20 + $0x88] sm:$0xff] %v6554_v39 }
 0xf8d   : > { %v6555_v24 = vpop.f32.mrb[84].mxu1 }
 0xf8e   : > { %v6556_v57 = vpop.f32.mrb[85].mxu1 }
 0xf8f   : > { %v6557_v4 = vadd.f32 %v6556_v57, %v6555_v24  ;;  %v6558_v40 = vpop.f32.mrb[86].mxu1 }
 0xf90   : > { %v6559_v16 = vpop.f32.mrb[87].mxu1 }
 0xf91   : > { %5398 = vst [vmem:[%s8257_s20 + $0x90] sm:$0xff] %v6557_v4  ;;  %v6560_v2 = vadd.f32 %v6559_v16, %v6558_v40 }
 0xf93   : > { %5399 = vst [vmem:[%s8257_s20 + $0x98] sm:$0xff] %v6560_v2 }
 0xf95   : > { %v6561_v53 = vpop.f32.mrb[88].mxu1 }
 0xf96   : > { %v6562_v49 = vpop.f32.mrb[89].mxu1 }
 0xf97   : > { %v6563_v35 = vadd.f32 %v6562_v49, %v6561_v53  ;;  %v6564_v25 = vpop.f32.mrb[90].mxu1 }
 0xf98   : > { %v6565_v63 = vpop.f32.mrb[91].mxu1 }
 0xf99   : > { %5400 = vst [vmem:[%s8257_s20 + $0xa0] sm:$0xff] %v6563_v35  ;;  %v6566_v21 = vadd.f32 %v6565_v63, %v6564_v25 }
 0xf9b   : > { %5401 = vst [vmem:[%s8257_s20 + $0xa8] sm:$0xff] %v6566_v21 }
 0xf9d   : > { %v6567_v32 = vpop.f32.mrb[92].mxu1 }
 0xf9e   : > { %v6568_v19 = vpop.f32.mrb[93].mxu1 }
 0xf9f   : > { %v6569_v42 = vadd.f32 %v6568_v19, %v6567_v32  ;;  %v6570_v46 = vpop.f32.mrb[94].mxu1 }
 0xfa0   : > { %v6571_v3 = vpop.f32.mrb[95].mxu1 }
 0xfa1   : > { %5402 = vst [vmem:[%s8257_s20 + $0xb0] sm:$0xff] %v6569_v42  ;;  %v6572_v43 = vadd.f32 %v6571_v3, %v6570_v46 }
 0xfa3   : > { %5403 = vst [vmem:[%s8257_s20 + $0xb8] sm:$0xff] %v6572_v43 }
 0xfa5   : > { %v6573_v52 = vpop.f32.mrb[96].mxu1 }
 0xfa6   : > { %v6574_v22 = vpop.f32.mrb[97].mxu1 }
 0xfa7   : > { %v6575_v13 = vadd.f32 %v6574_v22, %v6573_v52  ;;  %v6576_v61 = vpop.f32.mrb[98].mxu1 }
 0xfa8   : > { %v6577_v20 = vpop.f32.mrb[99].mxu1 }
 0xfa9   : > { %5404 = vst [vmem:[%s8257_s20 + $0xc0] sm:$0xff] %v6575_v13  ;;  %v6578_v8 = vadd.f32 %v6577_v20, %v6576_v61 }
 0xfab   : > { %5405 = vst [vmem:[%s8257_s20 + $0xc8] sm:$0xff] %v6578_v8 }
 0xfad   : > { %v6579_v54 = vpop.f32.mrb[100].mxu1 }
 0xfae   : > { %v6580_v38 = vpop.f32.mrb[101].mxu1 }
 0xfaf   : > { %v6581_v28 = vadd.f32 %v6580_v38, %v6579_v54  ;;  %v6582_v11 = vpop.f32.mrb[102].mxu1 }
 0xfb0   : > { %v6583_v6 = vpop.f32.mrb[103].mxu1 }
 0xfb1   : > { %5406 = vst [vmem:[%s8257_s20 + $0xd0] sm:$0xff] %v6581_v28  ;;  %v6584_v59 = vadd.f32 %v6583_v6, %v6582_v11 }
 0xfb3   : > { %5407 = vst [vmem:[%s8257_s20 + $0xd8] sm:$0xff] %v6584_v59 }
 0xfb5   : > { %v6585_v18 = vpop.f32.mrb[104].mxu1 }
 0xfb6   : > { %v6586_v56 = vpop.f32.mrb[105].mxu1 }
 0xfb7   : > { %v6587_v33 = vadd.f32 %v6586_v56, %v6585_v18  ;;  %v6588_v12 = vpop.f32.mrb[106].mxu1 }
 0xfb8   : > { %v6589_v45 = vpop.f32.mrb[107].mxu1 }
 0xfb9   : > { %5408 = vst [vmem:[%s8257_s20 + $0xe0] sm:$0xff] %v6587_v33  ;;  %v6590_v26 = vadd.f32 %v6589_v45, %v6588_v12 }
 0xfbb   : > { %5409 = vst [vmem:[%s8257_s20 + $0xe8] sm:$0xff] %v6590_v26 }
 0xfbd   : > { %v6591_v36 = vpop.f32.mrb[108].mxu1  ;;  %5419 = sbr.rel (!%p8377_p8) target bundleno = 4064 (0xfe0), region = 40 }
 0xfbe   : > { %v6592_v5 = vpop.f32.mrb[109].mxu1 }
 0xfbf   : > { %v6593_v10 = vadd.f32 %v6592_v5, %v6591_v36  ;;  %v6594_v29 = vpop.f32.mrb[110].mxu1 }
 0xfc0   : > { %v6595_v60 = vpop.f32.mrb[111].mxu1 }
 0xfc1   : > { %5410 = vst [vmem:[%s8257_s20 + $0xf0] sm:$0xff] %v6593_v10  ;;  %v6596_v1 = vadd.f32 %v6595_v60, %v6594_v29 }
 0xfc3   : > { %5411 = vst [vmem:[%s8257_s20 + $0xf8] sm:$0xff] %v6596_v1 }
 0xfc4   : > { %s8386_s30 = smov (!%p5422_p9, %s5421_s30), 32 }
 0xfc5   : > { %s8295_s5 = sshll.u32 %s8386_s30, 7 }
 0xfc6   : > { %s5426_s6 = ssub.s32 4096, %s8295_s5 }
 0xfc7   : > { %5427 = vsyncadd %s5413_s23, %s5426_s6  ;;  %p5717_p10 = scmp.ne.s32.totalorder %s8295_s5, 0  ;;  %s5724_s21 = sshll.u32 %s7746_s13, 12 }
 0xfc8   : > { %s8305_s24 = scalar_lea.hbm %s8355_s2, %s5724_s21  ;;  %s5432_s27 = sshll.u32 %s8257_s20, 4  ;;  %s8308_s27 = int_to_ptr.vmem [resolvable:$true] %s5432_s27 }
 0xfc9   : > { %s7629_s28 = scalar_lea.vmem %s8308_s27, %s8295_s5  ;;  %s7707_s26 = smov [#allocation7]  }
 0xfca   : > { %p7630_p1 = scmp.ne.s32.totalorder %s8308_s27, %s7629_s28  ;;  %s7633_s25 = sshll.u32 %s7707_s26, 4  ;;  %s7634_s25 = int_to_ptr.vmem [resolvable:$false] %s7633_s25 }
 0xfcb   : > { %s7635_s13 = scalar_lea.vmem %s7634_s25, 8192  ;;  %p7636_p4 = scmp.lt.s32.totalorder %s8308_s27, %s7634_s25 }
 0xfcc   : > { %p7631_p0 = pnand %p7630_p1, %p5717_p10  ;;  %p7637_p6 = scmp.lt.s32.totalorder %s7635_s13, %s7629_s28 }
 0xfce   : > { %p7632_p7 = pneg %p7631_p0  ;;  %p7638_p11 = por %p7637_p6, %p7636_p4 }
 0xfd0   : > { %p7639_p13 = pnand %p7638_p11, %p7632_p7 }
 0xfd2   : > { %7642 = shalt.err (!%p7639_p13)
}
 0xfd3   : > { %s7643_s19 = scalar_lea.hbm %s8305_s24, %s8295_s5  ;;  %s7647_s8 = scalar_lea.hbm %s8355_s2, 10240 }
 0xfd4   : > { %p7644_p12 = scmp.ne.s32.totalorder %s8305_s24, %s7643_s19  ;;  %p7648_p3 = scmp.lt.u32.totalorder %s8305_s24, %s8355_s2 }
 0xfd5   : > { %p7649_p8 = scmp.lt.u32.totalorder %s7647_s8, %s7643_s19  ;;  %p7651_p1 = scmp.lt.u32.totalorder %s7643_s19, %s8305_s24 }
 0xfd6   : > { %p7645_p2 = pnand %p7644_p12, %p5717_p10 }
 0xfd7   : > { %p7650_p9 = por %p7649_p8, %p7648_p3 }
 0xfd8   : > { %p7646_p5 = pneg %p7645_p2 }
 0xfd9   : > { %p7652_p0 = por %p7651_p1, %p7650_p9 }
 0xfdb   : > { %p7653_p7 = pnand %p7652_p0, %p7646_p5 }
 0xfdd   : > { %7656 = shalt.err (!%p7653_p7)
}
 0xfde   : > { %s7708_s29 = smov 128   ;;  %s7709_s30 = smov 8  }
 0xfdf   : > { %5438 = dma.vmem_to_hbm [thread:$0]  (%p5717_p10), %s8308_s27, %s8295_s5, %s8305_s24, %s5413_s23, %s7708_s29, %s7708_s29, %s7709_s30  }
 0xfe0 PF: > { %p7253_p4 = scmp.ge.s32.totalorder %s7699_s12, 2  ;;  %s5447_s6 = sand.u32 1, %s7687_s9  }
 0xfe1   : > { %p8378_p6 = scmp.ne.s32.totalorder %s8363_s22, 0  ;;  %s5448_s21 = scalar_lea.sflag [#allocation4], %s5447_s6 }
 0xfe3   : > { %p7248_p11 = pnand %p7253_p4, %p8378_p6 }
 0xfe5   : > { %7682 = dma.done.wait (!%p7248_p11), %s5448_s21, 4096  }
 0xfe6   : > { %7684 = vsyncadd (!%p7248_p11), %s5448_s21, 4294963200  ;;  %p16_p13 = scmp.ge.s32.totalorder %s7750_s15, 5   ;;  %s8379_s9 = smov %s7691_s10 }
 0xfe7   : > { %s8380_s10 = smov %s7695_s11  ;;  %s8381_s11 = smov %s7762_s18 }
 0xfe8   : > { %s8382_s12 = smov %s7750_s15  ;;  %18 = sbr.rel (!%p16_p13) target bundleno = 6 (0x6), region = 77 }
 0xfef   :  { %5453 = vsyncpa [#allocation3], 1 }
 0xff0   :  { %5455 = vsyncpa [#allocation3 + $0x1], 1 }
 0xff1   :  { %5456 = vsyncpa [#allocation6], 1 }
 0xff2   :  { %5457 = vsyncpa [#allocation4], 1 }
 0xff3   :  { %5459 = vsyncpa [#allocation4 + $0x1], 1 }

</bundles_post_ra>
